<compile_context>
chip_gen: v5e
topology: v5e:2x2
jax: 0.10.0
libtpu: 0.0.40
codegen_flags: <defaults>
</compile_context>

<pallas_src>
import numpy as np
import jax
import jax.numpy as jnp
from jax.experimental import pallas as pl
from jax.experimental.pallas import tpu as pltpu

# ---- small, module-consistent configuration ----
HIDDEN_DIM = 64
NUM_SEEDS = 8
NUM_HEADS = 8
HEAD_DIM = HIDDEN_DIM // NUM_HEADS
assert HIDDEN_DIM % NUM_HEADS == 0
E_PAD_MULTIPLE = 128          # lane-dense edge padding
GRAPHS_PER_BLOCK = 8          # graphs per grid step (multiple of 8 sublanes)


def _attention_pooling_kernel(feats_ref, mask_ref, qexp_ref, wk_ref, wv_ref,
                              mhead_ref, sel_ref, w1t_ref, b1_ref, w2t_ref,
                              b2_ref, out_ref):
    """One grid step == GRAPHS_PER_BLOCK graphs, no per-head / per-graph loops."""
    G, _, H = feats_ref.shape
    R = qexp_ref.shape[0]          # num_heads * num_seeds
    S = sel_ref.shape[0]           # num_seeds

    feats = feats_ref[...].astype(jnp.float32)             # (G, E, H)

    # Grid-invariant operands broadcast once per step (hoisted, not in a loop).
    wk_b = jnp.broadcast_to(wk_ref[...], (G, H, H))
    wv_b = jnp.broadcast_to(wv_ref[...], (G, H, H))
    q_b = jnp.broadcast_to(qexp_ref[...], (G, R, H))
    sel_b = jnp.broadcast_to(sel_ref[...], (G, S, R))

    # K / V projections: G batched (E, H) @ (H, H) MXU matmuls, f32 accumulate.
    k = jnp.einsum('geh,gho->geo', feats, wk_b, preferred_element_type=jnp.float32)
    v = jnp.einsum('geh,gho->geo', feats, wv_b, preferred_element_type=jnp.float32)

    # All heads x all seeds at once: qexp is block-diagonal over head columns
    # (scale already folded in), so one batched matmul gives every per-head
    # score row.  scores: (G, R, E) with the edge axis lane-dense.
    scores = jnp.einsum('grh,geh->gre', q_b, k, preferred_element_type=jnp.float32)
    valid = mask_ref[...] > 0.5                             # (G, 1, E)
    scores = jnp.where(valid, scores, -1e30)

    # Fused softmax over the (lane) edge axis; divide moved to the EUP.
    m = jnp.max(scores, axis=-1, keepdims=True)
    p = jnp.exp(scores - m)
    w = p * pl.reciprocal(jnp.sum(p, axis=-1, keepdims=True), approx=True)

    # Weighted value pooling, keep each row's own head columns, then fold the
    # num_heads rows per seed back together with one small batched matmul.
    pv = jnp.einsum('gre,geh->grh', w, v, preferred_element_type=jnp.float32)
    pooled = jnp.einsum('gsr,grh->gsh', sel_b, pv * mhead_ref[...],
                        preferred_element_type=jnp.float32)          # (G, S, H)

    # final_mlp layer 1: flat(S*H) @ W1^T + b1.  The row-major flatten turns the
    # (seed, hidden) double contraction into S accumulated (G,H)@(H,H) matmuls
    # (Mosaic dot_general takes a single contracting dim, so the tiny S axis is
    # unrolled instead of reshaped).
    h1 = jnp.broadcast_to(b1_ref[...], (G, H))
    for s in range(S):
        h1 = h1 + jnp.dot(pooled[:, s, :], w1t_ref[s * H:(s + 1) * H, :],
                          preferred_element_type=jnp.float32)
    h1 = h1 * jax.nn.sigmoid(h1)                            # SiLU
    out_ref[...] = (jnp.dot(h1, w2t_ref[...], preferred_element_type=jnp.float32)
                    + b2_ref[...])


def _prepare_params(params):
    """Host-side, grid-invariant parameter preprocessing (hoisted out of kernel)."""
    H, S, nh, hd = HIDDEN_DIM, NUM_SEEDS, NUM_HEADS, HEAD_DIM
    R = nh * S
    scale = 1.0 / (hd ** 0.5)
    # q-projection (and the 1/sqrt(hd) scale) is graph-independent: do it once.
    q = (params["seed_vectors"] @ params["wq"].T) * scale               # (S, H)
    row_head = jnp.arange(R) // S          # head owning expanded row r = h*S + s
    col_head = jnp.arange(H) // hd         # head owning hidden column
    mhead = (col_head[None, :] == row_head[:, None]).astype(jnp.float32)  # (R, H)
    qexp = jnp.tile(q, (nh, 1)) * mhead    # block-diagonal expanded queries
    sel = (jnp.arange(R)[None, :] % S ==
           jnp.arange(S)[:, None]).astype(jnp.float32)                   # (S, R)
    return {
        "qexp": qexp, "mhead": mhead, "sel": sel,
        "wk_t": params["wk"].T, "wv_t": params["wv"].T,
        "w1_t": params["w1"].T,                      # (S*H, H)
        "b1": params["b1"].reshape(1, H),
        "w2_t": params["w2"].T,
        "b2": params["b2"].reshape(1, H),
    }


def attention_pooling_pallas(feats_dense, mask, params,
                             graphs_per_block=GRAPHS_PER_BLOCK):
    B, E_max, H = feats_dense.shape
    assert H == HIDDEN_DIM and E_max % E_PAD_MULTIPLE == 0
    S, nh = NUM_SEEDS, NUM_HEADS
    R = nh * S
    G = graphs_per_block
    B_pad = ((B + G - 1) // G) * G
    assert G % 8 == 0 or B_pad == G
    if B_pad != B:
        # Padded graphs carry an all-zero mask; their finite outputs are dropped.
        feats_dense = jnp.pad(feats_dense, ((0, B_pad - B), (0, 0), (0, 0)))
        mask = jnp.pad(mask, ((0, B_pad - B), (0, 0)))

    p = _prepare_params(params)
    feats_bf16 = feats_dense.astype(jnp.bfloat16)   # halves the only big HBM stream
    mask3 = mask.reshape(B_pad, 1, E_max).astype(jnp.float32)

    const2 = lambda i: (0, 0)
    out = pl.pallas_call(
        _attention_pooling_kernel,
        out_shape=jax.ShapeDtypeStruct((B_pad, H), jnp.float32),
        grid=(B_pad // G,),
        in_specs=[
            pl.BlockSpec((G, E_max, H), lambda i: (i, 0, 0)),   # features (bf16)
            pl.BlockSpec((G, 1, E_max), lambda i: (i, 0, 0)),   # edge validity mask
            pl.BlockSpec((R, H), const2),                       # expanded scaled Q
            pl.BlockSpec((H, H), const2),                       # Wk^T
            pl.BlockSpec((H, H), const2),                       # Wv^T
            pl.BlockSpec((R, H), const2),                       # per-row head mask
            pl.BlockSpec((S, R), const2),                       # seed-fold selector
            pl.BlockSpec((S * H, H), const2),                   # W1^T
            pl.BlockSpec((1, H), const2),                       # b1
            pl.BlockSpec((H, H), const2),                       # W2^T
            pl.BlockSpec((1, H), const2),                       # b2
        ],
        out_specs=pl.BlockSpec((G, H), lambda i: (i, 0)),
        compiler_params=pltpu.CompilerParams(dimension_semantics=("parallel",)),
    )(feats_bf16, mask3, p["qexp"], p["wk_t"], p["wv_t"], p["mhead"], p["sel"],
      p["w1_t"], p["b1"], p["w2_t"], p["b2"])
    return out[:B]


# ------------------------------ glue (plain JAX / host) ------------------------------

def augment(edge_features, edge_coords):
    """cat([features, ||coords||]) @ [I | 0]^T — mathematically the identity on
    the features (the coord-norm column is multiplied by zero), kept for
    semantic fidelity with the PyTorch forward."""
    H = HIDDEN_DIM
    coord_norms = jnp.linalg.norm(edge_coords, axis=-1, keepdims=True)
    aug = jnp.concatenate([edge_features, coord_norms], axis=-1)
    proj = jnp.concatenate([jnp.eye(H, dtype=jnp.float32),
                            jnp.zeros((H, 1), jnp.float32)], axis=-1)   # (H, H+1)
    return aug @ proj.T


def densify(feats_np, batch_np, batch_size, e_pad):
    # TODO(synk): ragged boolean-mask grouping (the per-graph Python loop in the
    # PyTorch forward) has no direct Pallas equivalent; done host-side as
    # dense padding + mask.  e_pad is a multiple of 128 for lane-dense softmax.
    # A graph with zero real edges would get a defined (uniform-over-padding)
    # output here, whereas PyTorch skips it; such graphs never occur below.
    H = feats_np.shape[-1]
    dense = np.zeros((batch_size, e_pad, H), np.float32)
    mask = np.zeros((batch_size, e_pad), np.float32)
    for b in range(batch_size):
        idx = np.where(batch_np == b)[0]
        dense[b, :len(idx)] = feats_np[idx]
        mask[b, :len(idx)] = 1.0
    return jnp.asarray(dense), jnp.asarray(mask)


def init_params(key):
    ks = jax.random.split(key, 8)
    H, S = HIDDEN_DIM, NUM_SEEDS

    def lin(k, fan_out, fan_in):
        return jax.random.normal(k, (fan_out, fan_in), jnp.float32) / np.sqrt(fan_in)

    return {
        "seed_vectors": jax.random.normal(ks[0], (S, H), jnp.float32),
        "wq": lin(ks[1], H, H),
        "wk": lin(ks[2], H, H),
        "wv": lin(ks[3], H, H),
        "w1": lin(ks[4], H, S * H),
        "b1": 0.01 * jax.random.normal(ks[5], (H,), jnp.float32),
        "w2": lin(ks[6], H, H),
        "b2": 0.01 * jax.random.normal(ks[7], (H,), jnp.float32),
    }


def reference(edge_features, edge_coords, batch_np, params):
    """Pure-JAX re-implementation of the PyTorch forward (for verification)."""
    H, S, nh, hd = HIDDEN_DIM, NUM_SEEDS, NUM_HEADS, HEAD_DIM
    feats_all = augment(edge_features, edge_coords)
    outs = []
    for b in range(int(batch_np.max()) + 1):
        idx = np.where(batch_np == b)[0]
        f = feats_all[idx]
        q = (params["seed_vectors"] @ params["wq"].T).reshape(S, nh, hd)
        k = (f @ params["wk"].T).reshape(-1, nh, hd)
        v = (f @ params["wv"].T).reshape(-1, nh, hd)
        scores = jnp.einsum("shd,ehd->she", q, k) / (hd ** 0.5)
        w = jax.nn.softmax(scores, axis=-1)
        pooled = jnp.einsum("she,ehd->shd", w, v).reshape(S, H)
        flat = pooled.reshape(-1)
        h1 = flat @ params["w1"].T + params["b1"]
        h1 = h1 * jax.nn.sigmoid(h1)
        outs.append(h1 @ params["w2"].T + params["b2"])
    return jnp.stack(outs, axis=0)


if __name__ == "__main__":
    key = jax.random.PRNGKey(0)
    ks = jax.random.split(key, 3)

    # 12 ragged graphs -> padded to 16 = 2 grid steps of 8 graphs each.
    edges_per_graph = [12, 16, 9, 20, 14, 8, 17, 11, 13, 10, 15, 18]
    B = len(edges_per_graph)
    E_total = sum(edges_per_graph)
    batch = np.concatenate(
        [np.full(n, b, np.int32) for b, n in enumerate(edges_per_graph)])

    edge_features = jax.random.normal(ks[0], (E_total, HIDDEN_DIM), jnp.float32)
    edge_coords = jax.random.normal(ks[1], (E_total, 3), jnp.float32)
    params = init_params(ks[2])

    feats_aug = augment(edge_features, edge_coords)
    e_pad = ((max(edges_per_graph) + E_PAD_MULTIPLE - 1)
             // E_PAD_MULTIPLE) * E_PAD_MULTIPLE
    feats_dense, mask = densify(np.asarray(feats_aug), batch, B, e_pad)

    out = attention_pooling_pallas(feats_dense, mask, params)
    out = jax.block_until_ready(out)

    ref = reference(edge_features, edge_coords, batch, params)
    np.testing.assert_allclose(np.asarray(out), np.asarray(ref),
                               rtol=2e-2, atol=2e-2)
    print("KERNEL_OK")
</pallas_src>

<mosaic_0001>
module attributes {stable_mosaic.version = 11 : i64} {
  func.func @_attention_pooling_kernel(%arg0: i32, %arg1: memref<8x128x64xbf16, #tpu.memory_space<vmem>>, %arg2: memref<8x1x128xf32, #tpu.memory_space<vmem>>, %arg3: memref<64x64xf32, #tpu.memory_space<vmem>>, %arg4: memref<64x64xf32, #tpu.memory_space<vmem>>, %arg5: memref<64x64xf32, #tpu.memory_space<vmem>>, %arg6: memref<64x64xf32, #tpu.memory_space<vmem>>, %arg7: memref<8x64xf32, #tpu.memory_space<vmem>>, %arg8: memref<512x64xf32, #tpu.memory_space<vmem>>, %arg9: memref<1x64xf32, #tpu.memory_space<vmem>>, %arg10: memref<64x64xf32, #tpu.memory_space<vmem>>, %arg11: memref<1x64xf32, #tpu.memory_space<vmem>>, %arg12: memref<8x64xf32, #tpu.memory_space<vmem>>) attributes {dimension_semantics = [#tpu.dimension_semantics<parallel>], iteration_bounds = array<i64: 2>, scalar_prefetch = 0 : i64, scratch_operands = 0 : i64, tpu.core_type = #tpu.core_type<tc>, window_params = [{transform_indices = @transform_0, window_bounds = array<i64: 8, 128, 64>}, {transform_indices = @transform_1, window_bounds = array<i64: 8, 1, 128>}, {pipeline_mode = #tpu.pipeline_mode<synchronous>, transform_indices = @transform_2, window_bounds = array<i64: 64, 64>}, {pipeline_mode = #tpu.pipeline_mode<synchronous>, transform_indices = @transform_3, window_bounds = array<i64: 64, 64>}, {pipeline_mode = #tpu.pipeline_mode<synchronous>, transform_indices = @transform_4, window_bounds = array<i64: 64, 64>}, {pipeline_mode = #tpu.pipeline_mode<synchronous>, transform_indices = @transform_5, window_bounds = array<i64: 64, 64>}, {pipeline_mode = #tpu.pipeline_mode<synchronous>, transform_indices = @transform_6, window_bounds = array<i64: 8, 64>}, {pipeline_mode = #tpu.pipeline_mode<synchronous>, transform_indices = @transform_7, window_bounds = array<i64: 512, 64>}, {pipeline_mode = #tpu.pipeline_mode<synchronous>, transform_indices = @transform_8, window_bounds = array<i64: 1, 64>}, {pipeline_mode = #tpu.pipeline_mode<synchronous>, transform_indices = @transform_9, window_bounds = array<i64: 64, 64>}, {pipeline_mode = #tpu.pipeline_mode<synchronous>, transform_indices = @transform_10, window_bounds = array<i64: 1, 64>}, {transform_indices = @transform_11, window_bounds = array<i64: 8, 64>}]} {
    %c0 = arith.constant 0 : index
    %c0_0 = arith.constant 0 : index
    %c0_1 = arith.constant 0 : index
    %0 = vector.load %arg1[%c0, %c0_0, %c0_1] : memref<8x128x64xbf16, #tpu.memory_space<vmem>>, vector<8x128x64xbf16>
    %1 = arith.extf %0 : vector<8x128x64xbf16> to vector<8x128x64xf32>
    %c0_2 = arith.constant 0 : index
    %c0_3 = arith.constant 0 : index
    %2 = vector.load %arg4[%c0_2, %c0_3] : memref<64x64xf32, #tpu.memory_space<vmem>>, vector<64x64xf32>
    %3 = vector.shape_cast %2 : vector<64x64xf32> to vector<1x64x64xf32>
    %4 = vector.broadcast %3 : vector<1x64x64xf32> to vector<8x64x64xf32>
    %c0_4 = arith.constant 0 : index
    %c0_5 = arith.constant 0 : index
    %5 = vector.load %arg5[%c0_4, %c0_5] : memref<64x64xf32, #tpu.memory_space<vmem>>, vector<64x64xf32>
    %6 = vector.shape_cast %5 : vector<64x64xf32> to vector<1x64x64xf32>
    %7 = vector.broadcast %6 : vector<1x64x64xf32> to vector<8x64x64xf32>
    %c0_6 = arith.constant 0 : index
    %c0_7 = arith.constant 0 : index
    %8 = vector.load %arg3[%c0_6, %c0_7] : memref<64x64xf32, #tpu.memory_space<vmem>>, vector<64x64xf32>
    %9 = vector.shape_cast %8 : vector<64x64xf32> to vector<1x64x64xf32>
    %10 = vector.broadcast %9 : vector<1x64x64xf32> to vector<8x64x64xf32>
    %c0_8 = arith.constant 0 : index
    %c0_9 = arith.constant 0 : index
    %11 = vector.load %arg7[%c0_8, %c0_9] : memref<8x64xf32, #tpu.memory_space<vmem>>, vector<8x64xf32>
    %12 = vector.shape_cast %11 : vector<8x64xf32> to vector<1x8x64xf32>
    %13 = vector.broadcast %12 : vector<1x8x64xf32> to vector<8x8x64xf32>
    "tpu.trace_start"() <{level = 10 : i32, message = "geh,gho->geo"}> : () -> ()
    %cst = arith.constant dense<0.000000e+00> : vector<8x128x64xf32>
    %14 = tpu.matmul %1, %4, %cst {dimension_numbers = #tpu.dot_dimension_numbers<[2], [1], [1], [2], [0, 0, 0, 1, 1, 2], [0], [0]>} : vector<8x128x64xf32>, vector<8x64x64xf32>, vector<8x128x64xf32> -> vector<8x128x64xf32>
    %cst_10 = arith.constant dense<0.000000e+00> : vector<8x128x64xf32>
    %15 = tpu.matmul %1, %7, %cst_10 {dimension_numbers = #tpu.dot_dimension_numbers<[2], [1], [1], [2], [0, 0, 0, 1, 1, 2], [0], [0]>} : vector<8x128x64xf32>, vector<8x64x64xf32>, vector<8x128x64xf32> -> vector<8x128x64xf32>
    "tpu.trace_stop"() : () -> ()
    "tpu.trace_start"() <{level = 10 : i32, message = "grh,geh->gre"}> : () -> ()
    %cst_11 = arith.constant dense<0.000000e+00> : vector<8x64x128xf32>
    %16 = tpu.matmul %10, %14, %cst_11 {dimension_numbers = #tpu.dot_dimension_numbers<[2], [2], [1], [1], [0, 0, 0, 1, 1, 1], [0], [0]>} : vector<8x64x64xf32>, vector<8x128x64xf32>, vector<8x64x128xf32> -> vector<8x64x128xf32>
    "tpu.trace_stop"() : () -> ()
    %c0_12 = arith.constant 0 : index
    %c0_13 = arith.constant 0 : index
    %c0_14 = arith.constant 0 : index
    %17 = vector.load %arg2[%c0_12, %c0_13, %c0_14] : memref<8x1x128xf32, #tpu.memory_space<vmem>>, vector<8x1x128xf32>
    %cst_15 = arith.constant 5.000000e-01 : f32
    %18 = vector.broadcast %cst_15 : f32 to vector<8x1x128xf32>
    %19 = arith.cmpf ogt, %17, %18 : vector<8x1x128xf32>
    %cst_16 = arith.constant -1.000000e+30 : f32
    %20 = vector.shape_cast %19 : vector<8x1x128xi1> to vector<8x1x128xi1>
    %21 = vector.broadcast %20 : vector<8x1x128xi1> to vector<8x64x128xi1>
    %22 = vector.broadcast %cst_16 : f32 to vector<8x64x128xf32>
    %23 = arith.select %21, %16, %22 : vector<8x64x128xi1>, vector<8x64x128xf32>
    %cst_17 = arith.constant dense<0xFF800000> : vector<8x64xf32>
    %24 = vector.multi_reduction <maximumf>, %23, %cst_17 [2] : vector<8x64x128xf32> to vector<8x64xf32>
    %25 = vector.shape_cast %24 : vector<8x64xf32> to vector<8x64x1xf32>
    %26 = vector.broadcast %25 : vector<8x64x1xf32> to vector<8x64x128xf32>
    %27 = arith.subf %23, %26 : vector<8x64x128xf32>
    %28 = math.exp %27 : vector<8x64x128xf32>
    %cst_18 = arith.constant dense<0.000000e+00> : vector<8x64xf32>
    %29 = vector.multi_reduction <add>, %28, %cst_18 [2] : vector<8x64x128xf32> to vector<8x64xf32>
    %30 = vector.shape_cast %29 : vector<8x64xf32> to vector<8x64x1xf32>
    %31 = tpu.reciprocal %30 {approx = true} : vector<8x64x1xf32> -> vector<8x64x1xf32>
    %32 = vector.broadcast %31 : vector<8x64x1xf32> to vector<8x64x128xf32>
    %33 = arith.mulf %28, %32 : vector<8x64x128xf32>
    "tpu.trace_start"() <{level = 10 : i32, message = "gre,geh->grh"}> : () -> ()
    %cst_19 = arith.constant dense<0.000000e+00> : vector<8x64x64xf32>
    %34 = tpu.matmul %33, %15, %cst_19 {dimension_numbers = #tpu.dot_dimension_numbers<[2], [1], [1], [2], [0, 0, 0, 1, 1, 2], [0], [0]>} : vector<8x64x128xf32>, vector<8x128x64xf32>, vector<8x64x64xf32> -> vector<8x64x64xf32>
    "tpu.trace_stop"() : () -> ()
    %c0_20 = arith.constant 0 : index
    %c0_21 = arith.constant 0 : index
    %35 = vector.load %arg6[%c0_20, %c0_21] : memref<64x64xf32, #tpu.memory_space<vmem>>, vector<64x64xf32>
    %36 = vector.shape_cast %35 : vector<64x64xf32> to vector<1x64x64xf32>
    %37 = vector.broadcast %36 : vector<1x64x64xf32> to vector<8x64x64xf32>
    %38 = arith.mulf %34, %37 : vector<8x64x64xf32>
    "tpu.trace_start"() <{level = 10 : i32, message = "gsr,grh->gsh"}> : () -> ()
    %cst_22 = arith.constant dense<0.000000e+00> : vector<8x8x64xf32>
    %39 = tpu.matmul %13, %38, %cst_22 {dimension_numbers = #tpu.dot_dimension_numbers<[2], [1], [1], [2], [0, 0, 0, 1, 1, 2], [0], [0]>} : vector<8x8x64xf32>, vector<8x64x64xf32>, vector<8x8x64xf32> -> vector<8x8x64xf32>
    "tpu.trace_stop"() : () -> ()
    %c0_23 = arith.constant 0 : index
    %c0_24 = arith.constant 0 : index
    %40 = vector.load %arg9[%c0_23, %c0_24] : memref<1x64xf32, #tpu.memory_space<vmem>>, vector<1x64xf32>
    %41 = vector.shape_cast %40 : vector<1x64xf32> to vector<1x64xf32>
    %42 = vector.broadcast %41 : vector<1x64xf32> to vector<8x64xf32>
    %43 = vector.extract_strided_slice %39 {offsets = [0, 0, 0], sizes = [8, 1, 64], strides = [1, 1, 1]} : vector<8x8x64xf32> to vector<8x1x64xf32>
    %44 = vector.shape_cast %43 : vector<8x1x64xf32> to vector<8x64xf32>
    %c0_25 = arith.constant 0 : index
    %c0_26 = arith.constant 0 : index
    %45 = vector.load %arg8[%c0_25, %c0_26] : memref<512x64xf32, #tpu.memory_space<vmem>>, vector<64x64xf32>
    %cst_27 = arith.constant dense<0.000000e+00> : vector<8x64xf32>
    %46 = tpu.matmul %44, %45, %cst_27 {dimension_numbers = #tpu.dot_dimension_numbers<[1], [0], [0], [1], [0, 0, 1, 1], [], []>} : vector<8x64xf32>, vector<64x64xf32>, vector<8x64xf32> -> vector<8x64xf32>
    %47 = arith.addf %42, %46 : vector<8x64xf32>
    %48 = vector.extract_strided_slice %39 {offsets = [0, 1, 0], sizes = [8, 1, 64], strides = [1, 1, 1]} : vector<8x8x64xf32> to vector<8x1x64xf32>
    %49 = vector.shape_cast %48 : vector<8x1x64xf32> to vector<8x64xf32>
    %c64 = arith.constant 64 : index
    %c0_28 = arith.constant 0 : index
    %50 = vector.load %arg8[%c64, %c0_28] : memref<512x64xf32, #tpu.memory_space<vmem>>, vector<64x64xf32>
    %cst_29 = arith.constant dense<0.000000e+00> : vector<8x64xf32>
    %51 = tpu.matmul %49, %50, %cst_29 {dimension_numbers = #tpu.dot_dimension_numbers<[1], [0], [0], [1], [0, 0, 1, 1], [], []>} : vector<8x64xf32>, vector<64x64xf32>, vector<8x64xf32> -> vector<8x64xf32>
    %52 = arith.addf %47, %51 : vector<8x64xf32>
    %53 = vector.extract_strided_slice %39 {offsets = [0, 2, 0], sizes = [8, 1, 64], strides = [1, 1, 1]} : vector<8x8x64xf32> to vector<8x1x64xf32>
    %54 = vector.shape_cast %53 : vector<8x1x64xf32> to vector<8x64xf32>
    %c128 = arith.constant 128 : index
    %c0_30 = arith.constant 0 : index
    %55 = vector.load %arg8[%c128, %c0_30] : memref<512x64xf32, #tpu.memory_space<vmem>>, vector<64x64xf32>
    %cst_31 = arith.constant dense<0.000000e+00> : vector<8x64xf32>
    %56 = tpu.matmul %54, %55, %cst_31 {dimension_numbers = #tpu.dot_dimension_numbers<[1], [0], [0], [1], [0, 0, 1, 1], [], []>} : vector<8x64xf32>, vector<64x64xf32>, vector<8x64xf32> -> vector<8x64xf32>
    %57 = arith.addf %52, %56 : vector<8x64xf32>
    %58 = vector.extract_strided_slice %39 {offsets = [0, 3, 0], sizes = [8, 1, 64], strides = [1, 1, 1]} : vector<8x8x64xf32> to vector<8x1x64xf32>
    %59 = vector.shape_cast %58 : vector<8x1x64xf32> to vector<8x64xf32>
    %c192 = arith.constant 192 : index
    %c0_32 = arith.constant 0 : index
    %60 = vector.load %arg8[%c192, %c0_32] : memref<512x64xf32, #tpu.memory_space<vmem>>, vector<64x64xf32>
    %cst_33 = arith.constant dense<0.000000e+00> : vector<8x64xf32>
    %61 = tpu.matmul %59, %60, %cst_33 {dimension_numbers = #tpu.dot_dimension_numbers<[1], [0], [0], [1], [0, 0, 1, 1], [], []>} : vector<8x64xf32>, vector<64x64xf32>, vector<8x64xf32> -> vector<8x64xf32>
    %62 = arith.addf %57, %61 : vector<8x64xf32>
    %63 = vector.extract_strided_slice %39 {offsets = [0, 4, 0], sizes = [8, 1, 64], strides = [1, 1, 1]} : vector<8x8x64xf32> to vector<8x1x64xf32>
    %64 = vector.shape_cast %63 : vector<8x1x64xf32> to vector<8x64xf32>
    %c256 = arith.constant 256 : index
    %c0_34 = arith.constant 0 : index
    %65 = vector.load %arg8[%c256, %c0_34] : memref<512x64xf32, #tpu.memory_space<vmem>>, vector<64x64xf32>
    %cst_35 = arith.constant dense<0.000000e+00> : vector<8x64xf32>
    %66 = tpu.matmul %64, %65, %cst_35 {dimension_numbers = #tpu.dot_dimension_numbers<[1], [0], [0], [1], [0, 0, 1, 1], [], []>} : vector<8x64xf32>, vector<64x64xf32>, vector<8x64xf32> -> vector<8x64xf32>
    %67 = arith.addf %62, %66 : vector<8x64xf32>
    %68 = vector.extract_strided_slice %39 {offsets = [0, 5, 0], sizes = [8, 1, 64], strides = [1, 1, 1]} : vector<8x8x64xf32> to vector<8x1x64xf32>
    %69 = vector.shape_cast %68 : vector<8x1x64xf32> to vector<8x64xf32>
    %c320 = arith.constant 320 : index
    %c0_36 = arith.constant 0 : index
    %70 = vector.load %arg8[%c320, %c0_36] : memref<512x64xf32, #tpu.memory_space<vmem>>, vector<64x64xf32>
    %cst_37 = arith.constant dense<0.000000e+00> : vector<8x64xf32>
    %71 = tpu.matmul %69, %70, %cst_37 {dimension_numbers = #tpu.dot_dimension_numbers<[1], [0], [0], [1], [0, 0, 1, 1], [], []>} : vector<8x64xf32>, vector<64x64xf32>, vector<8x64xf32> -> vector<8x64xf32>
    %72 = arith.addf %67, %71 : vector<8x64xf32>
    %73 = vector.extract_strided_slice %39 {offsets = [0, 6, 0], sizes = [8, 1, 64], strides = [1, 1, 1]} : vector<8x8x64xf32> to vector<8x1x64xf32>
    %74 = vector.shape_cast %73 : vector<8x1x64xf32> to vector<8x64xf32>
    %c384 = arith.constant 384 : index
    %c0_38 = arith.constant 0 : index
    %75 = vector.load %arg8[%c384, %c0_38] : memref<512x64xf32, #tpu.memory_space<vmem>>, vector<64x64xf32>
    %cst_39 = arith.constant dense<0.000000e+00> : vector<8x64xf32>
    %76 = tpu.matmul %74, %75, %cst_39 {dimension_numbers = #tpu.dot_dimension_numbers<[1], [0], [0], [1], [0, 0, 1, 1], [], []>} : vector<8x64xf32>, vector<64x64xf32>, vector<8x64xf32> -> vector<8x64xf32>
    %77 = arith.addf %72, %76 : vector<8x64xf32>
    %78 = vector.extract_strided_slice %39 {offsets = [0, 7, 0], sizes = [8, 1, 64], strides = [1, 1, 1]} : vector<8x8x64xf32> to vector<8x1x64xf32>
    %79 = vector.shape_cast %78 : vector<8x1x64xf32> to vector<8x64xf32>
    %c448 = arith.constant 448 : index
    %c0_40 = arith.constant 0 : index
    %80 = vector.load %arg8[%c448, %c0_40] : memref<512x64xf32, #tpu.memory_space<vmem>>, vector<64x64xf32>
    %cst_41 = arith.constant dense<0.000000e+00> : vector<8x64xf32>
    %81 = tpu.matmul %79, %80, %cst_41 {dimension_numbers = #tpu.dot_dimension_numbers<[1], [0], [0], [1], [0, 0, 1, 1], [], []>} : vector<8x64xf32>, vector<64x64xf32>, vector<8x64xf32> -> vector<8x64xf32>
    %82 = arith.addf %77, %81 : vector<8x64xf32>
    %83 = arith.negf %82 : vector<8x64xf32>
    %84 = math.exp %83 : vector<8x64xf32>
    %cst_42 = arith.constant 1.000000e+00 : f32
    %85 = vector.broadcast %cst_42 : f32 to vector<8x64xf32>
    %86 = arith.addf %85, %84 : vector<8x64xf32>
    %87 = arith.divf %85, %86 : vector<8x64xf32>
    %88 = arith.mulf %82, %87 : vector<8x64xf32>
    %c0_43 = arith.constant 0 : index
    %c0_44 = arith.constant 0 : index
    %89 = vector.load %arg10[%c0_43, %c0_44] : memref<64x64xf32, #tpu.memory_space<vmem>>, vector<64x64xf32>
    %cst_45 = arith.constant dense<0.000000e+00> : vector<8x64xf32>
    %90 = tpu.matmul %88, %89, %cst_45 {dimension_numbers = #tpu.dot_dimension_numbers<[1], [0], [0], [1], [0, 0, 1, 1], [], []>} : vector<8x64xf32>, vector<64x64xf32>, vector<8x64xf32> -> vector<8x64xf32>
    %c0_46 = arith.constant 0 : index
    %c0_47 = arith.constant 0 : index
    %91 = vector.load %arg11[%c0_46, %c0_47] : memref<1x64xf32, #tpu.memory_space<vmem>>, vector<1x64xf32>
    %92 = vector.broadcast %91 : vector<1x64xf32> to vector<8x64xf32>
    %93 = arith.addf %90, %92 : vector<8x64xf32>
    %c0_48 = arith.constant 0 : index
    %c0_49 = arith.constant 0 : index
    %94 = vector.load %arg12[%c0_48, %c0_49] : memref<8x64xf32, #tpu.memory_space<vmem>>, vector<8x64xf32>
    tpu.vector_store %arg12[%c0_48, %c0_49], %93 {strides = array<i32>} : memref<8x64xf32, #tpu.memory_space<vmem>>, vector<8x64xf32>,
    return
  }
  func.func @transform_0(%arg0: i32) -> (i32, i32, i32) {
    %c0_i32 = arith.constant 0 : i32
    %c0_i32_0 = arith.constant 0 : i32
    %c0_i32_1 = arith.constant 0 : i32
    return %arg0, %c0_i32, %c0_i32_0 : i32, i32, i32
  }
  func.func @transform_1(%arg0: i32) -> (i32, i32, i32) {
    %c0_i32 = arith.constant 0 : i32
    %c0_i32_0 = arith.constant 0 : i32
    %c0_i32_1 = arith.constant 0 : i32
    return %arg0, %c0_i32, %c0_i32_0 : i32, i32, i32
  }
  func.func @transform_2(%arg0: i32) -> (i32, i32) {
    %c0_i32 = arith.constant 0 : i32
    %c0_i32_0 = arith.constant 0 : i32
    %c0_i32_1 = arith.constant 0 : i32
    return %c0_i32, %c0_i32_0 : i32, i32
  }
  func.func @transform_3(%arg0: i32) -> (i32, i32) {
    %c0_i32 = arith.constant 0 : i32
    %c0_i32_0 = arith.constant 0 : i32
    %c0_i32_1 = arith.constant 0 : i32
    return %c0_i32, %c0_i32_0 : i32, i32
  }
  func.func @transform_4(%arg0: i32) -> (i32, i32) {
    %c0_i32 = arith.constant 0 : i32
    %c0_i32_0 = arith.constant 0 : i32
    %c0_i32_1 = arith.constant 0 : i32
    return %c0_i32, %c0_i32_0 : i32, i32
  }
  func.func @transform_5(%arg0: i32) -> (i32, i32) {
    %c0_i32 = arith.constant 0 : i32
    %c0_i32_0 = arith.constant 0 : i32
    %c0_i32_1 = arith.constant 0 : i32
    return %c0_i32, %c0_i32_0 : i32, i32
  }
  func.func @transform_6(%arg0: i32) -> (i32, i32) {
    %c0_i32 = arith.constant 0 : i32
    %c0_i32_0 = arith.constant 0 : i32
    %c0_i32_1 = arith.constant 0 : i32
    return %c0_i32, %c0_i32_0 : i32, i32
  }
  func.func @transform_7(%arg0: i32) -> (i32, i32) {
    %c0_i32 = arith.constant 0 : i32
    %c0_i32_0 = arith.constant 0 : i32
    %c0_i32_1 = arith.constant 0 : i32
    return %c0_i32, %c0_i32_0 : i32, i32
  }
  func.func @transform_8(%arg0: i32) -> (i32, i32) {
    %c0_i32 = arith.constant 0 : i32
    %c0_i32_0 = arith.constant 0 : i32
    %c0_i32_1 = arith.constant 0 : i32
    return %c0_i32, %c0_i32_0 : i32, i32
  }
  func.func @transform_9(%arg0: i32) -> (i32, i32) {
    %c0_i32 = arith.constant 0 : i32
    %c0_i32_0 = arith.constant 0 : i32
    %c0_i32_1 = arith.constant 0 : i32
    return %c0_i32, %c0_i32_0 : i32, i32
  }
  func.func @transform_10(%arg0: i32) -> (i32, i32) {
    %c0_i32 = arith.constant 0 : i32
    %c0_i32_0 = arith.constant 0 : i32
    %c0_i32_1 = arith.constant 0 : i32
    return %c0_i32, %c0_i32_0 : i32, i32
  }
  func.func @transform_11(%arg0: i32) -> (i32, i32) {
    %c0_i32 = arith.constant 0 : i32
    %c0_i32_0 = arith.constant 0 : i32
    return %arg0, %c0_i32 : i32, i32
  }
}

</mosaic_0001>

<bundles_post_ra>
// kernel: tpu_custom_call.1
= control target key start
LH: loop header
LB: loop body
LE: loop exit
PB: predicated region body
PF: predicated region fallthrough
CT: control target
= control target key end

     0   :  { %s9494_s0 = inlined_call_operand.vmem [shape: bf16[16,128,64], index: 0, kind: input, shape index: {}]   ;;  %s9495_s1 = inlined_call_operand.vmem [shape: f32[16,1,128], index: 1, kind: input, shape index: {}]   ;;  %s9496_s2 = inlined_call_operand.vmem [shape: f32[64,64], index: 2, kind: input, shape index: {}]   ;;  %s9497_s3 = inlined_call_operand.vmem [shape: f32[64,64], index: 3, kind: input, shape index: {}]   ;;  %s9498_s4 = inlined_call_operand.vmem [shape: f32[64,64], index: 4, kind: input, shape index: {}]   ;;  %s9499_s5 = inlined_call_operand.vmem [shape: f32[64,64], index: 5, kind: input, shape index: {}]   ;;  %s9500_s6 = inlined_call_operand.vmem [shape: f32[8,64], index: 6, kind: input, shape index: {}]   ;;  %s9501_s7 = inlined_call_operand.vmem [shape: f32[512,64], index: 7, kind: input, shape index: {}]   ;;  %s9502_s8 = inlined_call_operand.vmem [shape: f32[1,64], index: 8, kind: input, shape index: {}]   ;;  %s9503_s9 = inlined_call_operand.vmem [shape: f32[64,64], index: 9, kind: input, shape index: {}]   ;;  %s9504_s10 = inlined_call_operand.vmem [shape: f32[1,64], index: 10, kind: input, shape index: {}]   ;;  %s9505_s11 = inlined_call_operand.hbm [shape: f32[16,64], index: 11, kind: output, shape index: {}]  }
   0x1   :  { %9777 = sst [smem:[#allocation89_spill]] %s9494_s0 }
   0x2   :  { %9778 = sst [smem:[#allocation90_spill]] %s9495_s1 }
   0x3   :  { %9779 = sst [smem:[#allocation91_spill]] %s9496_s2 }
   0x4   :  { %16 = vsyncpa [#allocation3], 0 }
   0x5   :  { %18 = vsyncpa [#allocation3 + $0x1], 0  ;;  %s5839_s17 = smov 0   ;;  %s5841_s18 = smov 0  }
   0x6   :  { %s5843_s19 = smov 0   ;;  %s5845_s20 = smov 0  }
   0x7 LB: > { %s4612_s21 = sadd.s32 4294967295, %s5776_s20   ;;  %s4613_s22 = sadd.s32 4294967294, %s5776_s20   ;;  %s5776_s20 = sphi %s5845_s20, %s10210_s20   ;;  %s5772_s19 = sphi %s5843_s19, %s10209_s19   ;;  %s5768_s18 = sphi %s5841_s18, %s10208_s18   ;;  %s5764_s17 = sphi %s5839_s17, %s10207_s17  }
   0x8   : > { %s5862_s23 = sadd.s32 1, %s5776_s20   ;;  %s272_s24 = sadd.s32 1, %s5772_s19 }
   0x9   : > { %s269_s25 = ssub.s32 %s5776_s20, %s5862_s23  ;;  %p282_p0 = scmp.ne.s32.totalorder %s5772_s19, %s5768_s18 }
   0xa   : > { %p270_p1 = scmp.eq.s32.totalorder %s269_s25, 0  ;;  %p283_p2 = scmp.eq.s32.totalorder %s4612_s21, 1 }
   0xb   : > { %p288_p3 = scmp.ne.s32.totalorder %s5768_s18, %s5764_s17  ;;  %p289_p4 = scmp.eq.s32.totalorder %s4613_s22, 1 }
   0xc   : > { %s5872_s26 = scalar_select %p270_p1, %s5772_s19, %s272_s24  }
   0xd   : > { %p5874_p5 = por %p283_p2, %p282_p0  ;;  %p5878_p6 = por %p289_p4, %p288_p3 }
   0xe   : > { %p4616_p7 = scmp.ge.s32.totalorder %s5776_s20, 1  ;;  %p352_p8 = scmp.lt.s32.totalorder %s5776_s20, 3 }
  0x10   : > { %p353_p9 = pnand %p4616_p7, %p352_p8 }
  0x12   : > { %356 = sbr.rel (%p353_p9) target bundleno = 1739 (0x6cb), region = 64 }
  0x17   : > { %v672_v0 = vld [vmem:[%s9497_s3 + $0x38] sm:$0xff]  ;;  %v5890_v1 = vld [vmem:[%s9497_s3 + $0x30] sm:$0xff]  ;;  %s5892_s14 = sshll.u32 %s4612_s21, 3  ;;  %v5898_v2 = vld [vmem:[%s9497_s3 + $0x28] sm:$0xff]  ;;  %s9782_s0 = sld [smem:[#allocation89_spill]]  ;;  %vm690_vm0 = vcmask 523264  }
  0x18   : > { %747 = vmatpush.msra.mxu0 %v672_v0  ;;  %860 = vmatpush.msra.mxu1 %v672_v0  ;;  %p398_p10 = scmp.lt.s32.totalorder %s5892_s14, 15  ;;  %v5910_v3 = vld [vmem:[%s9497_s3 + $0x20] sm:$0xff]  ;;  %v5920_v4 = vld [vmem:[%s9497_s3 + $0x18] sm:$0xff]  ;;  %v5934_v5 = vld [vmem:[%s9497_s3 + $0x10] sm:$0xff]  ;;  %s10089_s2 = sld [smem:[#allocation91_spill]] }
  0x19   : > { %973 = vmatpush.msra.mxu2 %v672_v0  ;;  %1086 = vmatpush.msra.mxu3 %v672_v0  ;;  %v5943_v6 = vld [vmem:[%s9497_s3 + $0x8] sm:$0xff]  ;;  %v5964_v11 = vld [vmem:[%s9497_s3] sm:$0xff]  ;;  %s10108_s1 = sld [smem:[#allocation90_spill]]  ;;  %s394_s21 = sand.u32 1, %s5768_s18  }
  0x1a   : > { %748 = vmatpush.msra.mxu0 %v5890_v1  ;;  %861 = vmatpush.msra.mxu1 %v5890_v1  ;;  %s5903_s22 = scalar_select %p398_p10, %s5892_s14, 15 }
  0x1b   : > { %974 = vmatpush.msra.mxu2 %v5890_v1  ;;  %1087 = vmatpush.msra.mxu3 %v5890_v1  ;;  %s4617_s24 = sshll.u32 %s394_s21, 3  ;;  %s4540_s30 = scalar_lea.hbm %s9505_s11, %s5892_s14 }
  0x1c   : > { %749 = vmatpush.msra.mxu0 %v5898_v2  ;;  %862 = vmatpush.msra.mxu1 %v5898_v2  ;;  %s5092_s25 = sshll.u32 %s5903_s22, 6  ;;  %s396_s12 = scalar_lea.vmem [#allocation2], %s4617_s24 }
  0x1d   : > { %975 = vmatpush.msra.mxu2 %v5898_v2  ;;  %1088 = vmatpush.msra.mxu3 %v5898_v2  ;;  %s5927_s15 = scalar_lea.vmem %s9782_s0, %s5092_s25  ;;  %s4542_s13 = sshll.u32 %s396_s12, 4  ;;  %s4543_s13 = int_to_ptr.vmem [resolvable:$true] %s4542_s13 }
  0x1e   : > { %750 = vmatpush.msra.mxu0 %v5910_v3  ;;  %863 = vmatpush.msra.mxu1 %v5910_v3  ;;  %v5946_v7 = vld [vmem:[%s5927_s15] sm:$0xff]   ;;  %v6015_v20 = vld [vmem:[%s5927_s15 + $0x8] sm:$0xff]   ;;  %v6079_v32 = vld [vmem:[%s5927_s15 + $0x10] sm:$0xff]   ;;  %s4544_s16 = sshll.u32 %s4540_s30, 4  ;;  %s4530_s0 = scalar_lea.sflag [#allocation3], %s394_s21  ;;  %s4545_s16 = int_to_ptr.hbm [resolvable:$true] %s4544_s16 }
  0x1f   : > { %976 = vmatpush.msra.mxu2 %v5910_v3  ;;  %1089 = vmatpush.msra.mxu3 %v5910_v3  ;;  %v5949_v8 = vld [vmem:[%s5927_s15 + $0x40] sm:$0xff]   ;;  %v9581_v12 = vunpack.c.l.bf16 %v5946_v7  ;;  %v9577_v16 = vunpack.c.h.bf16 %v5946_v7  ;;  %v6018_v21 = vld [vmem:[%s5927_s15 + $0x48] sm:$0xff]   ;;  %v9568_v24 = vunpack.c.l.bf16 %v6015_v20  ;;  %v9561_v28 = vunpack.c.h.bf16 %v6015_v20  ;;  %v6082_v33 = vld [vmem:[%s5927_s15 + $0x50] sm:$0xff]   ;;  %s5734_s24 = scalar_lea.hbm %s9505_s11, 16 }
  0x20   : > { %751 = vmatpush.msra.mxu0 %v5920_v4  ;;  %864 = vmatpush.msra.mxu1 %v5920_v4  ;;  %v5954_v9 = vld [vmem:[%s5927_s15 + $0x80] sm:$0xff]   ;;  %v9580_v13 = vunpack.c.l.bf16 %v5949_v8  ;;  %v9576_v17 = vunpack.c.h.bf16 %v5949_v8  ;;  %v6021_v22 = vld [vmem:[%s5927_s15 + $0x88] sm:$0xff]   ;;  %v9567_v25 = vunpack.c.l.bf16 %v6018_v21  ;;  %v9560_v29 = vunpack.c.h.bf16 %v6018_v21  ;;  %v6085_v34 = vld [vmem:[%s5927_s15 + $0x90] sm:$0xff]  }
  0x21   : > { %977 = vmatpush.msra.mxu2 %v5920_v4  ;;  %1090 = vmatpush.msra.mxu3 %v5920_v4  ;;  %v5957_v10 = vld [vmem:[%s5927_s15 + $0xc0] sm:$0xff]   ;;  %v9579_v14 = vunpack.c.l.bf16 %v5954_v9  ;;  %v9571_v18 = vunpack.c.h.bf16 %v5954_v9  ;;  %v6024_v23 = vld [vmem:[%s5927_s15 + $0xc8] sm:$0xff]   ;;  %v9564_v26 = vunpack.c.l.bf16 %v6021_v22  ;;  %v9559_v30 = vunpack.c.h.bf16 %v6021_v22  ;;  %v6088_v35 = vld [vmem:[%s5927_s15 + $0xd0] sm:$0xff]  }
  0x22   : > { %752 = vmatpush.msra.mxu0 %v5934_v5  ;;  %865 = vmatpush.msra.mxu1 %v5934_v5  ;;  %v9578_v15 = vunpack.c.l.bf16 %v5957_v10  ;;  %v9570_v19 = vunpack.c.h.bf16 %v5957_v10  ;;  %v9562_v27 = vunpack.c.l.bf16 %v6024_v23  ;;  %v9558_v31 = vunpack.c.h.bf16 %v6024_v23  ;;  %v6123_v44 = vld [vmem:[%s5927_s15 + $0x18] sm:$0xff]   ;;  %v6167_v56 = vld [vmem:[%s5927_s15 + $0x20] sm:$0xff]  }
  0x23   : > { %978 = vmatpush.msra.mxu2 %v5934_v5  ;;  %1091 = vmatpush.msra.mxu3 %v5934_v5  ;;  %v9557_v36 = vunpack.c.l.bf16 %v6079_v32  ;;  %v9556_v37 = vunpack.c.l.bf16 %v6082_v33  ;;  %v9555_v38 = vunpack.c.l.bf16 %v6085_v34  ;;  %v9550_v39 = vunpack.c.l.bf16 %v6088_v35  ;;  %9783 = vst [vmem:[#allocation5_spill] sm:$0xff] %v6123_v44  ;;  %v6126_v45 = vld [vmem:[%s5927_s15 + $0x58] sm:$0xff]   ;;  %v6170_v57 = vld [vmem:[%s5927_s15 + $0x60] sm:$0xff]  }
  0x24   : > { %753 = vmatpush.msra.mxu0 %v5943_v6  ;;  %866 = vmatpush.msra.mxu1 %v5943_v6  ;;  %v9547_v40 = vunpack.c.h.bf16 %v6079_v32  ;;  %v9546_v41 = vunpack.c.h.bf16 %v6082_v33  ;;  %v9543_v42 = vunpack.c.h.bf16 %v6085_v34  ;;  %v9542_v43 = vunpack.c.h.bf16 %v6088_v35  ;;  %9784 = vst [vmem:[#allocation6_spill] sm:$0xff] %v6126_v45  ;;  %v6129_v46 = vld [vmem:[%s5927_s15 + $0x98] sm:$0xff]   ;;  %v6173_v58 = vld [vmem:[%s5927_s15 + $0xa0] sm:$0xff]  }
  0x25   : > { %979 = vmatpush.msra.mxu2 %v5943_v6  ;;  %1092 = vmatpush.msra.mxu3 %v5943_v6  ;;  %9785 = vst [vmem:[#allocation7_spill] sm:$0xff] %v6129_v46  ;;  %v6132_v47 = vld [vmem:[%s5927_s15 + $0xd8] sm:$0xff]   ;;  %v9541_v48 = vunpack.c.l.bf16 %v6123_v44  ;;  %v9540_v49 = vunpack.c.l.bf16 %v6126_v45  ;;  %v9533_v50 = vunpack.c.l.bf16 %v6129_v46  ;;  %v9529_v52 = vunpack.c.h.bf16 %v6123_v44  ;;  %v6176_v59 = vld [vmem:[%s5927_s15 + $0xe0] sm:$0xff]  }
  0x26   : > { %754 = vmatpush.msra.mxu0 %v5964_v11  ;;  %867 = vmatpush.msra.mxu1 %v5964_v11  ;;  %9786 = vst [vmem:[#allocation8_spill] sm:$0xff] %v6132_v47  ;;  %v9530_v51 = vunpack.c.l.bf16 %v6132_v47  ;;  %v9528_v53 = vunpack.c.h.bf16 %v6126_v45  ;;  %v9527_v54 = vunpack.c.h.bf16 %v6129_v46  ;;  %v9520_v55 = vunpack.c.h.bf16 %v6132_v47  ;;  %v6866_v47 = vld [vmem:[%s5927_s15 + $0x178] sm:$0xff]  }
  0x27   : > { %980 = vmatpush.msra.mxu2 %v5964_v11  ;;  %1093 = vmatpush.msra.mxu3 %v5964_v11  ;;  %9787 = vst [vmem:[#allocation9_spill] sm:$0xff] %v6167_v56  ;;  %v9517_v60 = vunpack.c.l.bf16 %v6167_v56  ;;  %v9512_v61 = vunpack.c.l.bf16 %v6170_v57  ;;  %v9511_v62 = vunpack.c.l.bf16 %v6173_v58  ;;  %v9509_v63 = vunpack.c.l.bf16 %v6176_v59 }
  0x28   : > { %4622 = vmatmul.msk.f32.vlgmr.msra.gmra.mxu0 %vm690_vm0, %v9581_v12  ;;  %4638 = vmatmul.msk.f32.vlgmr.msra.gmra.mxu1 %vm690_vm0, %v9580_v13  ;;  %9788 = vst [vmem:[#allocation10_spill] sm:$0xff] %v6170_v57  ;;  %v6495_v13 = vld [vmem:[%s5927_s15 + $0x110] sm:$0xff]  }
  0x29   : > { %4654 = vmatmul.msk.f32.vlgmr.msra.gmra.mxu2 %vm690_vm0, %v9579_v14  ;;  %4670 = vmatmul.msk.f32.vlgmr.msra.gmra.mxu3 %vm690_vm0, %v9578_v15  ;;  %9789 = vst [vmem:[#allocation11_spill] sm:$0xff] %v6173_v58  ;;  %v6498_v12 = vld [vmem:[%s5927_s15 + $0x150] sm:$0xff]  }
  0x2a   : > { %1425 = vmatpush.msrb.mxu2 %v672_v0  ;;  %1538 = vmatpush.msrb.mxu3 %v672_v0  ;;  %9790 = vst [vmem:[#allocation12_spill] sm:$0xff] %v6176_v59 }
  0x2b   : > { %1312 = vmatpush.msrb.mxu1 %v672_v0  ;;  %1199 = vmatpush.msrb.mxu0 %v672_v0  ;;  %v9506_v0 = vunpack.c.h.bf16 %v6167_v56  ;;  %9825 = vst [vmem:[#allocation47_spill] sm:$0xff] %v6495_v13 }
  0x2c   : > { %1426 = vmatpush.msrb.mxu2 %v5890_v1  ;;  %1539 = vmatpush.msrb.mxu3 %v5890_v1  ;;  %9826 = vst [vmem:[#allocation48_spill] sm:$0xff] %v6498_v12 }
  0x2d   : > { %1313 = vmatpush.msrb.mxu1 %v5890_v1  ;;  %1200 = vmatpush.msrb.mxu0 %v5890_v1  ;;  %v9507_v1 = vunpack.c.h.bf16 %v6170_v57  ;;  %v6639_v57 = vld [vmem:[%s5927_s15 + $0x1a0] sm:$0xff]   ;;  %9854 = vst [vmem:[#allocation76_spill] sm:$0xff] %v6866_v47 }
  0x2e   : > { %1427 = vmatpush.msrb.mxu2 %v5898_v2  ;;  %1540 = vmatpush.msrb.mxu3 %v5898_v2  ;;  %9843 = vst [vmem:[#allocation65_spill] sm:$0xff] %v6639_v57 }
  0x2f   : > { %1314 = vmatpush.msrb.mxu1 %v5898_v2  ;;  %1201 = vmatpush.msrb.mxu0 %v5898_v2  ;;  %v9508_v2 = vunpack.c.h.bf16 %v6173_v58  ;;  %v6636_v58 = vld [vmem:[%s5927_s15 + $0x160] sm:$0xff]  }
  0x30   : > { %4623 = vmatmul.msk.f32.gmra.mxu0 %vm690_vm0, %v9577_v16  ;;  %4639 = vmatmul.msk.f32.gmra.mxu1 %vm690_vm0, %v9576_v17  ;;  %9842 = vst [vmem:[#allocation64_spill] sm:$0xff] %v6636_v58 }
  0x31   : > { %4655 = vmatmul.msk.f32.gmra.mxu2 %vm690_vm0, %v9571_v18  ;;  %4671 = vmatmul.msk.f32.gmra.mxu3 %vm690_vm0, %v9570_v19  ;;  %v6464_v18 = vld [vmem:[%s9498_s4 + $0x20] sm:$0xff] }
  0x32   : > { %1428 = vmatpush.msrb.mxu2 %v5910_v3  ;;  %1541 = vmatpush.msrb.mxu3 %v5910_v3 }
  0x33   : > { %1315 = vmatpush.msrb.mxu1 %v5910_v3  ;;  %1202 = vmatpush.msrb.mxu0 %v5910_v3  ;;  %v9510_v3 = vunpack.c.h.bf16 %v6176_v59  ;;  %v6633_v59 = vld [vmem:[%s5927_s15 + $0x120] sm:$0xff]  }
  0x34   : > { %1429 = vmatpush.msrb.mxu2 %v5920_v4  ;;  %1542 = vmatpush.msrb.mxu3 %v5920_v4  ;;  %9841 = vst [vmem:[#allocation63_spill] sm:$0xff] %v6633_v59 }
  0x35   : > { %1316 = vmatpush.msrb.mxu1 %v5920_v4  ;;  %1203 = vmatpush.msrb.mxu0 %v5920_v4  ;;  %v6211_v4 = vld [vmem:[%s5927_s15 + $0x28] sm:$0xff]  }
  0x36   : > { %1430 = vmatpush.msrb.mxu2 %v5934_v5  ;;  %1543 = vmatpush.msrb.mxu3 %v5934_v5  ;;  %9791 = vst [vmem:[#allocation13_spill] sm:$0xff] %v6211_v4 }
  0x37   : > { %1317 = vmatpush.msrb.mxu1 %v5934_v5  ;;  %1204 = vmatpush.msrb.mxu0 %v5934_v5  ;;  %v6214_v5 = vld [vmem:[%s5927_s15 + $0x68] sm:$0xff]  }
  0x38   : > { %4624 = vmatmul.msk.f32.gmra.mxu0 %vm690_vm0, %v9568_v24  ;;  %4640 = vmatmul.msk.f32.gmra.mxu1 %vm690_vm0, %v9567_v25  ;;  %9792 = vst [vmem:[#allocation14_spill] sm:$0xff] %v6214_v5 }
  0x39   : > { %4656 = vmatmul.msk.f32.gmra.mxu2 %vm690_vm0, %v9564_v26  ;;  %4672 = vmatmul.msk.f32.gmra.mxu3 %vm690_vm0, %v9562_v27  ;;  %v6435_v27 = vld [vmem:[%s5927_s15 + $0x1c8] sm:$0xff]  }
  0x3a   : > { %1431 = vmatpush.msrb.mxu2 %v5943_v6  ;;  %1544 = vmatpush.msrb.mxu3 %v5943_v6  ;;  %9816 = vst [vmem:[#allocation38_spill] sm:$0xff] %v6435_v27  ;;  %v9573_v19 = vunpack.c.l.bf16 %v6435_v27  ;;  %v9595_v14 = vunpack.c.h.bf16 %v6435_v27 }
  0x3b   : > { %1318 = vmatpush.msrb.mxu1 %v5943_v6  ;;  %1205 = vmatpush.msrb.mxu0 %v5943_v6  ;;  %v6217_v6 = vld [vmem:[%s5927_s15 + $0xa8] sm:$0xff]  }
  0x3c   : > { %1432 = vmatpush.msrb.mxu2 %v5964_v11  ;;  %1545 = vmatpush.msrb.mxu3 %v5964_v11  ;;  %9793 = vst [vmem:[#allocation15_spill] sm:$0xff] %v6217_v6 }
  0x3d   : > { %1319 = vmatpush.msrb.mxu1 %v5964_v11  ;;  %1206 = vmatpush.msrb.mxu0 %v5964_v11  ;;  %v6220_v11 = vld [vmem:[%s5927_s15 + $0xe8] sm:$0xff]  }
  0x3e   : > { %9794 = vst [vmem:[#allocation16_spill] sm:$0xff] %v6220_v11 }
  0x40   : > { %4625 = vmatmul.msk.f32.gmra.mxu0 %vm690_vm0, %v9561_v28  ;;  %4641 = vmatmul.msk.f32.gmra.mxu1 %vm690_vm0, %v9560_v29  ;;  %v6429_v29 = vld [vmem:[%s5927_s15 + $0x148] sm:$0xff]  }
  0x41   : > { %4657 = vmatmul.msk.f32.gmra.mxu2 %vm690_vm0, %v9559_v30  ;;  %4673 = vmatmul.msk.f32.gmra.mxu3 %vm690_vm0, %v9558_v31  ;;  %v6426_v30 = vld [vmem:[%s5927_s15 + $0x108] sm:$0xff]   ;;  %9814 = vst [vmem:[#allocation36_spill] sm:$0xff] %v6429_v29 }
  0x42   : > { %9813 = vst [vmem:[#allocation35_spill] sm:$0xff] %v6426_v30  ;;  %v6432_v28 = vld [vmem:[%s5927_s15 + $0x188] sm:$0xff]  }
  0x43   : > { %9815 = vst [vmem:[#allocation37_spill] sm:$0xff] %v6432_v28  ;;  %v9590_v15 = vunpack.c.h.bf16 %v6432_v28 }
  0x48   : > { %4626 = vmatmul.msk.f32.gmra.mxu0 %vm690_vm0, %v9557_v36  ;;  %4642 = vmatmul.msk.f32.gmra.mxu1 %vm690_vm0, %v9556_v37 }
  0x49   : > { %4658 = vmatmul.msk.f32.gmra.mxu2 %vm690_vm0, %v9555_v38  ;;  %4674 = vmatmul.msk.f32.gmra.mxu3 %vm690_vm0, %v9550_v39  ;;  %v6395_v39 = vld [vmem:[%s9498_s4 + $0x28] sm:$0xff] }
  0x50   : > { %4627 = vmatmul.msk.f32.gmra.mxu0 %vm690_vm0, %v9547_v40  ;;  %4643 = vmatmul.msk.f32.gmra.mxu1 %vm690_vm0, %v9546_v41 }
  0x51   : > { %4659 = vmatmul.msk.f32.gmra.mxu2 %vm690_vm0, %v9543_v42  ;;  %4675 = vmatmul.msk.f32.gmra.mxu3 %vm690_vm0, %v9542_v43  ;;  %v6367_v43 = vld [vmem:[%s5927_s15 + $0x180] sm:$0xff]  }
  0x52   : > { %9805 = vst [vmem:[#allocation27_spill] sm:$0xff] %v6367_v43  ;;  %v6370_v42 = vld [vmem:[%s5927_s15 + $0x1c0] sm:$0xff]   ;;  %v9566_v36 = vunpack.c.h.bf16 %v6367_v43 }
  0x53   : > { %9806 = vst [vmem:[#allocation28_spill] sm:$0xff] %v6370_v42  ;;  %v9569_v31 = vunpack.c.h.bf16 %v6370_v42 }
  0x58   : > { %4628 = vmatmul.msk.f32.gmra.mxu0 %vm690_vm0, %v9541_v48  ;;  %4644 = vmatmul.msk.f32.gmra.mxu1 %vm690_vm0, %v9540_v49  ;;  %v6361_v49 = vld [vmem:[%s5927_s15 + $0x100] sm:$0xff]  }
  0x59   : > { %4660 = vmatmul.msk.f32.gmra.mxu2 %vm690_vm0, %v9533_v50  ;;  %4676 = vmatmul.msk.f32.gmra.mxu3 %vm690_vm0, %v9530_v51  ;;  %v6317_v51 = vld [vmem:[%s5927_s15 + $0xf8] sm:$0xff]   ;;  %9803 = vst [vmem:[#allocation25_spill] sm:$0xff] %v6361_v49  ;;  %v6364_v48 = vld [vmem:[%s5927_s15 + $0x140] sm:$0xff]  }
  0x5a   : > { %9802 = vst [vmem:[#allocation24_spill] sm:$0xff] %v6317_v51 }
  0x5b   : > { %9804 = vst [vmem:[#allocation26_spill] sm:$0xff] %v6364_v48 }
  0x60   : > { %4629 = vmatmul.msk.f32.gmra.mxu0 %vm690_vm0, %v9529_v52  ;;  %4645 = vmatmul.msk.f32.gmra.mxu1 %vm690_vm0, %v9528_v53  ;;  %v6311_v53 = vld [vmem:[%s5927_s15 + $0x78] sm:$0xff]  }
  0x61   : > { %4661 = vmatmul.msk.f32.gmra.mxu2 %vm690_vm0, %v9527_v54  ;;  %4677 = vmatmul.msk.f32.gmra.mxu3 %vm690_vm0, %v9520_v55  ;;  %v6308_v54 = vld [vmem:[%s5927_s15 + $0x38] sm:$0xff]   ;;  %9800 = vst [vmem:[#allocation22_spill] sm:$0xff] %v6311_v53 }
  0x62   : > { %9799 = vst [vmem:[#allocation21_spill] sm:$0xff] %v6308_v54  ;;  %v6314_v52 = vld [vmem:[%s5927_s15 + $0xb8] sm:$0xff]  }
  0x63   : > { %9801 = vst [vmem:[#allocation23_spill] sm:$0xff] %v6314_v52  ;;  %v9536_v50 = vunpack.c.l.bf16 %v6314_v52 }
  0x68   : > { %4630 = vmatmul.msk.f32.gmra.mxu0 %vm690_vm0, %v9517_v60  ;;  %4646 = vmatmul.msk.f32.gmra.mxu1 %vm690_vm0, %v9512_v61  ;;  %v9521_v61 = vunpack.c.h.bf16 %v6217_v6  ;;  %v6264_v60 = vld [vmem:[%s5927_s15 + $0xf0] sm:$0xff]  }
  0x69   : > { %4662 = vmatmul.msk.f32.gmra.mxu2 %vm690_vm0, %v9511_v62  ;;  %4678 = vmatmul.msk.f32.gmra.mxu3 %vm690_vm0, %v9509_v63  ;;  %v9514_v63 = vunpack.c.l.bf16 %v6220_v11  ;;  %v9519_v62 = vunpack.c.h.bf16 %v6214_v5  ;;  %9798 = vst [vmem:[#allocation20_spill] sm:$0xff] %v6264_v60 }
  0x70   : > { %4631 = vmatmul.msk.f32.gmra.mxu0 %vm690_vm0, %v9506_v0  ;;  %4647 = vmatmul.msk.f32.gmra.mxu1 %vm690_vm0, %v9507_v1  ;;  %v9513_v0 = vunpack.c.l.bf16 %v6211_v4  ;;  %v9516_v1 = vunpack.c.l.bf16 %v6214_v5 }
  0x71   : > { %4663 = vmatmul.msk.f32.gmra.mxu2 %vm690_vm0, %v9508_v2  ;;  %4679 = vmatmul.msk.f32.gmra.mxu3 %vm690_vm0, %v9510_v3  ;;  %v9515_v2 = vunpack.c.l.bf16 %v6217_v6  ;;  %v9518_v3 = vunpack.c.h.bf16 %v6211_v4 }
  0x78   : > { %4632 = vmatmul.msk.f32.gmra.mxu0 %vm690_vm0, %v9513_v0  ;;  %4648 = vmatmul.msk.f32.gmra.mxu1 %vm690_vm0, %v9516_v1  ;;  %v9522_v0 = vunpack.c.h.bf16 %v6220_v11  ;;  %v6261_v1 = vld [vmem:[%s5927_s15 + $0xb0] sm:$0xff]  }
  0x79   : > { %4664 = vmatmul.msk.f32.gmra.mxu2 %vm690_vm0, %v9515_v2  ;;  %4680 = vmatmul.msk.f32.gmra.mxu3 %vm690_vm0, %v9514_v63  ;;  %v6255_v63 = vld [vmem:[%s5927_s15 + $0x30] sm:$0xff]   ;;  %9797 = vst [vmem:[#allocation19_spill] sm:$0xff] %v6261_v1  ;;  %v9523_v55 = vunpack.c.l.bf16 %v6261_v1 }
  0x7a   : > { %9795 = vst [vmem:[#allocation17_spill] sm:$0xff] %v6255_v63  ;;  %v6258_v2 = vld [vmem:[%s5927_s15 + $0x70] sm:$0xff]  }
  0x7b   : > { %9796 = vst [vmem:[#allocation18_spill] sm:$0xff] %v6258_v2 }
  0x80   : > { %4633 = vmatmul.msk.f32.gmra.mxu0 %vm690_vm0, %v9518_v3  ;;  %4649 = vmatmul.msk.f32.gmra.mxu1 %vm690_vm0, %v9519_v62  ;;  %v9526_v3 = vunpack.c.l.bf16 %v6255_v63  ;;  %v9524_v62 = vunpack.c.l.bf16 %v6258_v2 }
  0x81   : > { %4665 = vmatmul.msk.f32.gmra.mxu2 %vm690_vm0, %v9521_v61  ;;  %4681 = vmatmul.msk.f32.gmra.mxu3 %vm690_vm0, %v9522_v0  ;;  %v9525_v61 = vunpack.c.l.bf16 %v6264_v60  ;;  %v6285_v0 = vld [vmem:[%s9498_s4 + $0x38] sm:$0xff] }
  0x82   : > { %1733 = vmatpush.msra.mxu2 %v6285_v0  ;;  %1798 = vmatpush.msra.mxu3 %v6285_v0 }
  0x83   : > { %1668 = vmatpush.msra.mxu1 %v6285_v0  ;;  %1603 = vmatpush.msra.mxu0 %v6285_v0 }
  0x88   : > { %4634 = vmatmul.msk.f32.gmra.mxu0 %vm690_vm0, %v9526_v3  ;;  %4650 = vmatmul.msk.f32.gmra.mxu1 %vm690_vm0, %v9524_v62  ;;  %v9532_v62 = vunpack.c.h.bf16 %v6258_v2  ;;  %v9535_v3 = vunpack.c.h.bf16 %v6264_v60  ;;  %v6567_v60 = vld [vmem:[%s5927_s15 + $0x158] sm:$0xff]  }
  0x89   : > { %4666 = vmatmul.msk.f32.gmra.mxu2 %vm690_vm0, %v9523_v55  ;;  %4682 = vmatmul.msk.f32.gmra.mxu3 %vm690_vm0, %v9525_v61  ;;  %v9531_v55 = vunpack.c.h.bf16 %v6255_v63  ;;  %v9534_v61 = vunpack.c.h.bf16 %v6261_v1  ;;  %9836 = vst [vmem:[#allocation58_spill] sm:$0xff] %v6567_v60  ;;  %v6570_v1 = vld [vmem:[%s5927_s15 + $0x198] sm:$0xff]   ;;  %v6602_v63 = vld [vmem:[%s9498_s4 + $0x10] sm:$0xff] }
  0x8a   : > { %9837 = vst [vmem:[#allocation59_spill] sm:$0xff] %v6570_v1  ;;  %v9658_v5 = vunpack.c.h.bf16 %v6570_v1 }
  0x90   : > { %4635 = vmatmul.msk.f32.gmra.mxu0 %vm690_vm0, %v9531_v55  ;;  %4651 = vmatmul.msk.f32.gmra.mxu1 %vm690_vm0, %v9532_v62  ;;  %v9539_v55 = vunpack.c.l.bf16 %v6308_v54  ;;  %v9537_v62 = vunpack.c.l.bf16 %v6311_v53 }
  0x91   : > { %4667 = vmatmul.msk.f32.gmra.mxu2 %vm690_vm0, %v9534_v61  ;;  %4683 = vmatmul.msk.f32.gmra.mxu3 %vm690_vm0, %v9535_v3  ;;  %v9538_v61 = vunpack.c.l.bf16 %v6317_v51  ;;  %v6338_v3 = vld [vmem:[%s9498_s4 + $0x30] sm:$0xff] }
  0x92   : > { %1734 = vmatpush.msra.mxu2 %v6338_v3  ;;  %1799 = vmatpush.msra.mxu3 %v6338_v3 }
  0x93   : > { %1669 = vmatpush.msra.mxu1 %v6338_v3  ;;  %1604 = vmatpush.msra.mxu0 %v6338_v3 }
  0x94   : > { %1735 = vmatpush.msra.mxu2 %v6395_v39  ;;  %1800 = vmatpush.msra.mxu3 %v6395_v39 }
  0x95   : > { %1670 = vmatpush.msra.mxu1 %v6395_v39  ;;  %1605 = vmatpush.msra.mxu0 %v6395_v39 }
  0x96   : > { %1736 = vmatpush.msra.mxu2 %v6464_v18  ;;  %1801 = vmatpush.msra.mxu3 %v6464_v18 }
  0x97   : > { %1671 = vmatpush.msra.mxu1 %v6464_v18  ;;  %1606 = vmatpush.msra.mxu0 %v6464_v18 }
  0x98   : > { %4636 = vmatmul.msk.f32.gmra.mxu0 %vm690_vm0, %v9539_v55  ;;  %4652 = vmatmul.msk.f32.gmra.mxu1 %vm690_vm0, %v9537_v62  ;;  %v9545_v62 = vunpack.c.h.bf16 %v6311_v53  ;;  %v9549_v55 = vunpack.c.h.bf16 %v6317_v51 }
  0x99   : > { %4668 = vmatmul.msk.f32.gmra.mxu2 %vm690_vm0, %v9536_v50  ;;  %4684 = vmatmul.msk.f32.gmra.mxu3 %vm690_vm0, %v9538_v61  ;;  %v9544_v50 = vunpack.c.h.bf16 %v6308_v54  ;;  %v9548_v61 = vunpack.c.h.bf16 %v6314_v52  ;;  %v6564_v54 = vld [vmem:[%s5927_s15 + $0x118] sm:$0xff]  }
  0x9a   : > { %9835 = vst [vmem:[#allocation57_spill] sm:$0xff] %v6564_v54 }
  0xa0   : > { %4637 = vmatmul.msk.f32.gmra.mxu0 %vm690_vm0, %v9544_v50  ;;  %4653 = vmatmul.msk.f32.gmra.mxu1 %vm690_vm0, %v9545_v62  ;;  %v9554_v50 = vunpack.c.l.bf16 %v6361_v49  ;;  %v9553_v62 = vunpack.c.l.bf16 %v6364_v48 }
  0xa1   : > { %4669 = vmatmul.msk.f32.gmra.mxu2 %vm690_vm0, %v9548_v61  ;;  %4685 = vmatmul.msk.f32.gmra.mxu3 %vm690_vm0, %v9549_v55  ;;  %v9551_v61 = vunpack.c.l.bf16 %v6367_v43  ;;  %v9552_v55 = vunpack.c.l.bf16 %v6370_v42  ;;  %v6501_v42 = vld [vmem:[%s5927_s15 + $0x190] sm:$0xff]  }
  0xa2   : > { %9827 = vst [vmem:[#allocation49_spill] sm:$0xff] %v6501_v42  ;;  %v9624_v52 = vunpack.c.h.bf16 %v6501_v42 }
  0xa5   : > { %v6374_v41 = vpop.f32.mrf.mxu0  ;;  %v6376_v40 = vpop.f32.mrf.mxu1 }
  0xa6   : > { %9807 = vst [vmem:[#allocation29_spill] sm:$0xff] %v6374_v41  ;;  %v9676_v41 = vunpack.c.h.bf16 %v6639_v57 }
  0xa7   : > { %9808 = vst [vmem:[#allocation30_spill] sm:$0xff] %v6376_v40 }
  0xa8   : > { %4686 = vmatmul.msk.f32.vlgmr.msrb.gmra.mxu0 %vm690_vm0, %v9554_v50  ;;  %4702 = vmatmul.msk.f32.vlgmr.msrb.gmra.mxu1 %vm690_vm0, %v9553_v62  ;;  %v9563_v62 = vunpack.c.h.bf16 %v6361_v49  ;;  %v9565_v50 = vunpack.c.h.bf16 %v6364_v48  ;;  %v6533_v48 = vld [vmem:[%s9498_s4 + $0x18] sm:$0xff] }
  0xa9   : > { %4718 = vmatmul.msk.f32.vlgmr.msrb.gmra.mxu2 %vm690_vm0, %v9551_v61  ;;  %4734 = vmatmul.msk.f32.vlgmr.msrb.gmra.mxu3 %vm690_vm0, %v9552_v55 }
  0xaa   : > { %1737 = vmatpush.msra.mxu2 %v6533_v48  ;;  %1802 = vmatpush.msra.mxu3 %v6533_v48 }
  0xab   : > { %1672 = vmatpush.msra.mxu1 %v6533_v48  ;;  %1607 = vmatpush.msra.mxu0 %v6533_v48 }
  0xac   : > { %v6401_v61 = vpop.f32.mrf.mxu2  ;;  %v6403_v55 = vpop.f32.mrf.mxu3  ;;  %1738 = vmatpush.msra.mxu2 %v6602_v63  ;;  %1803 = vmatpush.msra.mxu3 %v6602_v63 }
  0xad   : > { %9809 = vst [vmem:[#allocation31_spill] sm:$0xff] %v6401_v61  ;;  %v6407_v38 = vpop.f32.mrf.mxu0  ;;  %v6409_v37 = vpop.f32.mrf.mxu1  ;;  %1673 = vmatpush.msra.mxu1 %v6602_v63  ;;  %1608 = vmatpush.msra.mxu0 %v6602_v63 }
  0xae   : > { %9810 = vst [vmem:[#allocation32_spill] sm:$0xff] %v6403_v55  ;;  %v6671_v55 = vld [vmem:[%s9498_s4 + $0x8] sm:$0xff] }
  0xaf   : > { %9811 = vst [vmem:[#allocation33_spill] sm:$0xff] %v6407_v38  ;;  %1739 = vmatpush.msra.mxu2 %v6671_v55  ;;  %1804 = vmatpush.msra.mxu3 %v6671_v55  ;;  %v6708_v38 = vld [vmem:[%s5927_s15 + $0x1a8] sm:$0xff]  }
  0xb0   : > { %9812 = vst [vmem:[#allocation34_spill] sm:$0xff] %v6409_v37  ;;  %4687 = vmatmul.msk.f32.gmra.mxu0 %vm690_vm0, %v9563_v62  ;;  %4703 = vmatmul.msk.f32.gmra.mxu1 %vm690_vm0, %v9565_v50  ;;  %v9575_v50 = vunpack.c.l.bf16 %v6426_v30  ;;  %v6705_v37 = vld [vmem:[%s5927_s15 + $0x168] sm:$0xff]  }
  0xb1   : > { %4719 = vmatmul.msk.f32.gmra.mxu2 %vm690_vm0, %v9566_v36  ;;  %4735 = vmatmul.msk.f32.gmra.mxu3 %vm690_vm0, %v9569_v31  ;;  %v9574_v36 = vunpack.c.l.bf16 %v6429_v29  ;;  %v9572_v31 = vunpack.c.l.bf16 %v6432_v28  ;;  %9846 = vst [vmem:[#allocation68_spill] sm:$0xff] %v6705_v37 }
  0xb2   : > { %1609 = vmatpush.msra.mxu0 %v6671_v55  ;;  %1674 = vmatpush.msra.mxu1 %v6671_v55  ;;  %9847 = vst [vmem:[#allocation69_spill] sm:$0xff] %v6708_v38 }
  0xb4   : > { %v6437_v62 = vpop.f32.mrf.mxu2  ;;  %v6439_v26 = vpop.f32.mrf.mxu3 }
  0xb5   : > { %9817 = vst [vmem:[#allocation39_spill] sm:$0xff] %v6437_v62  ;;  %v6443_v25 = vpop.f32.mrf.mxu0  ;;  %v6445_v24 = vpop.f32.mrf.mxu1  ;;  %v6702_v62 = vld [vmem:[%s5927_s15 + $0x128] sm:$0xff]  }
  0xb6   : > { %9818 = vst [vmem:[#allocation40_spill] sm:$0xff] %v6439_v26 }
  0xb7   : > { %9819 = vst [vmem:[#allocation41_spill] sm:$0xff] %v6443_v25 }
  0xb8   : > { %9820 = vst [vmem:[#allocation42_spill] sm:$0xff] %v6445_v24  ;;  %4688 = vmatmul.msk.f32.gmra.mxu0 %vm690_vm0, %v9575_v50  ;;  %4704 = vmatmul.msk.f32.gmra.mxu1 %vm690_vm0, %v9574_v36  ;;  %v9586_v36 = vunpack.c.h.bf16 %v6426_v30  ;;  %v9589_v50 = vunpack.c.h.bf16 %v6429_v29  ;;  %v6504_v30 = vld [vmem:[%s5927_s15 + $0x1d0] sm:$0xff]   ;;  %v9691_v24 = vunpack.c.h.bf16 %v6702_v62 }
  0xb9   : > { %4720 = vmatmul.msk.f32.gmra.mxu2 %vm690_vm0, %v9572_v31  ;;  %4736 = vmatmul.msk.f32.gmra.mxu3 %vm690_vm0, %v9573_v19  ;;  %9828 = vst [vmem:[#allocation50_spill] sm:$0xff] %v6504_v30  ;;  %v9601_v43 = vunpack.c.l.bf16 %v6504_v30  ;;  %v9629_v53 = vunpack.c.h.bf16 %v6504_v30 }
  0xba   : > { %9845 = vst [vmem:[#allocation67_spill] sm:$0xff] %v6702_v62 }
  0xbc   : > { %v6470_v31 = vpop.f32.mrf.mxu2  ;;  %v6472_v19 = vpop.f32.mrf.mxu3 }
  0xbd   : > { %9821 = vst [vmem:[#allocation43_spill] sm:$0xff] %v6470_v31  ;;  %v6476_v17 = vpop.f32.mrf.mxu0  ;;  %v6478_v16 = vpop.f32.mrf.mxu1  ;;  %v6734_v31 = vld [vmem:[%s9498_s4] sm:$0xff] }
  0xbe   : > { %9822 = vst [vmem:[#allocation44_spill] sm:$0xff] %v6472_v19  ;;  %1610 = vmatpush.msra.mxu0 %v6734_v31  ;;  %1675 = vmatpush.msra.mxu1 %v6734_v31 }
  0xbf   : > { %9823 = vst [vmem:[#allocation45_spill] sm:$0xff] %v6476_v17  ;;  %1740 = vmatpush.msra.mxu2 %v6734_v31  ;;  %1805 = vmatpush.msra.mxu3 %v6734_v31 }
  0xc0   : > { %9824 = vst [vmem:[#allocation46_spill] sm:$0xff] %v6478_v16  ;;  %4689 = vmatmul.msk.f32.gmra.mxu0 %vm690_vm0, %v9586_v36  ;;  %4705 = vmatmul.msk.f32.gmra.mxu1 %vm690_vm0, %v9589_v50  ;;  %v9603_v50 = vunpack.c.l.bf16 %v6495_v13  ;;  %v6782_v16 = vld [vmem:[%s5927_s15 + $0x170] sm:$0xff]  }
  0xc1   : > { %4721 = vmatmul.msk.f32.gmra.mxu2 %vm690_vm0, %v9590_v15  ;;  %4737 = vmatmul.msk.f32.gmra.mxu3 %vm690_vm0, %v9595_v14  ;;  %v9602_v15 = vunpack.c.l.bf16 %v6498_v12  ;;  %v9600_v14 = vunpack.c.l.bf16 %v6501_v42  ;;  %9850 = vst [vmem:[#allocation72_spill] sm:$0xff] %v6782_v16 }
  0xc2   : > { %1863 = vmatpush.msrb.mxu0 %v6285_v0  ;;  %1928 = vmatpush.msrb.mxu1 %v6285_v0 }
  0xc3   : > { %1993 = vmatpush.msrb.mxu2 %v6285_v0  ;;  %2058 = vmatpush.msrb.mxu3 %v6285_v0  ;;  %v6779_v0 = vld [vmem:[%s5927_s15 + $0x130] sm:$0xff]  }
  0xc4   : > { %v6506_v36 = vpop.f32.mrf.mxu2  ;;  %v6508_v29 = vpop.f32.mrf.mxu3  ;;  %1864 = vmatpush.msrb.mxu0 %v6338_v3  ;;  %1929 = vmatpush.msrb.mxu1 %v6338_v3  ;;  %9849 = vst [vmem:[#allocation71_spill] sm:$0xff] %v6779_v0 }
  0xc5   : > { %9829 = vst [vmem:[#allocation51_spill] sm:$0xff] %v6506_v36  ;;  %v6512_v28 = vpop.f32.mrf.mxu0  ;;  %v6514_v27 = vpop.f32.mrf.mxu1  ;;  %1994 = vmatpush.msrb.mxu2 %v6338_v3  ;;  %2059 = vmatpush.msrb.mxu3 %v6338_v3  ;;  %v6785_v3 = vld [vmem:[%s5927_s15 + $0x1b0] sm:$0xff]  }
  0xc6   : > { %9830 = vst [vmem:[#allocation52_spill] sm:$0xff] %v6508_v29  ;;  %v9688_v29 = vunpack.c.h.bf16 %v6708_v38  ;;  %1865 = vmatpush.msrb.mxu0 %v6395_v39  ;;  %1930 = vmatpush.msrb.mxu1 %v6395_v39 }
  0xc7   : > { %9831 = vst [vmem:[#allocation53_spill] sm:$0xff] %v6512_v28  ;;  %1995 = vmatpush.msrb.mxu2 %v6395_v39  ;;  %2060 = vmatpush.msrb.mxu3 %v6395_v39 }
  0xc8   : > { %9832 = vst [vmem:[#allocation54_spill] sm:$0xff] %v6514_v27  ;;  %4690 = vmatmul.msk.f32.gmra.mxu0 %vm690_vm0, %v9603_v50  ;;  %4706 = vmatmul.msk.f32.gmra.mxu1 %vm690_vm0, %v9602_v15  ;;  %v9620_v15 = vunpack.c.h.bf16 %v6495_v13  ;;  %v9623_v50 = vunpack.c.h.bf16 %v6498_v12  ;;  %v6573_v13 = vld [vmem:[%s5927_s15 + $0x1d8] sm:$0xff]  }
  0xc9   : > { %4722 = vmatmul.msk.f32.gmra.mxu2 %vm690_vm0, %v9600_v14  ;;  %4738 = vmatmul.msk.f32.gmra.mxu3 %vm690_vm0, %v9601_v43  ;;  %9838 = vst [vmem:[#allocation60_spill] sm:$0xff] %v6573_v13  ;;  %v9635_v2 = vunpack.c.l.bf16 %v6573_v13  ;;  %v9663_v4 = vunpack.c.h.bf16 %v6573_v13 }
  0xca   : > { %9851 = vst [vmem:[#allocation73_spill] sm:$0xff] %v6785_v3  ;;  %1866 = vmatpush.msrb.mxu0 %v6464_v18  ;;  %1931 = vmatpush.msrb.mxu1 %v6464_v18 }
  0xcb   : > { %1996 = vmatpush.msrb.mxu2 %v6464_v18  ;;  %2061 = vmatpush.msrb.mxu3 %v6464_v18 }
  0xcc   : > { %v6539_v14 = vpop.f32.mrf.mxu2  ;;  %v6541_v43 = vpop.f32.mrf.mxu3  ;;  %1867 = vmatpush.msrb.mxu0 %v6533_v48  ;;  %1932 = vmatpush.msrb.mxu1 %v6533_v48 }
  0xcd   : > { %9833 = vst [vmem:[#allocation55_spill] sm:$0xff] %v6539_v14  ;;  %v6545_v49 = vpop.f32.mrf.mxu0  ;;  %v6547_v51 = vpop.f32.mrf.mxu1  ;;  %1997 = vmatpush.msrb.mxu2 %v6533_v48  ;;  %2062 = vmatpush.msrb.mxu3 %v6533_v48  ;;  %v9727_v14 = vunpack.c.h.bf16 %v6866_v47 }
  0xce   : > { %9834 = vst [vmem:[#allocation56_spill] sm:$0xff] %v6541_v43  ;;  %1868 = vmatpush.msrb.mxu0 %v6602_v63  ;;  %1933 = vmatpush.msrb.mxu1 %v6602_v63 }
  0xcf   : > { %1998 = vmatpush.msrb.mxu2 %v6602_v63  ;;  %2063 = vmatpush.msrb.mxu3 %v6602_v63  ;;  %v9714_v63 = vunpack.c.h.bf16 %v6785_v3 }
  0xd0   : > { %4691 = vmatmul.msk.f32.gmra.mxu0 %vm690_vm0, %v9620_v15  ;;  %4707 = vmatmul.msk.f32.gmra.mxu1 %vm690_vm0, %v9623_v50  ;;  %v9637_v50 = vunpack.c.l.bf16 %v6564_v54 }
  0xd1   : > { %4723 = vmatmul.msk.f32.gmra.mxu2 %vm690_vm0, %v9624_v52  ;;  %4739 = vmatmul.msk.f32.gmra.mxu3 %vm690_vm0, %v9629_v53  ;;  %v9636_v52 = vunpack.c.l.bf16 %v6567_v60  ;;  %v9634_v53 = vunpack.c.l.bf16 %v6570_v1 }
  0xd2   : > { %1869 = vmatpush.msrb.mxu0 %v6671_v55  ;;  %1934 = vmatpush.msrb.mxu1 %v6671_v55 }
  0xd3   : > { %1999 = vmatpush.msrb.mxu2 %v6671_v55  ;;  %2064 = vmatpush.msrb.mxu3 %v6671_v55  ;;  %v6863_v55 = vld [vmem:[%s5927_s15 + $0x138] sm:$0xff]  }
  0xd4   : > { %v6575_v15 = vpop.f32.mrf.mxu2  ;;  %v6577_v12 = vpop.f32.mrf.mxu3  ;;  %1870 = vmatpush.msrb.mxu0 %v6734_v31  ;;  %1935 = vmatpush.msrb.mxu1 %v6734_v31  ;;  %9853 = vst [vmem:[#allocation75_spill] sm:$0xff] %v6863_v55  ;;  %v9726_v43 = vunpack.c.h.bf16 %v6863_v55 }
  0xd5   : > { %9839 = vst [vmem:[#allocation61_spill] sm:$0xff] %v6575_v15  ;;  %v6581_v42 = vpop.f32.mrf.mxu0  ;;  %v6583_v30 = vpop.f32.mrf.mxu1  ;;  %2000 = vmatpush.msrb.mxu2 %v6734_v31  ;;  %2065 = vmatpush.msrb.mxu3 %v6734_v31  ;;  %v6869_v31 = vld [vmem:[%s5927_s15 + $0x1b8] sm:$0xff]  }
  0xd6   : > { %9840 = vst [vmem:[#allocation62_spill] sm:$0xff] %v6577_v12  ;;  %v9728_v28 = vunpack.c.h.bf16 %v6869_v31 }
  0xd7   : > { %9855 = vst [vmem:[#allocation77_spill] sm:$0xff] %v6869_v31 }
  0xd8   : > { %4692 = vmatmul.msk.f32.gmra.mxu0 %vm690_vm0, %v9637_v50  ;;  %4708 = vmatmul.msk.f32.gmra.mxu1 %vm690_vm0, %v9636_v52  ;;  %v9654_v52 = vunpack.c.h.bf16 %v6564_v54  ;;  %v9657_v50 = vunpack.c.h.bf16 %v6567_v60  ;;  %v6642_v54 = vld [vmem:[%s5927_s15 + $0x1e0] sm:$0xff]  }
  0xd9   : > { %4724 = vmatmul.msk.f32.gmra.mxu2 %vm690_vm0, %v9634_v53  ;;  %4740 = vmatmul.msk.f32.gmra.mxu3 %vm690_vm0, %v9635_v2  ;;  %9844 = vst [vmem:[#allocation66_spill] sm:$0xff] %v6642_v54  ;;  %v9667_v56 = vunpack.c.l.bf16 %v6642_v54  ;;  %v9681_v26 = vunpack.c.h.bf16 %v6642_v54 }
  0xdc   : > { %v6608_v53 = vpop.f32.mrf.mxu2  ;;  %v6610_v2 = vpop.f32.mrf.mxu3 }
  0xdd   : > { %v6614_v11 = vpop.f32.mrf.mxu0  ;;  %v6616_v6 = vpop.f32.mrf.mxu1 }
  0xe0   : > { %4693 = vmatmul.msk.f32.gmra.mxu0 %vm690_vm0, %v9654_v52  ;;  %4709 = vmatmul.msk.f32.gmra.mxu1 %vm690_vm0, %v9657_v50  ;;  %v9669_v50 = vunpack.c.l.bf16 %v6633_v59 }
  0xe1   : > { %4725 = vmatmul.msk.f32.gmra.mxu2 %vm690_vm0, %v9658_v5  ;;  %4741 = vmatmul.msk.f32.gmra.mxu3 %vm690_vm0, %v9663_v4  ;;  %v9668_v5 = vunpack.c.l.bf16 %v6636_v58  ;;  %v9666_v4 = vunpack.c.l.bf16 %v6639_v57 }
  0xe4   : > { %v6644_v52 = vpop.f32.mrf.mxu2  ;;  %v6646_v60 = vpop.f32.mrf.mxu3 }
  0xe5   : > { %v6650_v1 = vpop.f32.mrf.mxu0  ;;  %v6652_v13 = vpop.f32.mrf.mxu1 }
  0xe8   : > { %4694 = vmatmul.msk.f32.gmra.mxu0 %vm690_vm0, %v9669_v50  ;;  %4710 = vmatmul.msk.f32.gmra.mxu1 %vm690_vm0, %v9668_v5  ;;  %v9672_v5 = vunpack.c.h.bf16 %v6633_v59  ;;  %v9675_v50 = vunpack.c.h.bf16 %v6636_v58  ;;  %v6711_v59 = vld [vmem:[%s5927_s15 + $0x1e8] sm:$0xff]  }
  0xe9   : > { %4726 = vmatmul.msk.f32.gmra.mxu2 %vm690_vm0, %v9666_v4  ;;  %4742 = vmatmul.msk.f32.gmra.mxu3 %vm690_vm0, %v9667_v56  ;;  %9848 = vst [vmem:[#allocation70_spill] sm:$0xff] %v6711_v59  ;;  %v9685_v19 = vunpack.c.l.bf16 %v6711_v59  ;;  %v9690_v36 = vunpack.c.h.bf16 %v6711_v59 }
  0xec   : > { %v6677_v4 = vpop.f32.mrf.mxu2  ;;  %v6679_v56 = vpop.f32.mrf.mxu3 }
  0xed   : > { %v6683_v61 = vpop.f32.mrf.mxu0  ;;  %v6685_v40 = vpop.f32.mrf.mxu1 }
  0xf0   : > { %4695 = vmatmul.msk.f32.gmra.mxu0 %vm690_vm0, %v9672_v5  ;;  %4711 = vmatmul.msk.f32.gmra.mxu1 %vm690_vm0, %v9675_v50  ;;  %v9683_v50 = vunpack.c.l.bf16 %v6702_v62  ;;  %v6788_v62 = vld [vmem:[%s5927_s15 + $0x1f0] sm:$0xff]  }
  0xf1   : > { %4727 = vmatmul.msk.f32.gmra.mxu2 %vm690_vm0, %v9676_v41  ;;  %4743 = vmatmul.msk.f32.gmra.mxu3 %vm690_vm0, %v9681_v26  ;;  %v9682_v41 = vunpack.c.l.bf16 %v6705_v37  ;;  %v9684_v26 = vunpack.c.l.bf16 %v6708_v38  ;;  %9852 = vst [vmem:[#allocation74_spill] sm:$0xff] %v6788_v62  ;;  %v9700_v39 = vunpack.c.l.bf16 %v6788_v62  ;;  %v9717_v17 = vunpack.c.h.bf16 %v6788_v62 }
  0xf2   : > { %v9725_v62 = vunpack.c.l.bf16 %v6869_v31 }
  0xf4   : > { %v6713_v5 = vpop.f32.mrf.mxu2  ;;  %v6715_v58 = vpop.f32.mrf.mxu3 }
  0xf5   : > { %v6719_v57 = vpop.f32.mrf.mxu0  ;;  %v6721_v54 = vpop.f32.mrf.mxu1 }
  0xf8   : > { %4696 = vmatmul.msk.f32.gmra.mxu0 %vm690_vm0, %v9683_v50  ;;  %4712 = vmatmul.msk.f32.gmra.mxu1 %vm690_vm0, %v9682_v41 }
  0xf9   : > { %4728 = vmatmul.msk.f32.gmra.mxu2 %vm690_vm0, %v9684_v26  ;;  %4744 = vmatmul.msk.f32.gmra.mxu3 %vm690_vm0, %v9685_v19  ;;  %v9689_v26 = vunpack.c.h.bf16 %v6705_v37  ;;  %v9699_v37 = vunpack.c.l.bf16 %v6785_v3  ;;  %v9723_v3 = vunpack.c.l.bf16 %v6866_v47 }
  0xfc   : > { %v6746_v41 = vpop.f32.mrf.mxu2  ;;  %v6748_v50 = vpop.f32.mrf.mxu3 }
  0xfd   : > { %v6754_v19 = vpop.f32.mrf.mxu0  ;;  %v6756_v25 = vpop.f32.mrf.mxu1 }
 0x100   : > { %4697 = vmatmul.msk.f32.gmra.mxu0 %vm690_vm0, %v9691_v24  ;;  %4713 = vmatmul.msk.f32.gmra.mxu1 %vm690_vm0, %v9689_v26  ;;  %v9698_v24 = vunpack.c.l.bf16 %v6782_v16 }
 0x101   : > { %4729 = vmatmul.msk.f32.gmra.mxu2 %vm690_vm0, %v9688_v29  ;;  %4745 = vmatmul.msk.f32.gmra.mxu3 %vm690_vm0, %v9690_v36  ;;  %v9701_v36 = vunpack.c.l.bf16 %v6779_v0 }
 0x104   : > { %v6794_v29 = vpop.f32.mrf.mxu2  ;;  %v6796_v26 = vpop.f32.mrf.mxu3 }
 0x105   : > { %v6802_v59 = vpop.f32.mrf.mxu0  ;;  %v6804_v38 = vpop.f32.mrf.mxu1 }
 0x108   : > { %4698 = vmatmul.msk.f32.gmra.mxu0 %vm690_vm0, %v9701_v36  ;;  %4714 = vmatmul.msk.f32.gmra.mxu1 %vm690_vm0, %v9698_v24  ;;  %v9706_v24 = vunpack.c.h.bf16 %v6779_v0  ;;  %v6872_v0 = vld [vmem:[%s5927_s15 + $0x1f8] sm:$0xff]   ;;  %s8004_s15 = scalar_lea.vmem %s10108_s1, %s5903_s22  ;;  %s5728_s1 = sshra.s32 %s4545_s16, 4  ;;  %s5729_s1 = int_to_ptr.hbm [resolvable:$true] %s5728_s1 }
 0x109   : > { %4730 = vmatmul.msk.f32.gmra.mxu2 %vm690_vm0, %v9699_v37  ;;  %4746 = vmatmul.msk.f32.gmra.mxu3 %vm690_vm0, %v9700_v39  ;;  %v9709_v37 = vunpack.c.h.bf16 %v6782_v16  ;;  %9856 = vst [vmem:[#allocation78_spill] sm:$0xff] %v6872_v0  ;;  %p5735_p0 = scmp.lt.s32.totalorder %s5729_s1, %s9505_s11 }
 0x10c   : > { %v6830_v18 = vpop.f32.mrf.mxu2  ;;  %v6832_v48 = vpop.f32.mrf.mxu3 }
 0x10d   : > { %v6838_v39 = vpop.f32.mrf.mxu0  ;;  %v6840_v36 = vpop.f32.mrf.mxu1 }
 0x110   : > { %4699 = vmatmul.msk.f32.gmra.mxu0 %vm690_vm0, %v9706_v24  ;;  %4715 = vmatmul.msk.f32.gmra.mxu1 %vm690_vm0, %v9709_v37  ;;  %v9722_v37 = vunpack.c.l.bf16 %v6863_v55 }
 0x111   : > { %4731 = vmatmul.msk.f32.gmra.mxu2 %vm690_vm0, %v9714_v63  ;;  %4747 = vmatmul.msk.f32.gmra.mxu3 %vm690_vm0, %v9717_v17  ;;  %v9724_v17 = vunpack.c.l.bf16 %v6872_v0 }
 0x114   : > { %v1021_v24 = vpop.f32.mrf.mxu2  ;;  %v1134_v16 = vpop.f32.mrf.mxu3 }
 0x115   : > { %v798_v46 = vpop.f32.mrf.mxu0  ;;  %v911_v63 = vpop.f32.mrf.mxu1 }
 0x118   : > { %4700 = vmatmul.msk.f32.gmra.mxu0 %vm690_vm0, %v9722_v37  ;;  %4716 = vmatmul.msk.f32.gmra.mxu1 %vm690_vm0, %v9723_v3  ;;  %v9729_v3 = vunpack.c.h.bf16 %v6872_v0 }
 0x119   : > { %4732 = vmatmul.msk.f32.gmra.mxu2 %vm690_vm0, %v9725_v62  ;;  %4748 = vmatmul.msk.f32.gmra.mxu3 %vm690_vm0, %v9724_v17 }
 0x11c   : > { %v1024_v45 = vpop.f32.mrf.mxu2  ;;  %v1137_v44 = vpop.f32.mrf.mxu3 }
 0x11d   : > { %v801_v27 = vpop.f32.mrf.mxu0  ;;  %v914_v37 = vpop.f32.mrf.mxu1 }
 0x120   : > { %4701 = vmatmul.msk.f32.gmra.mxu0 %vm690_vm0, %v9726_v43  ;;  %4717 = vmatmul.msk.f32.gmra.mxu1 %vm690_vm0, %v9727_v14  ;;  %v9859_v43 = vunpack.c.l.bf16 %v5946_v7  ;;  %v9860_v14 = vunpack.c.l.bf16 %v5949_v8 }
 0x121   : > { %4733 = vmatmul.msk.f32.gmra.mxu2 %vm690_vm0, %v9728_v28  ;;  %4749 = vmatmul.msk.f32.gmra.mxu3 %vm690_vm0, %v9729_v3  ;;  %v9861_v28 = vunpack.c.l.bf16 %v5954_v9  ;;  %v9862_v3 = vunpack.c.l.bf16 %v5957_v10 }
 0x124   : > { %v1027_v17 = vpop.f32.mrf.mxu2  ;;  %v1140_v62 = vpop.f32.mrf.mxu3 }
 0x125   : > { %v6906_v12 = vpop.f32.mrf.mxu0  ;;  %v6908_v15 = vpop.f32.mrf.mxu1 }
 0x126   : > { %9857 = vst [vmem:[#allocation79_spill] sm:$0xff] %v6906_v12 }
 0x127   : > { %9858 = vst [vmem:[#allocation80_spill] sm:$0xff] %v6908_v15  ;;  %v9961_v15 = vld [vmem:[#allocation21_spill] sm:$0xff] }
 0x128   : > { %4750 = vmatmul.msk.f32.vlgmr.msra.gmra.mxu0 %vm690_vm0, %v9859_v43  ;;  %4766 = vmatmul.msk.f32.vlgmr.msra.gmra.mxu1 %vm690_vm0, %v9860_v14 }
 0x129   : > { %4782 = vmatmul.msk.f32.vlgmr.msra.gmra.mxu2 %vm690_vm0, %v9861_v28  ;;  %4798 = vmatmul.msk.f32.vlgmr.msra.gmra.mxu3 %vm690_vm0, %v9862_v3  ;;  %v9869_v28 = vunpack.c.h.bf16 %v5954_v9 }
 0x12a   : > { %4878 = vmatpush.xpose.msk.msra.mxu0 %vm690_vm0, %v801_v27  ;;  %4902 = vmatpush.xpose.msk.msra.mxu1 %vm690_vm0, %v914_v37  ;;  %v9868_v27 = vunpack.c.h.bf16 %v5949_v8  ;;  %v9870_v37 = vunpack.c.h.bf16 %v5957_v10  ;;  %v9873_v10 = vunpack.c.l.bf16 %v6015_v20 }
 0x12b   : > { %4926 = vmatpush.xpose.msk.msra.mxu2 %vm690_vm0, %v1027_v17  ;;  %4950 = vmatpush.xpose.msk.msra.mxu3 %vm690_vm0, %v1140_v62  ;;  %v9867_v17 = vunpack.c.h.bf16 %v5946_v7  ;;  %v9893_v62 = vld [vmem:[#allocation53_spill] sm:$0xff] }
 0x12c   : > { %v6926_v43 = vpop.f32.mrf.mxu2  ;;  %v6928_v0 = vpop.f32.mrf.mxu3 }
 0x12d   : > { %9863 = vst [vmem:[#allocation81_spill] sm:$0xff] %v6926_v43  ;;  %v6930_v14 = vpop.f32.mrf.mxu0  ;;  %v6932_v31 = vpop.f32.mrf.mxu1 }
 0x12e   : > { %9864 = vst [vmem:[#allocation82_spill] sm:$0xff] %v6928_v0  ;;  %4879 = vmatpush.xpose.msk.msra.mxu0 %vm690_vm0, %v798_v46  ;;  %4903 = vmatpush.xpose.msk.msra.mxu1 %vm690_vm0, %v911_v63  ;;  %v9906_v63 = vld [vmem:[#allocation46_spill] sm:$0xff] }
 0x12f   : > { %9865 = vst [vmem:[#allocation83_spill] sm:$0xff] %v6930_v14  ;;  %4927 = vmatpush.xpose.msk.msra.mxu2 %vm690_vm0, %v1024_v45  ;;  %4951 = vmatpush.xpose.msk.msra.mxu3 %vm690_vm0, %v1137_v44 }
 0x130   : > { %9866 = vst [vmem:[#allocation84_spill] sm:$0xff] %v6932_v31  ;;  %4751 = vmatmul.msk.f32.gmra.mxu0 %vm690_vm0, %v9867_v17  ;;  %4767 = vmatmul.msk.f32.gmra.mxu1 %vm690_vm0, %v9868_v27  ;;  %v9907_v17 = vld [vmem:[#allocation51_spill] sm:$0xff]  ;;  %v9908_v27 = vld [vmem:[#allocation52_spill] sm:$0xff]  ;;  %v9969_v31 = vunpack.c.h.bf16 %v9961_v15 }
 0x131   : > { %4783 = vmatmul.msk.f32.gmra.mxu2 %vm690_vm0, %v9869_v28  ;;  %4799 = vmatmul.msk.f32.gmra.mxu3 %vm690_vm0, %v9870_v37 }
 0x132   : > { %4880 = vmatpush.xpose.msk.msra.mxu0 %vm690_vm0, %v6838_v39  ;;  %4904 = vmatpush.xpose.msk.msra.mxu1 %vm690_vm0, %v6840_v36  ;;  %v9876_v36 = vunpack.c.l.bf16 %v6024_v23  ;;  %v9903_v39 = vld [vmem:[#allocation8_spill] sm:$0xff] }
 0x133   : > { %4928 = vmatpush.xpose.msk.msra.mxu2 %vm690_vm0, %v1021_v24  ;;  %4952 = vmatpush.xpose.msk.msra.mxu3 %vm690_vm0, %v1134_v16  ;;  %v9874_v16 = vunpack.c.l.bf16 %v6018_v21  ;;  %v9875_v24 = vunpack.c.l.bf16 %v6021_v22 }
 0x134   : > { %v6956_v7 = vpop.f32.mrf.mxu2  ;;  %v6958_v8 = vpop.f32.mrf.mxu3 }
 0x135   : > { %9871 = vst [vmem:[#allocation85_spill] sm:$0xff] %v6956_v7  ;;  %v6960_v9 = vpop.f32.mrf.mxu0  ;;  %v6962_v44 = vpop.f32.mrf.mxu1 }
 0x136   : > { %9872 = vst [vmem:[#allocation86_spill] sm:$0xff] %v6958_v8  ;;  %4881 = vmatpush.xpose.msk.msra.mxu0 %vm690_vm0, %v6802_v59  ;;  %4905 = vmatpush.xpose.msk.msra.mxu1 %vm690_vm0, %v6804_v38 }
 0x137   : > { %4929 = vmatpush.xpose.msk.msra.mxu2 %vm690_vm0, %v6830_v18  ;;  %4953 = vmatpush.xpose.msk.msra.mxu3 %vm690_vm0, %v6832_v48  ;;  %v9904_v18 = vunpack.c.l.bf16 %v9903_v39  ;;  %v9905_v48 = vld [vmem:[#allocation45_spill] sm:$0xff] }
 0x138   : > { %4752 = vmatmul.msk.f32.gmra.mxu0 %vm690_vm0, %v9873_v10  ;;  %4768 = vmatmul.msk.f32.gmra.mxu1 %vm690_vm0, %v9874_v16 }
 0x139   : > { %4784 = vmatmul.msk.f32.gmra.mxu2 %vm690_vm0, %v9875_v24  ;;  %4800 = vmatmul.msk.f32.gmra.mxu3 %vm690_vm0, %v9876_v36  ;;  %v9909_v24 = vld [vmem:[#allocation41_spill] sm:$0xff]  ;;  %v9910_v36 = vld [vmem:[#allocation42_spill] sm:$0xff] }
 0x13a   : > { %4882 = vmatpush.xpose.msk.msra.mxu0 %vm690_vm0, %v6754_v19  ;;  %4906 = vmatpush.xpose.msk.msra.mxu1 %vm690_vm0, %v6756_v25  ;;  %v9879_v19 = vunpack.c.h.bf16 %v6015_v20  ;;  %v9880_v25 = vunpack.c.h.bf16 %v6018_v21 }
 0x13b   : > { %4930 = vmatpush.xpose.msk.msra.mxu2 %vm690_vm0, %v6794_v29  ;;  %4954 = vmatpush.xpose.msk.msra.mxu3 %vm690_vm0, %v6796_v26  ;;  %v9881_v26 = vunpack.c.h.bf16 %v6021_v22  ;;  %v9882_v29 = vunpack.c.h.bf16 %v6024_v23 }
 0x13c   : > { %v6992_v38 = vpop.f32.mrf.mxu2  ;;  %v6994_v45 = vpop.f32.mrf.mxu3 }
 0x13d   : > { %9877 = vst [vmem:[#allocation87_spill] sm:$0xff] %v6992_v38  ;;  %v6996_v46 = vpop.f32.mrf.mxu0  ;;  %v6998_v59 = vpop.f32.mrf.mxu1 }
 0x13e   : > { %9878 = vst [vmem:[#allocation88_spill] sm:$0xff] %v6994_v45  ;;  %4883 = vmatpush.xpose.msk.msra.mxu0 %vm690_vm0, %v6719_v57  ;;  %4907 = vmatpush.xpose.msk.msra.mxu1 %vm690_vm0, %v6721_v54 }
 0x13f   : > { %4931 = vmatpush.xpose.msk.msra.mxu2 %vm690_vm0, %v6746_v41  ;;  %4955 = vmatpush.xpose.msk.msra.mxu3 %vm690_vm0, %v6748_v50  ;;  %v9884_v41 = vunpack.c.l.bf16 %v6082_v33  ;;  %v9885_v50 = vunpack.c.l.bf16 %v6085_v34 }
 0x140   : > { %4753 = vmatmul.msk.f32.gmra.mxu0 %vm690_vm0, %v9879_v19  ;;  %4769 = vmatmul.msk.f32.gmra.mxu1 %vm690_vm0, %v9880_v25  ;;  %v9911_v19 = vld [vmem:[#allocation43_spill] sm:$0xff]  ;;  %v9912_v25 = vld [vmem:[#allocation44_spill] sm:$0xff] }
 0x141   : > { %4785 = vmatmul.msk.f32.gmra.mxu2 %vm690_vm0, %v9881_v26  ;;  %4801 = vmatmul.msk.f32.gmra.mxu3 %vm690_vm0, %v9882_v29 }
 0x142   : > { %4884 = vmatpush.xpose.msk.msra.mxu0 %vm690_vm0, %v6683_v61  ;;  %4908 = vmatpush.xpose.msk.msra.mxu1 %vm690_vm0, %v6685_v40  ;;  %v9883_v40 = vunpack.c.l.bf16 %v6079_v32  ;;  %v9889_v61 = vunpack.c.h.bf16 %v6085_v34 }
 0x143   : > { %4932 = vmatpush.xpose.msk.msra.mxu2 %vm690_vm0, %v6713_v5  ;;  %4956 = vmatpush.xpose.msk.msra.mxu3 %vm690_vm0, %v6715_v58  ;;  %v9899_v5 = vld [vmem:[#allocation6_spill] sm:$0xff] }
 0x144   : > { %v7028_v20 = vpop.f32.mrf.mxu2  ;;  %v7030_v21 = vpop.f32.mrf.mxu3  ;;  %v9914_v29 = vunpack.c.h.bf16 %v9899_v5 }
 0x145   : > { %v7032_v22 = vpop.f32.mrf.mxu0  ;;  %v7034_v23 = vpop.f32.mrf.mxu1 }
 0x146   : > { %4885 = vmatpush.xpose.msk.msra.mxu0 %vm690_vm0, %v6650_v1  ;;  %4909 = vmatpush.xpose.msk.msra.mxu1 %vm690_vm0, %v6652_v13  ;;  %v9886_v13 = vunpack.c.l.bf16 %v6088_v35  ;;  %v9896_v1 = vld [vmem:[#allocation56_spill] sm:$0xff] }
 0x147   : > { %4933 = vmatpush.xpose.msk.msra.mxu2 %vm690_vm0, %v6677_v4  ;;  %4957 = vmatpush.xpose.msk.msra.mxu3 %vm690_vm0, %v6679_v56 }
 0x148   : > { %4754 = vmatmul.msk.f32.gmra.mxu0 %vm690_vm0, %v9883_v40  ;;  %4770 = vmatmul.msk.f32.gmra.mxu1 %vm690_vm0, %v9884_v41  ;;  %v9916_v41 = vunpack.c.h.bf16 %v9903_v39  ;;  %v9931_v39 = vld [vmem:[#allocation12_spill] sm:$0xff] }
 0x149   : > { %4786 = vmatmul.msk.f32.gmra.mxu2 %vm690_vm0, %v9885_v50  ;;  %4802 = vmatmul.msk.f32.gmra.mxu3 %vm690_vm0, %v9886_v13  ;;  %v9917_v50 = vld [vmem:[#allocation33_spill] sm:$0xff]  ;;  %v9918_v13 = vld [vmem:[#allocation34_spill] sm:$0xff] }
 0x14a   : > { %4886 = vmatpush.xpose.msk.msra.mxu0 %vm690_vm0, %v6614_v11  ;;  %4910 = vmatpush.xpose.msk.msra.mxu1 %vm690_vm0, %v6616_v6  ;;  %v9900_v6 = vunpack.c.l.bf16 %v9899_v5  ;;  %v9901_v11 = vld [vmem:[#allocation7_spill] sm:$0xff]  ;;  %v9927_v5 = vld [vmem:[#allocation10_spill] sm:$0xff] }
 0x14b   : > { %4934 = vmatpush.xpose.msk.msra.mxu2 %vm690_vm0, %v6644_v52  ;;  %4958 = vmatpush.xpose.msk.msra.mxu3 %vm690_vm0, %v6646_v60  ;;  %v9887_v52 = vunpack.c.h.bf16 %v6079_v32  ;;  %v9888_v60 = vunpack.c.h.bf16 %v6082_v33  ;;  %v9891_v32 = vld [vmem:[#allocation61_spill] sm:$0xff]  ;;  %v9892_v33 = vld [vmem:[#allocation62_spill] sm:$0xff]  ;;  %v9902_v3 = vunpack.c.l.bf16 %v9901_v11  ;;  %v9915_v40 = vunpack.c.h.bf16 %v9901_v11  ;;  %v9929_v11 = vld [vmem:[#allocation11_spill] sm:$0xff] }
 0x14c   : > { %v7064_v54 = vpop.f32.mrf.mxu2  ;;  %v7066_v56 = vpop.f32.mrf.mxu3 }
 0x14d   : > { %v7068_v57 = vpop.f32.mrf.mxu0  ;;  %v7070_v58 = vpop.f32.mrf.mxu1 }
 0x14e   : > { %4887 = vmatpush.xpose.msk.msra.mxu0 %vm690_vm0, %v6581_v42  ;;  %4911 = vmatpush.xpose.msk.msra.mxu1 %vm690_vm0, %v6583_v30  ;;  %v9890_v30 = vunpack.c.h.bf16 %v6088_v35 }
 0x14f   : > { %4935 = vmatpush.xpose.msk.msra.mxu2 %vm690_vm0, %v6608_v53  ;;  %4959 = vmatpush.xpose.msk.msra.mxu3 %vm690_vm0, %v6610_v2  ;;  %v9897_v2 = vld [vmem:[#allocation5_spill] sm:$0xff] }
 0x150   : > { %4755 = vmatmul.msk.f32.gmra.mxu0 %vm690_vm0, %v9887_v52  ;;  %4771 = vmatmul.msk.f32.gmra.mxu1 %vm690_vm0, %v9888_v60  ;;  %v9898_v4 = vunpack.c.l.bf16 %v9897_v2  ;;  %v9913_v26 = vunpack.c.h.bf16 %v9897_v2  ;;  %v9919_v52 = vld [vmem:[#allocation39_spill] sm:$0xff]  ;;  %v9920_v60 = vld [vmem:[#allocation40_spill] sm:$0xff]  ;;  %v9925_v2 = vld [vmem:[#allocation9_spill] sm:$0xff] }
 0x151   : > { %4787 = vmatmul.msk.f32.gmra.mxu2 %vm690_vm0, %v9889_v61  ;;  %4803 = vmatmul.msk.f32.gmra.mxu3 %vm690_vm0, %v9890_v30 }
 0x152   : > { %4888 = vmatpush.xpose.msk.msra.mxu0 %vm690_vm0, %v6545_v49  ;;  %4912 = vmatpush.xpose.msk.msra.mxu1 %vm690_vm0, %v6547_v51  ;;  %v9894_v49 = vld [vmem:[#allocation54_spill] sm:$0xff]  ;;  %v9895_v51 = vld [vmem:[#allocation55_spill] sm:$0xff] }
 0x153   : > { %4936 = vmatpush.xpose.msk.msra.mxu2 %vm690_vm0, %v9891_v32  ;;  %4960 = vmatpush.xpose.msk.msra.mxu3 %vm690_vm0, %v9892_v33 }
 0x154   : > { %v7100_v42 = vpop.f32.mrf.mxu2  ;;  %v7102_v34 = vpop.f32.mrf.mxu3 }
 0x155   : > { %v7104_v53 = vpop.f32.mrf.mxu0  ;;  %v7106_v35 = vpop.f32.mrf.mxu1 }
 0x156   : > { %4889 = vmatpush.xpose.msk.msra.mxu0 %vm690_vm0, %v9893_v62  ;;  %4913 = vmatpush.xpose.msk.msra.mxu1 %vm690_vm0, %v9894_v49  ;;  %v9921_v62 = vld [vmem:[#allocation29_spill] sm:$0xff]  ;;  %v9922_v49 = vld [vmem:[#allocation30_spill] sm:$0xff] }
 0x157   : > { %4937 = vmatpush.xpose.msk.msra.mxu2 %vm690_vm0, %v9895_v51  ;;  %4961 = vmatpush.xpose.msk.msra.mxu3 %vm690_vm0, %v9896_v1  ;;  %v9923_v51 = vld [vmem:[#allocation31_spill] sm:$0xff]  ;;  %v9924_v1 = vld [vmem:[#allocation32_spill] sm:$0xff] }
 0x158   : > { %4756 = vmatmul.msk.f32.gmra.mxu0 %vm690_vm0, %v9898_v4  ;;  %4772 = vmatmul.msk.f32.gmra.mxu1 %vm690_vm0, %v9900_v6  ;;  %v9926_v4 = vunpack.c.l.bf16 %v9925_v2  ;;  %v9928_v6 = vunpack.c.l.bf16 %v9927_v5 }
 0x159   : > { %4788 = vmatmul.msk.f32.gmra.mxu2 %vm690_vm0, %v9902_v3  ;;  %4804 = vmatmul.msk.f32.gmra.mxu3 %vm690_vm0, %v9904_v18  ;;  %v9930_v3 = vunpack.c.l.bf16 %v9929_v11  ;;  %v9932_v18 = vunpack.c.l.bf16 %v9931_v39 }
 0x15a   : > { %4890 = vmatpush.xpose.msk.msra.mxu0 %vm690_vm0, %v9905_v48  ;;  %4914 = vmatpush.xpose.msk.msra.mxu1 %vm690_vm0, %v9906_v63 }
 0x15b   : > { %4938 = vmatpush.xpose.msk.msra.mxu2 %vm690_vm0, %v9907_v17  ;;  %4962 = vmatpush.xpose.msk.msra.mxu3 %vm690_vm0, %v9908_v27 }
 0x15c   : > { %v7136_v28 = vpop.f32.mrf.mxu2  ;;  %v7138_v37 = vpop.f32.mrf.mxu3 }
 0x15d   : > { %v7140_v10 = vpop.f32.mrf.mxu0  ;;  %v7142_v16 = vpop.f32.mrf.mxu1 }
 0x15e   : > { %4891 = vmatpush.xpose.msk.msra.mxu0 %vm690_vm0, %v9909_v24  ;;  %4915 = vmatpush.xpose.msk.msra.mxu1 %vm690_vm0, %v9910_v36  ;;  %v9933_v24 = vunpack.c.h.bf16 %v9925_v2  ;;  %v9934_v36 = vunpack.c.h.bf16 %v9927_v5 }
 0x15f   : > { %4939 = vmatpush.xpose.msk.msra.mxu2 %vm690_vm0, %v9911_v19  ;;  %4963 = vmatpush.xpose.msk.msra.mxu3 %vm690_vm0, %v9912_v25  ;;  %v9935_v19 = vunpack.c.h.bf16 %v9929_v11  ;;  %v9936_v25 = vunpack.c.h.bf16 %v9931_v39 }
 0x160   : > { %4757 = vmatmul.msk.f32.gmra.mxu0 %vm690_vm0, %v9913_v26  ;;  %4773 = vmatmul.msk.f32.gmra.mxu1 %vm690_vm0, %v9914_v29 }
 0x161   : > { %4789 = vmatmul.msk.f32.gmra.mxu2 %vm690_vm0, %v9915_v40  ;;  %4805 = vmatmul.msk.f32.gmra.mxu3 %vm690_vm0, %v9916_v41 }
 0x162   : > { %4892 = vmatpush.xpose.msk.msra.mxu0 %vm690_vm0, %v9917_v50  ;;  %4916 = vmatpush.xpose.msk.msra.mxu1 %vm690_vm0, %v9918_v13  ;;  %v9937_v50 = vld [vmem:[#allocation13_spill] sm:$0xff] }
 0x163   : > { %4940 = vmatpush.xpose.msk.msra.mxu2 %vm690_vm0, %v9919_v52  ;;  %4964 = vmatpush.xpose.msk.msra.mxu3 %vm690_vm0, %v9920_v60  ;;  %v9938_v13 = vunpack.c.l.bf16 %v9937_v50  ;;  %v9939_v52 = vld [vmem:[#allocation14_spill] sm:$0xff]  ;;  %v9945_v11 = vunpack.c.h.bf16 %v9937_v50  ;;  %v9949_v50 = vld [vmem:[#allocation17_spill] sm:$0xff] }
 0x164   : > { %v7172_v61 = vpop.f32.mrf.mxu2  ;;  %v7174_v30 = vpop.f32.mrf.mxu3  ;;  %v9940_v60 = vunpack.c.l.bf16 %v9939_v52  ;;  %v9957_v47 = vunpack.c.h.bf16 %v9949_v50 }
 0x165   : > { %v7176_v32 = vpop.f32.mrf.mxu0  ;;  %v7178_v33 = vpop.f32.mrf.mxu1 }
 0x166   : > { %4893 = vmatpush.xpose.msk.msra.mxu0 %vm690_vm0, %v9921_v62  ;;  %4917 = vmatpush.xpose.msk.msra.mxu1 %vm690_vm0, %v9922_v49  ;;  %v9941_v62 = vld [vmem:[#allocation15_spill] sm:$0xff] }
 0x167   : > { %4941 = vmatpush.xpose.msk.msra.mxu2 %vm690_vm0, %v9923_v51  ;;  %4965 = vmatpush.xpose.msk.msra.mxu3 %vm690_vm0, %v9924_v1  ;;  %v9942_v49 = vunpack.c.l.bf16 %v9941_v62  ;;  %v9943_v51 = vld [vmem:[#allocation16_spill] sm:$0xff]  ;;  %v9947_v39 = vunpack.c.h.bf16 %v9941_v62  ;;  %v9953_v62 = vld [vmem:[#allocation19_spill] sm:$0xff] }
 0x168   : > { %4758 = vmatmul.msk.f32.gmra.mxu0 %vm690_vm0, %v9926_v4  ;;  %4774 = vmatmul.msk.f32.gmra.mxu1 %vm690_vm0, %v9928_v6  ;;  %v9944_v1 = vunpack.c.l.bf16 %v9943_v51 }
 0x169   : > { %4790 = vmatmul.msk.f32.gmra.mxu2 %vm690_vm0, %v9930_v3  ;;  %4806 = vmatmul.msk.f32.gmra.mxu3 %vm690_vm0, %v9932_v18  ;;  %v9946_v3 = vunpack.c.h.bf16 %v9939_v52  ;;  %v9948_v18 = vunpack.c.h.bf16 %v9943_v51  ;;  %v9951_v52 = vld [vmem:[#allocation18_spill] sm:$0xff]  ;;  %v9955_v51 = vld [vmem:[#allocation20_spill] sm:$0xff] }
 0x16c   : > { %v7200_v48 = vpop.f32.mrf.mxu2  ;;  %v7202_v63 = vpop.f32.mrf.mxu3 }
 0x16d   : > { %v7204_v17 = vpop.f32.mrf.mxu0  ;;  %v7206_v27 = vpop.f32.mrf.mxu1 }
 0x170   : > { %4759 = vmatmul.msk.f32.gmra.mxu0 %vm690_vm0, %v9933_v24  ;;  %4775 = vmatmul.msk.f32.gmra.mxu1 %vm690_vm0, %v9934_v36 }
 0x171   : > { %4791 = vmatmul.msk.f32.gmra.mxu2 %vm690_vm0, %v9935_v19  ;;  %4807 = vmatmul.msk.f32.gmra.mxu3 %vm690_vm0, %v9936_v25 }
 0x174   : > { %v7220_v26 = vpop.f32.mrf.mxu2  ;;  %v7222_v29 = vpop.f32.mrf.mxu3 }
 0x175   : > { %v7224_v40 = vpop.f32.mrf.mxu0  ;;  %v7226_v41 = vpop.f32.mrf.mxu1 }
 0x178   : > { %4760 = vmatmul.msk.f32.gmra.mxu0 %vm690_vm0, %v9938_v13  ;;  %4776 = vmatmul.msk.f32.gmra.mxu1 %vm690_vm0, %v9940_v60  ;;  %v9950_v13 = vunpack.c.l.bf16 %v9949_v50  ;;  %v9952_v60 = vunpack.c.l.bf16 %v9951_v52  ;;  %v9962_v50 = vunpack.c.l.bf16 %v9961_v15  ;;  %v9975_v15 = vld [vmem:[#allocation25_spill] sm:$0xff] }
 0x179   : > { %4792 = vmatmul.msk.f32.gmra.mxu2 %vm690_vm0, %v9942_v49  ;;  %4808 = vmatmul.msk.f32.gmra.mxu3 %vm690_vm0, %v9944_v1  ;;  %v9954_v49 = vunpack.c.l.bf16 %v9953_v62  ;;  %v9956_v1 = vunpack.c.l.bf16 %v9955_v51 }
 0x17c   : > { %v7240_v2 = vpop.f32.mrf.mxu2  ;;  %v7242_v4 = vpop.f32.mrf.mxu3 }
 0x17d   : > { %v7244_v5 = vpop.f32.mrf.mxu0  ;;  %v7246_v6 = vpop.f32.mrf.mxu1 }
 0x180   : > { %4761 = vmatmul.msk.f32.gmra.mxu0 %vm690_vm0, %v9945_v11  ;;  %4777 = vmatmul.msk.f32.gmra.mxu1 %vm690_vm0, %v9946_v3 }
 0x181   : > { %4793 = vmatmul.msk.f32.gmra.mxu2 %vm690_vm0, %v9947_v39  ;;  %4809 = vmatmul.msk.f32.gmra.mxu3 %vm690_vm0, %v9948_v18 }
 0x184   : > { %v7260_v24 = vpop.f32.mrf.mxu2  ;;  %v7262_v36 = vpop.f32.mrf.mxu3 }
 0x185   : > { %v1244_v19 = vpop.f32.mrf.mxu0  ;;  %v1357_v25 = vpop.f32.mrf.mxu1 }
 0x188   : > { %4762 = vmatmul.msk.f32.gmra.mxu0 %vm690_vm0, %v9950_v13  ;;  %4778 = vmatmul.msk.f32.gmra.mxu1 %vm690_vm0, %v9952_v60  ;;  %v9958_v13 = vunpack.c.h.bf16 %v9951_v52  ;;  %v9959_v60 = vunpack.c.h.bf16 %v9953_v62 }
 0x189   : > { %4794 = vmatmul.msk.f32.gmra.mxu2 %vm690_vm0, %v9954_v49  ;;  %4810 = vmatmul.msk.f32.gmra.mxu3 %vm690_vm0, %v9956_v1  ;;  %v9960_v49 = vunpack.c.h.bf16 %v9955_v51 }
 0x18c   : > { %v1470_v11 = vpop.f32.mrf.mxu2  ;;  %v1583_v3 = vpop.f32.mrf.mxu3 }
 0x18d   : > { %v1247_v39 = vpop.f32.mrf.mxu0  ;;  %v1360_v18 = vpop.f32.mrf.mxu1 }
 0x190   : > { %4763 = vmatmul.msk.f32.gmra.mxu0 %vm690_vm0, %v9957_v47  ;;  %4779 = vmatmul.msk.f32.gmra.mxu1 %vm690_vm0, %v9958_v13  ;;  %v9963_v47 = vld [vmem:[#allocation22_spill] sm:$0xff]  ;;  %v9965_v13 = vld [vmem:[#allocation23_spill] sm:$0xff] }
 0x191   : > { %4795 = vmatmul.msk.f32.gmra.mxu2 %vm690_vm0, %v9959_v60  ;;  %4811 = vmatmul.msk.f32.gmra.mxu3 %vm690_vm0, %v9960_v49  ;;  %v9964_v52 = vunpack.c.l.bf16 %v9963_v47  ;;  %v9966_v62 = vunpack.c.l.bf16 %v9965_v13  ;;  %v9967_v60 = vld [vmem:[#allocation24_spill] sm:$0xff] }
 0x192   : > { %v9968_v51 = vunpack.c.l.bf16 %v9967_v60 }
 0x194   : > { %v1473_v1 = vpop.f32.mrf.mxu2  ;;  %v1586_v55 = vpop.f32.mrf.mxu3 }
 0x195   : > { %v1250_v0 = vpop.f32.mrf.mxu0  ;;  %v1363_v43 = vpop.f32.mrf.mxu1 }
 0x198   : > { %4764 = vmatmul.msk.f32.gmra.mxu0 %vm690_vm0, %v9962_v50  ;;  %4780 = vmatmul.msk.f32.gmra.mxu1 %vm690_vm0, %v9964_v52  ;;  %v9970_v50 = vunpack.c.h.bf16 %v9963_v47  ;;  %v9971_v52 = vunpack.c.h.bf16 %v9965_v13  ;;  %v9977_v47 = vld [vmem:[#allocation26_spill] sm:$0xff]  ;;  %v9979_v13 = vld [vmem:[#allocation27_spill] sm:$0xff] }
 0x199   : > { %4796 = vmatmul.msk.f32.gmra.mxu2 %vm690_vm0, %v9966_v62  ;;  %4812 = vmatmul.msk.f32.gmra.mxu3 %vm690_vm0, %v9968_v51  ;;  %v9972_v62 = vunpack.c.h.bf16 %v9967_v60  ;;  %v9981_v60 = vld [vmem:[#allocation28_spill] sm:$0xff] }
 0x19c   : > { %v1476_v49 = vpop.f32.mrf.mxu2  ;;  %v1589_v12 = vpop.f32.mrf.mxu3 }
 0x19d   : > { %v1253_v8 = vpop.f32.mrf.mxu0  ;;  %v1366_v7 = vpop.f32.mrf.mxu1 }
 0x1a0   : > { %4765 = vmatmul.msk.f32.gmra.mxu0 %vm690_vm0, %v9969_v31  ;;  %4781 = vmatmul.msk.f32.gmra.mxu1 %vm690_vm0, %v9970_v50  ;;  %v9976_v31 = vunpack.c.l.bf16 %v9975_v15  ;;  %v9978_v50 = vunpack.c.l.bf16 %v9977_v47 }
 0x1a1   : > { %4797 = vmatmul.msk.f32.gmra.mxu2 %vm690_vm0, %v9971_v52  ;;  %4813 = vmatmul.msk.f32.gmra.mxu3 %vm690_vm0, %v9972_v62  ;;  %v9980_v52 = vunpack.c.l.bf16 %v9979_v13  ;;  %v9982_v62 = vunpack.c.l.bf16 %v9981_v60 }
 0x1a4   : > { %v1479_v51 = vpop.f32.mrf.mxu2  ;;  %v1592_v14 = vpop.f32.mrf.mxu3 }
 0x1a5   : > { %v7312_v45 = vpop.f32.mrf.mxu0  ;;  %v7314_v38 = vpop.f32.mrf.mxu1 }
 0x1a6   : > { %9973 = vst [vmem:[#allocation61_spill] sm:$0xff] %v7312_v45 }
 0x1a7   : > { %9974 = vst [vmem:[#allocation62_spill] sm:$0xff] %v7314_v38 }
 0x1a8   : > { %4814 = vmatmul.msk.f32.vlgmr.msrb.gmra.mxu0 %vm690_vm0, %v9976_v31  ;;  %4830 = vmatmul.msk.f32.vlgmr.msrb.gmra.mxu1 %vm690_vm0, %v9978_v50 }
 0x1a9   : > { %4846 = vmatmul.msk.f32.vlgmr.msrb.gmra.mxu2 %vm690_vm0, %v9980_v52  ;;  %4862 = vmatmul.msk.f32.vlgmr.msrb.gmra.mxu3 %vm690_vm0, %v9982_v62 }
 0x1aa   : > { %4974 = vmatpush.xpose.msk.msrb.mxu0 %vm690_vm0, %v1253_v8  ;;  %4998 = vmatpush.xpose.msk.msrb.mxu1 %vm690_vm0, %v1366_v7  ;;  %v9987_v7 = vunpack.c.h.bf16 %v9975_v15  ;;  %v9989_v8 = vunpack.c.h.bf16 %v9979_v13  ;;  %v9997_v15 = vld [vmem:[#allocation37_spill] sm:$0xff]  ;;  %v9999_v13 = vld [vmem:[#allocation38_spill] sm:$0xff] }
 0x1ab   : > { %5022 = vmatpush.xpose.msk.msrb.mxu2 %vm690_vm0, %v1479_v51  ;;  %5046 = vmatpush.xpose.msk.msrb.mxu3 %vm690_vm0, %v1592_v14  ;;  %v9988_v14 = vunpack.c.h.bf16 %v9977_v47  ;;  %v9998_v47 = vunpack.c.l.bf16 %v9997_v15 }
 0x1ac   : > { %v7332_v31 = vpop.f32.mrf.mxu2  ;;  %v7334_v38 = vpop.f32.mrf.mxu3 }
 0x1ad   : > { %9983 = vst [vmem:[#allocation53_spill] sm:$0xff] %v7332_v31  ;;  %v7336_v50 = vpop.f32.mrf.mxu0  ;;  %v7338_v45 = vpop.f32.mrf.mxu1 }
 0x1ae   : > { %9984 = vst [vmem:[#allocation54_spill] sm:$0xff] %v7334_v38  ;;  %4975 = vmatpush.xpose.msk.msrb.mxu0 %vm690_vm0, %v1250_v0  ;;  %4999 = vmatpush.xpose.msk.msrb.mxu1 %vm690_vm0, %v1363_v43  ;;  %v9990_v0 = vunpack.c.h.bf16 %v9981_v60  ;;  %v10011_v60 = vld [vmem:[#allocation49_spill] sm:$0xff]  ;;  %v10077_v38 = vld [vmem:[#allocation75_spill] sm:$0xff] }
 0x1af   : > { %9985 = vst [vmem:[#allocation55_spill] sm:$0xff] %v7336_v50  ;;  %5023 = vmatpush.xpose.msk.msrb.mxu2 %vm690_vm0, %v1476_v49  ;;  %5047 = vmatpush.xpose.msk.msrb.mxu3 %vm690_vm0, %v1589_v12  ;;  %v10012_v62 = vunpack.c.l.bf16 %v10011_v60 }
 0x1b0   : > { %9986 = vst [vmem:[#allocation56_spill] sm:$0xff] %v7338_v45  ;;  %4815 = vmatmul.msk.f32.gmra.mxu0 %vm690_vm0, %v9987_v7  ;;  %4831 = vmatmul.msk.f32.gmra.mxu1 %vm690_vm0, %v9988_v14  ;;  %v10085_v45 = vunpack.c.h.bf16 %v10077_v38 }
 0x1b1   : > { %4847 = vmatmul.msk.f32.gmra.mxu2 %vm690_vm0, %v9989_v8  ;;  %4863 = vmatmul.msk.f32.gmra.mxu3 %vm690_vm0, %v9990_v0  ;;  %v10023_v8 = vld [vmem:[#allocation59_spill] sm:$0xff] }
 0x1b2   : > { %4976 = vmatpush.xpose.msk.msrb.mxu0 %vm690_vm0, %v1247_v39  ;;  %5000 = vmatpush.xpose.msk.msrb.mxu1 %vm690_vm0, %v1360_v18  ;;  %v9993_v39 = vld [vmem:[#allocation35_spill] sm:$0xff]  ;;  %v10024_v0 = vunpack.c.l.bf16 %v10023_v8 }
 0x1b3   : > { %5024 = vmatpush.xpose.msk.msrb.mxu2 %vm690_vm0, %v1473_v1  ;;  %5048 = vmatpush.xpose.msk.msrb.mxu3 %vm690_vm0, %v1586_v55  ;;  %v9994_v18 = vunpack.c.l.bf16 %v9993_v39  ;;  %v9995_v55 = vld [vmem:[#allocation36_spill] sm:$0xff] }
 0x1b4   : > { %v7360_v12 = vpop.f32.mrf.mxu2  ;;  %v7362_v43 = vpop.f32.mrf.mxu3  ;;  %v9996_v1 = vunpack.c.l.bf16 %v9995_v55 }
 0x1b5   : > { %9991 = vst [vmem:[#allocation5_spill] sm:$0xff] %v7360_v12  ;;  %v7364_v49 = vpop.f32.mrf.mxu0  ;;  %v7366_v51 = vpop.f32.mrf.mxu1 }
 0x1b6   : > { %9992 = vst [vmem:[#allocation6_spill] sm:$0xff] %v7362_v43  ;;  %4977 = vmatpush.xpose.msk.msrb.mxu0 %vm690_vm0, %v1244_v19  ;;  %5001 = vmatpush.xpose.msk.msrb.mxu1 %vm690_vm0, %v1357_v25  ;;  %v10000_v19 = vunpack.c.l.bf16 %v9999_v13 }
 0x1b7   : > { %5025 = vmatpush.xpose.msk.msrb.mxu2 %vm690_vm0, %v1470_v11  ;;  %5049 = vmatpush.xpose.msk.msrb.mxu3 %vm690_vm0, %v1583_v3 }
 0x1b8   : > { %4816 = vmatmul.msk.f32.gmra.mxu0 %vm690_vm0, %v9994_v18  ;;  %4832 = vmatmul.msk.f32.gmra.mxu1 %vm690_vm0, %v9996_v1  ;;  %v10034_v1 = vld [vmem:[#allocation84_spill] sm:$0xff] }
 0x1b9   : > { %4848 = vmatmul.msk.f32.gmra.mxu2 %vm690_vm0, %v9998_v47  ;;  %4864 = vmatmul.msk.f32.gmra.mxu3 %vm690_vm0, %v10000_v19  ;;  %v10036_v47 = vld [vmem:[#allocation86_spill] sm:$0xff] }
 0x1ba   : > { %4978 = vmatpush.xpose.msk.msrb.mxu0 %vm690_vm0, %v7244_v5  ;;  %5002 = vmatpush.xpose.msk.msrb.mxu1 %vm690_vm0, %v7246_v6  ;;  %v10003_v5 = vunpack.c.h.bf16 %v9993_v39  ;;  %v10004_v6 = vunpack.c.h.bf16 %v9995_v55  ;;  %v10031_v55 = vunpack.c.h.bf16 %v10023_v8 }
 0x1bb   : > { %5026 = vmatpush.xpose.msk.msrb.mxu2 %vm690_vm0, %v7260_v24  ;;  %5050 = vmatpush.xpose.msk.msrb.mxu3 %vm690_vm0, %v7262_v36  ;;  %v10005_v24 = vunpack.c.h.bf16 %v9997_v15  ;;  %v10035_v15 = vld [vmem:[#allocation85_spill] sm:$0xff] }
 0x1bc   : > { %v7392_v25 = vpop.f32.mrf.mxu2  ;;  %v7394_v11 = vpop.f32.mrf.mxu3 }
 0x1bd   : > { %10001 = vst [vmem:[#allocation7_spill] sm:$0xff] %v7392_v25  ;;  %v7396_v3 = vpop.f32.mrf.mxu0  ;;  %v7398_v52 = vpop.f32.mrf.mxu1 }
 0x1be   : > { %10002 = vst [vmem:[#allocation8_spill] sm:$0xff] %v7394_v11  ;;  %4979 = vmatpush.xpose.msk.msrb.mxu0 %vm690_vm0, %v7224_v40  ;;  %5003 = vmatpush.xpose.msk.msrb.mxu1 %vm690_vm0, %v7226_v41  ;;  %v10006_v40 = vunpack.c.h.bf16 %v9999_v13 }
 0x1bf   : > { %5027 = vmatpush.xpose.msk.msrb.mxu2 %vm690_vm0, %v7240_v2  ;;  %5051 = vmatpush.xpose.msk.msrb.mxu3 %vm690_vm0, %v7242_v4 }
 0x1c0   : > { %4817 = vmatmul.msk.f32.gmra.mxu0 %vm690_vm0, %v10003_v5  ;;  %4833 = vmatmul.msk.f32.gmra.mxu1 %vm690_vm0, %v10004_v6 }
 0x1c1   : > { %4849 = vmatmul.msk.f32.gmra.mxu2 %vm690_vm0, %v10005_v24  ;;  %4865 = vmatmul.msk.f32.gmra.mxu3 %vm690_vm0, %v10006_v40  ;;  %v10037_v24 = vld [vmem:[#allocation79_spill] sm:$0xff]  ;;  %v10038_v40 = vld [vmem:[#allocation80_spill] sm:$0xff] }
 0x1c2   : > { %4980 = vmatpush.xpose.msk.msrb.mxu0 %vm690_vm0, %v7204_v17  ;;  %5004 = vmatpush.xpose.msk.msrb.mxu1 %vm690_vm0, %v7206_v27  ;;  %v10007_v17 = vld [vmem:[#allocation47_spill] sm:$0xff] }
 0x1c3   : > { %5028 = vmatpush.xpose.msk.msrb.mxu2 %vm690_vm0, %v7220_v26  ;;  %5052 = vmatpush.xpose.msk.msrb.mxu3 %vm690_vm0, %v7222_v29  ;;  %v10008_v27 = vunpack.c.l.bf16 %v10007_v17  ;;  %v10009_v26 = vld [vmem:[#allocation48_spill] sm:$0xff] }
 0x1c4   : > { %v7428_v41 = vpop.f32.mrf.mxu2  ;;  %v7430_v2 = vpop.f32.mrf.mxu3  ;;  %v10010_v29 = vunpack.c.l.bf16 %v10009_v26 }
 0x1c5   : > { %v7432_v4 = vpop.f32.mrf.mxu0  ;;  %v7434_v36 = vpop.f32.mrf.mxu1 }
 0x1c6   : > { %4981 = vmatpush.xpose.msk.msrb.mxu0 %vm690_vm0, %v7176_v32  ;;  %5005 = vmatpush.xpose.msk.msrb.mxu1 %vm690_vm0, %v7178_v33  ;;  %v10013_v32 = vld [vmem:[#allocation50_spill] sm:$0xff] }
 0x1c7   : > { %5029 = vmatpush.xpose.msk.msrb.mxu2 %vm690_vm0, %v7200_v48  ;;  %5053 = vmatpush.xpose.msk.msrb.mxu3 %vm690_vm0, %v7202_v63  ;;  %v10014_v33 = vunpack.c.l.bf16 %v10013_v32 }
 0x1c8   : > { %4818 = vmatmul.msk.f32.gmra.mxu0 %vm690_vm0, %v10008_v27  ;;  %4834 = vmatmul.msk.f32.gmra.mxu1 %vm690_vm0, %v10010_v29  ;;  %v10040_v27 = vld [vmem:[#allocation82_spill] sm:$0xff] }
 0x1c9   : > { %4850 = vmatmul.msk.f32.gmra.mxu2 %vm690_vm0, %v10012_v62  ;;  %4866 = vmatmul.msk.f32.gmra.mxu3 %vm690_vm0, %v10014_v33 }
 0x1ca   : > { %4982 = vmatpush.xpose.msk.msrb.mxu0 %vm690_vm0, %v7140_v10  ;;  %5006 = vmatpush.xpose.msk.msrb.mxu1 %vm690_vm0, %v7142_v16  ;;  %v10015_v10 = vunpack.c.h.bf16 %v10007_v17  ;;  %v10016_v16 = vunpack.c.h.bf16 %v10009_v26  ;;  %v10039_v17 = vld [vmem:[#allocation81_spill] sm:$0xff]  ;;  %v10041_v26 = vld [vmem:[#allocation63_spill] sm:$0xff] }
 0x1cb   : > { %5030 = vmatpush.xpose.msk.msrb.mxu2 %vm690_vm0, %v7172_v61  ;;  %5054 = vmatpush.xpose.msk.msrb.mxu3 %vm690_vm0, %v7174_v30  ;;  %v10017_v61 = vunpack.c.h.bf16 %v10011_v60  ;;  %v10042_v29 = vunpack.c.l.bf16 %v10041_v26  ;;  %v10043_v60 = vld [vmem:[#allocation64_spill] sm:$0xff] }
 0x1cc   : > { %v7464_v48 = vpop.f32.mrf.mxu2  ;;  %v7466_v63 = vpop.f32.mrf.mxu3  ;;  %v10044_v62 = vunpack.c.l.bf16 %v10043_v60 }
 0x1cd   : > { %v7468_v7 = vpop.f32.mrf.mxu0  ;;  %v7470_v14 = vpop.f32.mrf.mxu1 }
 0x1ce   : > { %4983 = vmatpush.xpose.msk.msrb.mxu0 %vm690_vm0, %v7104_v53  ;;  %5007 = vmatpush.xpose.msk.msrb.mxu1 %vm690_vm0, %v7106_v35  ;;  %v10018_v53 = vunpack.c.h.bf16 %v10013_v32  ;;  %v10045_v32 = vld [vmem:[#allocation65_spill] sm:$0xff] }
 0x1cf   : > { %5031 = vmatpush.xpose.msk.msrb.mxu2 %vm690_vm0, %v7136_v28  ;;  %5055 = vmatpush.xpose.msk.msrb.mxu3 %vm690_vm0, %v7138_v37  ;;  %v10046_v33 = vunpack.c.l.bf16 %v10045_v32  ;;  %v10051_v8 = vunpack.c.h.bf16 %v10045_v32 }
 0x1d0   : > { %4819 = vmatmul.msk.f32.gmra.mxu0 %vm690_vm0, %v10015_v10  ;;  %4835 = vmatmul.msk.f32.gmra.mxu1 %vm690_vm0, %v10016_v16  ;;  %v10047_v10 = vld [vmem:[#allocation66_spill] sm:$0xff] }
 0x1d1   : > { %4851 = vmatmul.msk.f32.gmra.mxu2 %vm690_vm0, %v10017_v61  ;;  %4867 = vmatmul.msk.f32.gmra.mxu3 %vm690_vm0, %v10018_v53  ;;  %v10048_v16 = vunpack.c.l.bf16 %v10047_v10 }
 0x1d2   : > { %4984 = vmatpush.xpose.msk.msrb.mxu0 %vm690_vm0, %v7068_v57  ;;  %5008 = vmatpush.xpose.msk.msrb.mxu1 %vm690_vm0, %v7070_v58  ;;  %v10019_v57 = vld [vmem:[#allocation57_spill] sm:$0xff] }
 0x1d3   : > { %5032 = vmatpush.xpose.msk.msrb.mxu2 %vm690_vm0, %v7100_v42  ;;  %5056 = vmatpush.xpose.msk.msrb.mxu3 %vm690_vm0, %v7102_v34  ;;  %v10020_v58 = vunpack.c.l.bf16 %v10019_v57  ;;  %v10021_v42 = vld [vmem:[#allocation58_spill] sm:$0xff] }
 0x1d4   : > { %v7500_v35 = vpop.f32.mrf.mxu2  ;;  %v7502_v28 = vpop.f32.mrf.mxu3  ;;  %v10022_v34 = vunpack.c.l.bf16 %v10021_v42 }
 0x1d5   : > { %v7504_v37 = vpop.f32.mrf.mxu0  ;;  %v7506_v30 = vpop.f32.mrf.mxu1 }
 0x1d6   : > { %4985 = vmatpush.xpose.msk.msrb.mxu0 %vm690_vm0, %v7032_v22  ;;  %5009 = vmatpush.xpose.msk.msrb.mxu1 %vm690_vm0, %v7034_v23  ;;  %v10025_v22 = vld [vmem:[#allocation60_spill] sm:$0xff] }
 0x1d7   : > { %5033 = vmatpush.xpose.msk.msrb.mxu2 %vm690_vm0, %v7064_v54  ;;  %5057 = vmatpush.xpose.msk.msrb.mxu3 %vm690_vm0, %v7066_v56  ;;  %v10026_v23 = vunpack.c.l.bf16 %v10025_v22 }
 0x1d8   : > { %4820 = vmatmul.msk.f32.gmra.mxu0 %vm690_vm0, %v10020_v58  ;;  %4836 = vmatmul.msk.f32.gmra.mxu1 %vm690_vm0, %v10022_v34  ;;  %v10050_v34 = vunpack.c.h.bf16 %v10043_v60 }
 0x1d9   : > { %4852 = vmatmul.msk.f32.gmra.mxu2 %vm690_vm0, %v10024_v0  ;;  %4868 = vmatmul.msk.f32.gmra.mxu3 %vm690_vm0, %v10026_v23  ;;  %v10052_v0 = vunpack.c.h.bf16 %v10047_v10 }
 0x1da   : > { %4986 = vmatpush.xpose.msk.msrb.mxu0 %vm690_vm0, %v6996_v46  ;;  %5010 = vmatpush.xpose.msk.msrb.mxu1 %vm690_vm0, %v6998_v59  ;;  %v10027_v46 = vld [vmem:[#allocation87_spill] sm:$0xff]  ;;  %v10028_v59 = vld [vmem:[#allocation88_spill] sm:$0xff] }
 0x1db   : > { %5034 = vmatpush.xpose.msk.msrb.mxu2 %vm690_vm0, %v7028_v20  ;;  %5058 = vmatpush.xpose.msk.msrb.mxu3 %vm690_vm0, %v7030_v21  ;;  %v10029_v20 = vunpack.c.h.bf16 %v10019_v57  ;;  %v10030_v21 = vunpack.c.h.bf16 %v10021_v42  ;;  %v10049_v42 = vunpack.c.h.bf16 %v10041_v26 }
 0x1dc   : > { %v7536_v54 = vpop.f32.mrf.mxu2  ;;  %v7538_v56 = vpop.f32.mrf.mxu3 }
 0x1dd   : > { %v7540_v39 = vpop.f32.mrf.mxu0  ;;  %v7542_v18 = vpop.f32.mrf.mxu1 }
 0x1de   : > { %4987 = vmatpush.xpose.msk.msrb.mxu0 %vm690_vm0, %v6960_v9  ;;  %5011 = vmatpush.xpose.msk.msrb.mxu1 %vm690_vm0, %v6962_v44  ;;  %v10032_v9 = vunpack.c.h.bf16 %v10025_v22  ;;  %v10033_v44 = vld [vmem:[#allocation83_spill] sm:$0xff] }
 0x1df   : > { %5035 = vmatpush.xpose.msk.msrb.mxu2 %vm690_vm0, %v10027_v46  ;;  %5059 = vmatpush.xpose.msk.msrb.mxu3 %vm690_vm0, %v10028_v59 }
 0x1e0   : > { %4821 = vmatmul.msk.f32.gmra.mxu0 %vm690_vm0, %v10029_v20  ;;  %4837 = vmatmul.msk.f32.gmra.mxu1 %vm690_vm0, %v10030_v21  ;;  %v10053_v20 = vld [vmem:[#allocation67_spill] sm:$0xff] }
 0x1e1   : > { %4853 = vmatmul.msk.f32.gmra.mxu2 %vm690_vm0, %v10031_v55  ;;  %4869 = vmatmul.msk.f32.gmra.mxu3 %vm690_vm0, %v10032_v9  ;;  %v10054_v21 = vunpack.c.l.bf16 %v10053_v20  ;;  %v10055_v55 = vld [vmem:[#allocation68_spill] sm:$0xff]  ;;  %v10061_v26 = vunpack.c.h.bf16 %v10053_v20  ;;  %v10069_v20 = vld [vmem:[#allocation73_spill] sm:$0xff] }
 0x1e2   : > { %4988 = vmatpush.xpose.msk.msrb.mxu0 %vm690_vm0, %v10033_v44  ;;  %5012 = vmatpush.xpose.msk.msrb.mxu1 %vm690_vm0, %v10034_v1  ;;  %v10056_v9 = vunpack.c.l.bf16 %v10055_v55  ;;  %v10057_v44 = vld [vmem:[#allocation69_spill] sm:$0xff] }
 0x1e3   : > { %5036 = vmatpush.xpose.msk.msrb.mxu2 %vm690_vm0, %v10035_v15  ;;  %5060 = vmatpush.xpose.msk.msrb.mxu3 %vm690_vm0, %v10036_v47  ;;  %v10058_v1 = vunpack.c.l.bf16 %v10057_v44  ;;  %v10059_v15 = vld [vmem:[#allocation70_spill] sm:$0xff]  ;;  %v10063_v60 = vunpack.c.h.bf16 %v10057_v44 }
 0x1e4   : > { %v7572_v13 = vpop.f32.mrf.mxu2  ;;  %v7574_v19 = vpop.f32.mrf.mxu3  ;;  %v10060_v47 = vunpack.c.l.bf16 %v10059_v15 }
 0x1e5   : > { %v7576_v5 = vpop.f32.mrf.mxu0  ;;  %v7578_v6 = vpop.f32.mrf.mxu1 }
 0x1e6   : > { %4989 = vmatpush.xpose.msk.msrb.mxu0 %vm690_vm0, %v10037_v24  ;;  %5013 = vmatpush.xpose.msk.msrb.mxu1 %vm690_vm0, %v10038_v40 }
 0x1e7   : > { %5037 = vmatpush.xpose.msk.msrb.mxu2 %vm690_vm0, %v10039_v17  ;;  %5061 = vmatpush.xpose.msk.msrb.mxu3 %vm690_vm0, %v10040_v27 }
 0x1e8   : > { %4822 = vmatmul.msk.f32.gmra.mxu0 %vm690_vm0, %v10042_v29  ;;  %4838 = vmatmul.msk.f32.gmra.mxu1 %vm690_vm0, %v10044_v62  ;;  %v10062_v29 = vunpack.c.h.bf16 %v10055_v55  ;;  %v10064_v62 = vunpack.c.h.bf16 %v10059_v15  ;;  %v10071_v55 = vld [vmem:[#allocation74_spill] sm:$0xff] }
 0x1e9   : > { %4854 = vmatmul.msk.f32.gmra.mxu2 %vm690_vm0, %v10046_v33  ;;  %4870 = vmatmul.msk.f32.gmra.mxu3 %vm690_vm0, %v10048_v16 }
 0x1ec   : > { %v7600_v61 = vpop.f32.mrf.mxu2  ;;  %v7602_v53 = vpop.f32.mrf.mxu3 }
 0x1ed   : > { %v7604_v57 = vpop.f32.mrf.mxu0  ;;  %v7606_v58 = vpop.f32.mrf.mxu1 }
 0x1f0   : > { %4823 = vmatmul.msk.f32.gmra.mxu0 %vm690_vm0, %v10049_v42  ;;  %4839 = vmatmul.msk.f32.gmra.mxu1 %vm690_vm0, %v10050_v34  ;;  %v10065_v42 = vld [vmem:[#allocation71_spill] sm:$0xff] }
 0x1f1   : > { %4855 = vmatmul.msk.f32.gmra.mxu2 %vm690_vm0, %v10051_v8  ;;  %4871 = vmatmul.msk.f32.gmra.mxu3 %vm690_vm0, %v10052_v0  ;;  %v10066_v34 = vunpack.c.l.bf16 %v10065_v42  ;;  %v10067_v8 = vld [vmem:[#allocation72_spill] sm:$0xff] }
 0x1f2   : > { %v10068_v0 = vunpack.c.l.bf16 %v10067_v8 }
 0x1f4   : > { %v7620_v22 = vpop.f32.mrf.mxu2  ;;  %v7622_v23 = vpop.f32.mrf.mxu3 }
 0x1f5   : > { %v7624_v46 = vpop.f32.mrf.mxu0  ;;  %v7626_v59 = vpop.f32.mrf.mxu1 }
 0x1f8   : > { %4824 = vmatmul.msk.f32.gmra.mxu0 %vm690_vm0, %v10054_v21  ;;  %4840 = vmatmul.msk.f32.gmra.mxu1 %vm690_vm0, %v10056_v9  ;;  %v10070_v21 = vunpack.c.l.bf16 %v10069_v20  ;;  %v10072_v9 = vunpack.c.l.bf16 %v10071_v55 }
 0x1f9   : > { %4856 = vmatmul.msk.f32.gmra.mxu2 %vm690_vm0, %v10058_v1  ;;  %4872 = vmatmul.msk.f32.gmra.mxu3 %vm690_vm0, %v10060_v47 }
 0x1fc   : > { %v7640_v24 = vpop.f32.mrf.mxu2  ;;  %v7642_v40 = vpop.f32.mrf.mxu3 }
 0x1fd   : > { %v7644_v17 = vpop.f32.mrf.mxu0  ;;  %v7646_v27 = vpop.f32.mrf.mxu1 }
 0x200   : > { %4825 = vmatmul.msk.f32.gmra.mxu0 %vm690_vm0, %v10061_v26  ;;  %4841 = vmatmul.msk.f32.gmra.mxu1 %vm690_vm0, %v10062_v29  ;;  %v10073_v26 = vunpack.c.h.bf16 %v10065_v42  ;;  %v10074_v29 = vunpack.c.h.bf16 %v10067_v8  ;;  %v10078_v42 = vunpack.c.l.bf16 %v10077_v38  ;;  %v7719_v38 = vld [vmem:[%s10089_s2] sm:$0xff] }
 0x201   : > { %4857 = vmatmul.msk.f32.gmra.mxu2 %vm690_vm0, %v10063_v60  ;;  %4873 = vmatmul.msk.f32.gmra.mxu3 %vm690_vm0, %v10064_v62  ;;  %v10075_v60 = vunpack.c.h.bf16 %v10069_v20  ;;  %v10076_v62 = vunpack.c.h.bf16 %v10071_v55 }
 0x204   : > { %v7660_v32 = vpop.f32.mrf.mxu2  ;;  %v7662_v33 = vpop.f32.mrf.mxu3 }
 0x205   : > { %v1648_v10 = vpop.f32.mrf.mxu0  ;;  %v1713_v16 = vpop.f32.mrf.mxu1 }
 0x208   : > { %4826 = vmatmul.msk.f32.gmra.mxu0 %vm690_vm0, %v10066_v34  ;;  %4842 = vmatmul.msk.f32.gmra.mxu1 %vm690_vm0, %v10068_v0 }
 0x209   : > { %4858 = vmatmul.msk.f32.gmra.mxu2 %vm690_vm0, %v10070_v21  ;;  %4874 = vmatmul.msk.f32.gmra.mxu3 %vm690_vm0, %v10072_v9 }
 0x20c   : > { %v1778_v44 = vpop.f32.mrf.mxu2  ;;  %v1843_v1 = vpop.f32.mrf.mxu3 }
 0x20d   : > { %v1651_v15 = vpop.f32.mrf.mxu0  ;;  %v1716_v47 = vpop.f32.mrf.mxu1 }
 0x210   : > { %4827 = vmatmul.msk.f32.gmra.mxu0 %vm690_vm0, %v10073_v26  ;;  %4843 = vmatmul.msk.f32.gmra.mxu1 %vm690_vm0, %v10074_v29  ;;  %v10079_v26 = vld [vmem:[#allocation76_spill] sm:$0xff]  ;;  %v10081_v29 = vld [vmem:[#allocation77_spill] sm:$0xff] }
 0x211   : > { %4859 = vmatmul.msk.f32.gmra.mxu2 %vm690_vm0, %v10075_v60  ;;  %4875 = vmatmul.msk.f32.gmra.mxu3 %vm690_vm0, %v10076_v62  ;;  %v10080_v8 = vunpack.c.l.bf16 %v10079_v26  ;;  %v10082_v20 = vunpack.c.l.bf16 %v10081_v29  ;;  %v10083_v60 = vld [vmem:[#allocation78_spill] sm:$0xff] }
 0x212   : > { %v10084_v55 = vunpack.c.l.bf16 %v10083_v60 }
 0x214   : > { %v1781_v34 = vpop.f32.mrf.mxu2  ;;  %v1846_v0 = vpop.f32.mrf.mxu3 }
 0x215   : > { %v1654_v21 = vpop.f32.mrf.mxu0  ;;  %v1719_v9 = vpop.f32.mrf.mxu1 }
 0x218   : > { %4828 = vmatmul.msk.f32.gmra.mxu0 %vm690_vm0, %v10078_v42  ;;  %4844 = vmatmul.msk.f32.gmra.mxu1 %vm690_vm0, %v10080_v8  ;;  %v10086_v42 = vunpack.c.h.bf16 %v10079_v26  ;;  %v10087_v8 = vunpack.c.h.bf16 %v10081_v29 }
 0x219   : > { %4860 = vmatmul.msk.f32.gmra.mxu2 %vm690_vm0, %v10082_v20  ;;  %4876 = vmatmul.msk.f32.gmra.mxu3 %vm690_vm0, %v10084_v55  ;;  %v10088_v20 = vunpack.c.h.bf16 %v10083_v60 }
 0x21c   : > { %v1784_v62 = vpop.f32.mrf.mxu2  ;;  %v1849_v31 = vpop.f32.mrf.mxu3 }
 0x21d   : > { %v1657_v43 = vpop.f32.mrf.mxu0  ;;  %v1722_v12 = vpop.f32.mrf.mxu1 }
 0x220   : > { %4829 = vmatmul.msk.f32.gmra.mxu0 %vm690_vm0, %v10085_v45  ;;  %4845 = vmatmul.msk.f32.gmra.mxu1 %vm690_vm0, %v10086_v42 }
 0x221   : > { %4861 = vmatmul.msk.f32.gmra.mxu2 %vm690_vm0, %v10087_v8  ;;  %4877 = vmatmul.msk.f32.gmra.mxu3 %vm690_vm0, %v10088_v20 }
 0x224   : > { %v1787_v55 = vpop.f32.mrf.mxu2  ;;  %v1852_v50 = vpop.f32.mrf.mxu3 }
 0x225   : > { %v7712_v11 = vpop.f32.mrf.mxu0  ;;  %v7714_v25 = vpop.f32.mrf.mxu1 }
 0x228   : > { %4894 = vmatmul.msk.f32.vlgmr.msra.gmra.mxu0 %vm690_vm0, %v7719_v38  ;;  %4918 = vmatmul.msk.f32.vlgmr.msra.gmra.mxu1 %vm690_vm0, %v7719_v38 }
 0x229   : > { %4942 = vmatmul.msk.f32.vlgmr.msra.gmra.mxu2 %vm690_vm0, %v7719_v38  ;;  %4966 = vmatmul.msk.f32.vlgmr.msra.gmra.mxu3 %vm690_vm0, %v7719_v38 }
 0x22a   : > { %3531 = vmatpush.msra.mxu0 %v1657_v43  ;;  %3572 = vmatpush.msra.mxu1 %v1722_v12 }
 0x22b   : > { %3613 = vmatpush.msra.mxu2 %v1787_v55  ;;  %3654 = vmatpush.msra.mxu3 %v1852_v50  ;;  %v7740_v50 = vld [vmem:[%s10089_s2 + $0x8] sm:$0xff] }
 0x22c   : > { %3532 = vmatpush.msra.mxu0 %v1654_v21  ;;  %3573 = vmatpush.msra.mxu1 %v1719_v9  ;;  %v7729_v45 = vpop.f32.mrf.mxu2  ;;  %v7731_v26 = vpop.f32.mrf.mxu3 }
 0x22d   : > { %10090 = vst [vmem:[#allocation45_spill] sm:$0xff] %v7729_v45  ;;  %3614 = vmatpush.msra.mxu2 %v1784_v62  ;;  %3655 = vmatpush.msra.mxu3 %v1849_v31  ;;  %v7733_v29 = vpop.f32.mrf.mxu0  ;;  %v7735_v60 = vpop.f32.mrf.mxu1  ;;  %v5778_v45 = vmov 0  }
 0x22e   : > { %10091 = vst [vmem:[#allocation46_spill] sm:$0xff] %v7731_v26  ;;  %3533 = vmatpush.msra.mxu0 %v1651_v15  ;;  %3574 = vmatpush.msra.mxu1 %v1716_v47 }
 0x22f   : > { %3615 = vmatpush.msra.mxu2 %v1781_v34  ;;  %3656 = vmatpush.msra.mxu3 %v1846_v0 }
 0x230   : > { %3534 = vmatpush.msra.mxu0 %v1648_v10  ;;  %3575 = vmatpush.msra.mxu1 %v1713_v16 }
 0x231   : > { %3616 = vmatpush.msra.mxu2 %v1778_v44  ;;  %3657 = vmatpush.msra.mxu3 %v1843_v1  ;;  %v7918_v44 = vld [vmem:[%s10089_s2 + $0x38] sm:$0xff] }
 0x232   : > { %4919 = vmatmul.msk.f32.gmra.mxu1 %vm690_vm0, %v7740_v50  ;;  %4943 = vmatmul.msk.f32.gmra.mxu2 %vm690_vm0, %v7740_v50  ;;  %10107 = vst [vmem:[#allocation44_spill] sm:$0xff] %v7918_v44 }
 0x233   : > { %3535 = vmatpush.msra.mxu0 %v7644_v17  ;;  %3576 = vmatpush.msra.mxu1 %v7646_v27 }
 0x234   : > { %3617 = vmatpush.msra.mxu2 %v7660_v32  ;;  %3658 = vmatpush.msra.mxu3 %v7662_v33  ;;  %v7750_v31 = vpop.f32.mrf.mxu2  ;;  %v7752_v12 = vpop.f32.mrf.mxu3 }
 0x235   : > { %10092 = vst [vmem:[#allocation51_spill] sm:$0xff] %v7750_v31  ;;  %4967 = vmatmul.msk.f32.gmra.mxu3 %vm690_vm0, %v7740_v50  ;;  %3536 = vmatpush.msra.mxu0 %v7624_v46  ;;  %v7757_v43 = vpop.f32.mrf.mxu0  ;;  %v7759_v10 = vpop.f32.mrf.mxu1  ;;  %v7772_v46 = vld [vmem:[%s10089_s2 + $0x10] sm:$0xff] }
 0x236   : > { %10093 = vst [vmem:[#allocation52_spill] sm:$0xff] %v7752_v12  ;;  %3577 = vmatpush.msra.mxu1 %v7626_v59  ;;  %3618 = vmatpush.msra.mxu2 %v7640_v24  ;;  %v7893_v24 = vld [vmem:[%s10089_s2 + $0x30] sm:$0xff] }
 0x237   : > { %3659 = vmatpush.msra.mxu3 %v7642_v40  ;;  %3537 = vmatpush.msra.mxu0 %v7604_v57 }
 0x238   : > { %3578 = vmatpush.msra.mxu1 %v7606_v58  ;;  %3619 = vmatpush.msra.mxu2 %v7620_v22 }
 0x239   : > { %3660 = vmatpush.msra.mxu3 %v7622_v23  ;;  %3538 = vmatpush.msra.mxu0 %v7576_v5 }
 0x23a   : > { %3579 = vmatpush.msra.mxu1 %v7578_v6  ;;  %3620 = vmatpush.msra.mxu2 %v7600_v61 }
 0x23b   : > { %3661 = vmatpush.msra.mxu3 %v7602_v53  ;;  %4895 = vmatmul.msk.f32.gmra.mxu0 %vm690_vm0, %v7740_v50  ;;  %v7872_v53 = vld [vmem:[%s10089_s2 + $0x28] sm:$0xff] }
 0x23c   : > { %4920 = vmatmul.msk.f32.gmra.mxu1 %vm690_vm0, %v7772_v46  ;;  %3539 = vmatpush.msra.mxu0 %v7540_v39  ;;  %v7782_v5 = vpop.f32.mrf.mxu2  ;;  %v7784_v57 = vpop.f32.mrf.mxu3  ;;  %v10105_v39 = vld [vmem:[#allocation53_spill] sm:$0xff] }
 0x23d   : > { %10094 = vst [vmem:[#allocation41_spill] sm:$0xff] %v7782_v5  ;;  %3580 = vmatpush.msra.mxu1 %v7542_v18  ;;  %3621 = vmatpush.msra.mxu2 %v7572_v13  ;;  %v7788_v6 = vpop.f32.mrf.mxu0  ;;  %v7790_v61 = vpop.f32.mrf.mxu1  ;;  %v10106_v18 = vld [vmem:[#allocation54_spill] sm:$0xff]  ;;  %v2852_v5 = vld [vmem:[%s8004_s15 + $0x1] sm:$0x1] }
 0x23e   : > { %10095 = vst [vmem:[#allocation42_spill] sm:$0xff] %v7784_v57  ;;  %3662 = vmatpush.msra.mxu3 %v7574_v19  ;;  %3540 = vmatpush.msra.mxu0 %v7504_v37  ;;  %v7806_v37 = vld [vmem:[%s10089_s2 + $0x18] sm:$0xff]  ;;  %v2853_v57 = vld [vmem:[%s8004_s15 + $0x2] sm:$0x1]  ;;  %vm2860_vm3 = vcmp.gt.f32.partialorder %v2852_v5, 0.5 }
 0x23f   : > { %4968 = vmatmul.msk.f32.gmra.mxu3 %vm690_vm0, %v7772_v46  ;;  %3581 = vmatpush.msra.mxu1 %v7506_v30  ;;  %v10103_v30 = vld [vmem:[#allocation61_spill] sm:$0xff]  ;;  %vm2861_vm2 = vcmp.gt.f32.partialorder %v2853_v57, 0.5  ;;  %v2868_v5 = vsel %vm2860_vm3, 1, %v5778_v45  ;;  %v2854_v57 = vld [vmem:[%s8004_s15 + $0x3] sm:$0x1]  ;;  %vm4118_vm3 = vcmask 1042434  }
 0x240   : > { %3622 = vmatpush.msra.mxu2 %v7536_v54  ;;  %3663 = vmatpush.msra.mxu3 %v7538_v56  ;;  %vm2862_vm5 = vcmp.gt.f32.partialorder %v2854_v57, 0.5 }
 0x241   : > { %3541 = vmatpush.msra.mxu0 %v7468_v7  ;;  %3582 = vmatpush.msra.mxu1 %v7470_v14 }
 0x242   : > { %3623 = vmatpush.msra.mxu2 %v7500_v35  ;;  %3664 = vmatpush.msra.mxu3 %v7502_v28 }
 0x243   : > { %3542 = vmatpush.msra.mxu0 %v7432_v4  ;;  %3583 = vmatpush.msra.mxu1 %v7434_v36  ;;  %v10097_v4 = vld [vmem:[#allocation7_spill] sm:$0xff]  ;;  %v10098_v36 = vld [vmem:[#allocation8_spill] sm:$0xff] }
 0x244   : > { %3624 = vmatpush.msra.mxu2 %v7464_v48  ;;  %3665 = vmatpush.msra.mxu3 %v7466_v63  ;;  %v7812_v7 = vpop.f32.mrf.mxu2  ;;  %v7814_v14 = vpop.f32.mrf.mxu3 }
 0x245   : > { %10096 = vst [vmem:[#allocation43_spill] sm:$0xff] %v7814_v14  ;;  %4896 = vmatmul.msk.f32.gmra.mxu0 %vm690_vm0, %v7772_v46  ;;  %4921 = vmatmul.msk.f32.gmra.mxu1 %vm690_vm0, %v7806_v37  ;;  %v7820_v35 = vpop.f32.mrf.mxu0  ;;  %v7822_v28 = vpop.f32.mrf.mxu1 }
 0x246   : > { %3543 = vmatpush.msra.mxu0 %v7396_v3  ;;  %3584 = vmatpush.msra.mxu1 %v7398_v52  ;;  %v10099_v3 = vld [vmem:[#allocation55_spill] sm:$0xff]  ;;  %v10100_v52 = vld [vmem:[#allocation56_spill] sm:$0xff] }
 0x247   : > { %3625 = vmatpush.msra.mxu2 %v7428_v41  ;;  %3666 = vmatpush.msra.mxu3 %v7430_v2  ;;  %v10101_v41 = vld [vmem:[#allocation5_spill] sm:$0xff]  ;;  %v10102_v2 = vld [vmem:[#allocation6_spill] sm:$0xff] }
 0x248   : > { %4944 = vmatmul.msk.f32.gmra.mxu2 %vm690_vm0, %v7772_v46  ;;  %4969 = vmatmul.msk.f32.gmra.mxu3 %vm690_vm0, %v7806_v37 }
 0x249   : > { %3544 = vmatpush.msra.mxu0 %v7364_v49  ;;  %3585 = vmatpush.msra.mxu1 %v7366_v51  ;;  %v10104_v49 = vld [vmem:[#allocation62_spill] sm:$0xff]  ;;  %v7849_v51 = vld [vmem:[%s10089_s2 + $0x20] sm:$0xff]  ;;  %s5730_s2 = scalar_lea.hbm %s5729_s1, 8 }
 0x24a   : > { %3626 = vmatpush.msra.mxu2 %v10097_v4  ;;  %3667 = vmatpush.msra.mxu3 %v10098_v36  ;;  %p5731_p11 = scmp.ne.s32.totalorder %s5729_s1, %s5730_s2  ;;  %p5736_p1 = scmp.lt.s32.totalorder %s5734_s24, %s5730_s2 }
 0x24b   : > { %3545 = vmatpush.msra.mxu0 %v10099_v3  ;;  %3586 = vmatpush.msra.mxu1 %v10100_v52 }
 0x24c   : > { %3627 = vmatpush.msra.mxu2 %v10101_v41  ;;  %3668 = vmatpush.msra.mxu3 %v10102_v2  ;;  %v7840_v48 = vpop.f32.mrf.mxu2  ;;  %v7842_v63 = vpop.f32.mrf.mxu3  ;;  %p5732_p12 = pnand %p5731_p11, %p5874_p5  ;;  %p5737_p2 = por %p5736_p1, %p5735_p0 }
 0x24d   : > { %3546 = vmatpush.msra.mxu0 %v10103_v30  ;;  %3587 = vmatpush.msra.mxu1 %v10104_v49  ;;  %v7851_v54 = vpop.f32.mrf.mxu0  ;;  %v7853_v56 = vpop.f32.mrf.mxu1 }
 0x24e   : > { %3628 = vmatpush.msra.mxu2 %v10105_v39  ;;  %3669 = vmatpush.msra.mxu3 %v10106_v18  ;;  %v2851_v18 = vld [vmem:[%s8004_s15] sm:$0x1]  ;;  %p5733_p13 = pneg %p5732_p12 }
 0x24f   : > { %4897 = vmatmul.msk.f32.gmra.mxu0 %vm690_vm0, %v7806_v37  ;;  %4922 = vmatmul.msk.f32.gmra.mxu1 %vm690_vm0, %v7849_v51  ;;  %vm2859_vm1 = vcmp.gt.f32.partialorder %v2851_v18, 0.5 }
 0x250   : > { %4945 = vmatmul.msk.f32.gmra.mxu2 %vm690_vm0, %v7806_v37  ;;  %4970 = vmatmul.msk.f32.gmra.mxu3 %vm690_vm0, %v7849_v51  ;;  %v2867_v12 = vsel %vm2859_vm1, 1, %v5778_v45  ;;  %p5738_p3 = pnand %p5737_p2, %p5733_p13 }
 0x251   : > { %v2875_v14 = vperm.slane %v2867_v12, 0  ;;  %v2869_v12 = vsel %vm2861_vm2, 1, %v5778_v45  ;;  %vm4115_vm2 = vcmask 1041409  }
 0x253   : > { %vm8026_vm4 = vcmp.eq.s32.totalorder %v2875_v14, 1 }
 0x254   : > { %v7865_v13 = vpop.f32.mrf.mxu2  ;;  %v7867_v19 = vpop.f32.mrf.mxu3 }
 0x255   : > { %v7874_v58 = vpop.f32.mrf.mxu0  ;;  %v7876_v22 = vpop.f32.mrf.mxu1 }
 0x257   : > { %4898 = vmatmul.msk.f32.gmra.mxu0 %vm690_vm0, %v7849_v51  ;;  %4923 = vmatmul.msk.f32.gmra.mxu1 %vm690_vm0, %v7872_v53 }
 0x258   : > { %4946 = vmatmul.msk.f32.gmra.mxu2 %vm690_vm0, %v7849_v51  ;;  %4971 = vmatmul.msk.f32.gmra.mxu3 %vm690_vm0, %v7872_v53 }
 0x25c   : > { %v7886_v23 = vpop.f32.mrf.mxu2  ;;  %v7888_v59 = vpop.f32.mrf.mxu3 }
 0x25d   : > { %v7895_v40 = vpop.f32.mrf.mxu0  ;;  %v7897_v17 = vpop.f32.mrf.mxu1 }
 0x25f   : > { %4899 = vmatmul.msk.f32.gmra.mxu0 %vm690_vm0, %v7872_v53  ;;  %4924 = vmatmul.msk.f32.gmra.mxu1 %vm690_vm0, %v7893_v24 }
 0x260   : > { %4947 = vmatmul.msk.f32.gmra.mxu2 %vm690_vm0, %v7872_v53  ;;  %4972 = vmatmul.msk.f32.gmra.mxu3 %vm690_vm0, %v7893_v24 }
 0x264   : > { %v7907_v27 = vpop.f32.mrf.mxu2  ;;  %v7909_v32 = vpop.f32.mrf.mxu3 }
 0x265   : > { %v7911_v33 = vpop.f32.mrf.mxu0  ;;  %v7913_v16 = vpop.f32.mrf.mxu1 }
 0x267   : > { %4900 = vmatmul.msk.f32.gmra.mxu0 %vm690_vm0, %v7893_v24  ;;  %4925 = vmatmul.msk.f32.gmra.mxu1 %vm690_vm0, %v7918_v44 }
 0x268   : > { %4948 = vmatmul.msk.f32.gmra.mxu2 %vm690_vm0, %v7893_v24  ;;  %4973 = vmatmul.msk.f32.gmra.mxu3 %vm690_vm0, %v7918_v44 }
 0x26c   : > { %v7928_v1 = vpop.f32.mrf.mxu2  ;;  %v7930_v15 = vpop.f32.mrf.mxu3 }
 0x26d   : > { %v7932_v47 = vpop.f32.mrf.mxu0  ;;  %v7934_v34 = vpop.f32.mrf.mxu1 }
 0x26f   : > { %4901 = vmatmul.msk.f32.gmra.mxu0 %vm690_vm0, %v7918_v44  ;;  %5014 = vmatmul.msk.f32.vlgmr.msrb.gmra.mxu1 %vm690_vm0, %v7719_v38 }
 0x270   : > { %4949 = vmatmul.msk.f32.gmra.mxu2 %vm690_vm0, %v7918_v44  ;;  %5062 = vmatmul.msk.f32.vlgmr.msrb.gmra.mxu3 %vm690_vm0, %v7719_v38 }
 0x274   : > { %v7944_v0 = vpop.f32.mrf.mxu2  ;;  %v7946_v21 = vpop.f32.mrf.mxu3 }
 0x275   : > { %v7948_v9 = vpop.f32.mrf.mxu0  ;;  %v7950_v62 = vpop.f32.mrf.mxu1 }
 0x277   : > { %4990 = vmatmul.msk.f32.vlgmr.msrb.gmra.mxu0 %vm690_vm0, %v7719_v38  ;;  %5015 = vmatmul.msk.f32.gmra.mxu1 %vm690_vm0, %v7740_v50 }
 0x278   : > { %5038 = vmatmul.msk.f32.vlgmr.msrb.gmra.mxu2 %vm690_vm0, %v7719_v38  ;;  %5063 = vmatmul.msk.f32.gmra.mxu3 %vm690_vm0, %v7740_v50 }
 0x27c   : > { %v7960_v42 = vpop.f32.mrf.mxu2  ;;  %v7962_v8 = vpop.f32.mrf.mxu3 }
 0x27d   : > { %v7964_v20 = vpop.f32.mrf.mxu0  ;;  %v7966_v55 = vpop.f32.mrf.mxu1 }
 0x27f   : > { %4991 = vmatmul.msk.f32.gmra.mxu0 %vm690_vm0, %v7740_v50  ;;  %5016 = vmatmul.msk.f32.gmra.mxu1 %vm690_vm0, %v7772_v46 }
 0x280   : > { %5039 = vmatmul.msk.f32.gmra.mxu2 %vm690_vm0, %v7740_v50  ;;  %5064 = vmatmul.msk.f32.gmra.mxu3 %vm690_vm0, %v7772_v46 }
 0x284   : > { %v7976_v38 = vpop.f32.mrf.mxu2  ;;  %v7978_v4 = vpop.f32.mrf.mxu3 }
 0x285   : > { %v1908_v36 = vpop.f32.mrf.mxu0  ;;  %v1973_v3 = vpop.f32.mrf.mxu1 }
 0x287   : > { %4992 = vmatmul.msk.f32.gmra.mxu0 %vm690_vm0, %v7772_v46  ;;  %5017 = vmatmul.msk.f32.gmra.mxu1 %vm690_vm0, %v7806_v37 }
 0x288   : > { %5040 = vmatmul.msk.f32.gmra.mxu2 %vm690_vm0, %v7772_v46  ;;  %5065 = vmatmul.msk.f32.gmra.mxu3 %vm690_vm0, %v7806_v37 }
 0x28c   : > { %v7988_v50 = vpop.f32.mrf.mxu2  ;;  %v7990_v52 = vpop.f32.mrf.mxu3 }
 0x28d   : > { %v1911_v41 = vpop.f32.mrf.mxu0  ;;  %v1976_v2 = vpop.f32.mrf.mxu1 }
 0x28f   : > { %4993 = vmatmul.msk.f32.gmra.mxu0 %vm690_vm0, %v7806_v37  ;;  %5018 = vmatmul.msk.f32.gmra.mxu1 %vm690_vm0, %v7849_v51 }
 0x290   : > { %5041 = vmatmul.msk.f32.gmra.mxu2 %vm690_vm0, %v7806_v37  ;;  %5066 = vmatmul.msk.f32.gmra.mxu3 %vm690_vm0, %v7849_v51 }
 0x294   : > { %v2041_v46 = vpop.f32.mrf.mxu2  ;;  %v2106_v30 = vpop.f32.mrf.mxu3 }
 0x295   : > { %v1914_v49 = vpop.f32.mrf.mxu0  ;;  %v1979_v39 = vpop.f32.mrf.mxu1 }
 0x297   : > { %4994 = vmatmul.msk.f32.gmra.mxu0 %vm690_vm0, %v7849_v51  ;;  %5019 = vmatmul.msk.f32.gmra.mxu1 %vm690_vm0, %v7872_v53 }
 0x298   : > { %5042 = vmatmul.msk.f32.gmra.mxu2 %vm690_vm0, %v7849_v51  ;;  %5067 = vmatmul.msk.f32.gmra.mxu3 %vm690_vm0, %v7872_v53 }
 0x29c   : > { %v2044_v37 = vpop.f32.mrf.mxu2  ;;  %v2109_v26 = vpop.f32.mrf.mxu3 }
 0x29d   : > { %v1917_v31 = vpop.f32.mrf.mxu0  ;;  %v1982_v44 = vpop.f32.mrf.mxu1 }
 0x29e   : > { %3695 = vmatpush.msrb.mxu0 %v1917_v31  ;;  %3736 = vmatpush.msrb.mxu1 %v1982_v44 }
 0x29f   : > { %4995 = vmatmul.msk.f32.gmra.mxu0 %vm690_vm0, %v7872_v53  ;;  %5020 = vmatmul.msk.f32.gmra.mxu1 %vm690_vm0, %v7893_v24 }
 0x2a0   : > { %3696 = vmatpush.msrb.mxu0 %v1914_v49  ;;  %3737 = vmatpush.msrb.mxu1 %v1979_v39 }
 0x2a1   : > { %5043 = vmatmul.msk.f32.gmra.mxu2 %vm690_vm0, %v7872_v53  ;;  %5068 = vmatmul.msk.f32.gmra.mxu3 %vm690_vm0, %v7893_v24 }
 0x2a2   : > { %3697 = vmatpush.msrb.mxu0 %v1911_v41  ;;  %3738 = vmatpush.msrb.mxu1 %v1976_v2  ;;  %v2877_v41 = vperm.slane %v2869_v12, 0 }
 0x2a4   : > { %v2047_v51 = vpop.f32.mrf.mxu2  ;;  %v2112_v44 = vpop.f32.mrf.mxu3  ;;  %3698 = vmatpush.msrb.mxu0 %v1908_v36  ;;  %3739 = vmatpush.msrb.mxu1 %v1973_v3  ;;  %v2876_v36 = vperm.slane %v2868_v5, 0  ;;  %vm8043_vm6 = vcmp.eq.s32.totalorder %v2877_v41, 1 }
 0x2a5   : > { %3777 = vmatpush.msrb.mxu2 %v2047_v51  ;;  %3818 = vmatpush.msrb.mxu3 %v2112_v44  ;;  %v2204_v53 = vpop.f32.mrf.mxu0  ;;  %v2293_v49 = vpop.f32.mrf.mxu1 }
 0x2a6   : > { %3699 = vmatpush.msrb.mxu0 %v7964_v20  ;;  %3740 = vmatpush.msrb.mxu1 %v7966_v55  ;;  %v8037_v14 = vsel %vm8026_vm4, %v2204_v53, -1e+30  ;;  %v2870_v55 = vsel %vm2862_vm5, 1, %v5778_v45  ;;  %vm8050_vm7 = vcmp.eq.s32.totalorder %v2876_v36, 1  ;;  %vm4124_vm5 = vcmask 1044484  }
 0x2a7   : > { %3778 = vmatpush.msrb.mxu2 %v2044_v37  ;;  %3819 = vmatpush.msrb.mxu3 %v2109_v26  ;;  %v8066_v3 = vsel %vm8050_vm7, %v2293_v49, -1e+30 }
 0x2a8   : > { %2955 = vmax.xlane.f32.xlu2 %v8037_v14  ;;  %3700 = vmatpush.msrb.mxu0 %v7948_v9 }
 0x2a9   : > { %3741 = vmatpush.msrb.mxu1 %v7950_v62  ;;  %3779 = vmatpush.msrb.mxu2 %v2041_v46 }
 0x2aa   : > { %3820 = vmatpush.msrb.mxu3 %v2106_v30  ;;  %3701 = vmatpush.msrb.mxu0 %v7932_v47 }
 0x2ab   : > { %3742 = vmatpush.msrb.mxu1 %v7934_v34  ;;  %3780 = vmatpush.msrb.mxu2 %v7988_v50  ;;  %v2878_v34 = vperm.slane %v2870_v55, 0  ;;  %v2856_v55 = vld [vmem:[%s8004_s15 + $0x5] sm:$0x1] }
 0x2ac   : > { %3821 = vmatpush.msrb.mxu3 %v7990_v52  ;;  %v2382_v9 = vpop.f32.mrf.mxu2  ;;  %3702 = vmatpush.msrb.mxu0 %v7911_v33  ;;  %v2471_v62 = vpop.f32.mrf.mxu3  ;;  %vm2864_vm9 = vcmp.gt.f32.partialorder %v2856_v55, 0.5 }
 0x2ad   : > { %3743 = vmatpush.msrb.mxu1 %v7913_v16  ;;  %3781 = vmatpush.msrb.mxu2 %v7976_v38  ;;  %v8060_v47 = vsel %vm8043_vm6, %v2382_v9, -1e+30  ;;  %vm8074_vm8 = vcmp.eq.s32.totalorder %v2878_v34, 1 }
 0x2ae   : > { %3822 = vmatpush.msrb.mxu3 %v7978_v4  ;;  %2987 = vmax.xlane.f32.xlu0 %v8060_v47 }
 0x2af   : > { %v2296_v50 = vpop.f32.mrf.mxu1  ;;  %3703 = vmatpush.msrb.mxu0 %v7895_v40  ;;  %3744 = vmatpush.msrb.mxu1 %v7897_v17  ;;  %v8086_v40 = vsel %vm8074_vm8, %v2471_v62, -1e+30 }
 0x2b0   : > { %3782 = vmatpush.msrb.mxu2 %v7960_v42  ;;  %3823 = vmatpush.msrb.mxu3 %v7962_v8 }
 0x2b1   : > { %2971 = vmax.xlane.f32.xlu2 %v8066_v3  ;;  %3704 = vmatpush.msrb.mxu0 %v7874_v58 }
 0x2b2   : > { %3745 = vmatpush.msrb.mxu1 %v7876_v22  ;;  %3783 = vmatpush.msrb.mxu2 %v7944_v0 }
 0x2b3   : > { %3824 = vmatpush.msrb.mxu3 %v7946_v21  ;;  %3705 = vmatpush.msrb.mxu0 %v7851_v54 }
 0x2b4   : > { %3746 = vmatpush.msrb.mxu1 %v7853_v56  ;;  %3784 = vmatpush.msrb.mxu2 %v7928_v1 }
 0x2b5   : > { %3825 = vmatpush.msrb.mxu3 %v7930_v15  ;;  %v2385_v58 = vpop.f32.mrf.mxu2  ;;  %3706 = vmatpush.msrb.mxu0 %v7820_v35 }
 0x2b6   : > { %3747 = vmatpush.msrb.mxu1 %v7822_v28  ;;  %3785 = vmatpush.msrb.mxu2 %v7907_v27  ;;  %v8094_v54 = vsel %vm8043_vm6, %v2385_v58, -1e+30 }
 0x2b7   : > { %3826 = vmatpush.msrb.mxu3 %v7909_v32  ;;  %3003 = vmax.xlane.f32.xlu0 %v8086_v40 }
 0x2b8   : > { %v2474_v56 = vpop.f32.mrf.mxu3  ;;  %2989 = vmax.xlane.f32.xlu1 %v8094_v54  ;;  %v2207_v22 = vpop.f32.mrf.mxu0  ;;  %3707 = vmatpush.msrb.mxu0 %v7788_v6 }
 0x2b9   : > { %v2299_v17 = vpop.f32.mrf.mxu1  ;;  %3748 = vmatpush.msrb.mxu1 %v7790_v61  ;;  %3786 = vmatpush.msrb.mxu2 %v7886_v23  ;;  %v8104_v35 = vsel %vm8026_vm4, %v2207_v22, -1e+30  ;;  %v8119_v6 = vsel %vm8074_vm8, %v2474_v56, -1e+30  ;;  %v10118_v61 = vld [vmem:[#allocation41_spill] sm:$0xff]  ;;  %v10124_v23 = vld [vmem:[#allocation46_spill] sm:$0xff] }
 0x2ba   : > { %3827 = vmatpush.msrb.mxu3 %v7888_v59  ;;  %2957 = vmax.xlane.f32.xlu2 %v8104_v35  ;;  %v2872_v22 = vsel %vm2864_vm9, 1, %v5778_v45 }
 0x2bb   : > { %3708 = vmatpush.msrb.mxu0 %v7757_v43  ;;  %3749 = vmatpush.msrb.mxu1 %v7759_v10  ;;  %v8125_v43 = vsel %vm8050_vm7, %v2296_v50, -1e+30 }
 0x2bc   : > { %3787 = vmatpush.msrb.mxu2 %v7865_v13  ;;  %3828 = vmatpush.msrb.mxu3 %v7867_v19  ;;  %v8149_v13 = vsel %vm8050_vm7, %v2299_v17, -1e+30  ;;  %v10123_v19 = vld [vmem:[#allocation45_spill] sm:$0xff] }
 0x2bd   : > { %5044 = vmatmul.msk.f32.gmra.mxu2 %vm690_vm0, %v7893_v24  ;;  %3709 = vmatpush.msrb.mxu0 %v7733_v29  ;;  %v10117_v29 = vld [vmem:[#allocation43_spill] sm:$0xff] }
 0x2be   : > { %3750 = vmatpush.msrb.mxu1 %v7735_v60  ;;  %3788 = vmatpush.msrb.mxu2 %v7840_v48  ;;  %v10120_v48 = vld [vmem:[#allocation44_spill] sm:$0xff] }
 0x2bf   : > { %3829 = vmatpush.msrb.mxu3 %v7842_v63  ;;  %3710 = vmatpush.msrb.mxu0 %v7712_v11  ;;  %v10119_v11 = vld [vmem:[#allocation42_spill] sm:$0xff]  ;;  %v10122_v63 = vld [vmem:[#allocation52_spill] sm:$0xff] }
 0x2c0   : > { %3751 = vmatpush.msrb.mxu1 %v7714_v25  ;;  %3789 = vmatpush.msrb.mxu2 %v7812_v7  ;;  %v10121_v7 = vld [vmem:[#allocation51_spill] sm:$0xff] }
 0x2c1   : > { %3830 = vmatpush.msrb.mxu3 %v10117_v29  ;;  %3005 = vmax.xlane.f32.xlu1 %v8119_v6 }
 0x2c2   : > { %v2477_v60 = vpop.f32.mrf.mxu3  ;;  %2973 = vmax.xlane.f32.xlu0 %v8125_v43  ;;  %v2210_v10 = vpop.f32.mrf.mxu0  ;;  %3790 = vmatpush.msrb.mxu2 %v10118_v61  ;;  %v2857_v61 = vld [vmem:[%s8004_s15 + $0x6] sm:$0x1] }
 0x2c3   : > { %v2302_v28 = vpop.f32.mrf.mxu1  ;;  %3831 = vmatpush.msrb.mxu3 %v10119_v11  ;;  %5021 = vmatmul.msk.f32.gmra.mxu1 %vm690_vm0, %v10120_v48  ;;  %v8157_v59 = vsel %vm8026_vm4, %v2210_v10, -1e+30  ;;  %v2880_v10 = vperm.slane %v2872_v22, 0  ;;  %vm2865_vm10 = vcmp.gt.f32.partialorder %v2857_v61, 0.5 }
 0x2c4   : > { %v8138_v25 = vsel %vm8050_vm7, %v2302_v28, -1e+30  ;;  %3791 = vmatpush.msrb.mxu2 %v10121_v7  ;;  %5069 = vmatmul.msk.f32.gmra.mxu3 %vm690_vm0, %v10120_v48  ;;  %v2873_v7 = vsel %vm2865_vm10, 1, %v5778_v45 }
 0x2c5   : > { %2977 = vmax.xlane.f32.xlu2 %v8138_v25  ;;  %3832 = vmatpush.msrb.mxu3 %v10122_v63  ;;  %vm8250_vm11 = vcmp.eq.s32.totalorder %v2880_v10, 1 }
 0x2c6   : > { %5045 = vmatmul.msk.f32.gmra.mxu2 %vm690_vm0, %v10120_v48  ;;  %4996 = vmatmul.msk.f32.gmra.mxu0 %vm690_vm0, %v7893_v24  ;;  %v8168_v24 = vsel %vm8074_vm8, %v2477_v60, -1e+30 }
 0x2c7   : > { %3792 = vmatpush.msrb.mxu2 %v10123_v19  ;;  %3833 = vmatpush.msrb.mxu3 %v10124_v23  ;;  %v2855_v23 = vld [vmem:[%s8004_s15 + $0x4] sm:$0x1] }
 0x2c8   : > { %vm2863_vm12 = vcmp.gt.f32.partialorder %v2855_v23, 0.5 }
 0x2c9   : > { %2975 = vmax.xlane.f32.xlu1 %v8149_v13 }
 0x2ca   : > { %2959 = vmax.xlane.f32.xlu0 %v8157_v59 }
 0x2cb   : > { %v2388_v27 = vpop.f32.mrf.mxu2  ;;  %v2480_v32 = vpop.f32.mrf.mxu3 }
 0x2cc   : > { %v2213_v16 = vpop.f32.mrf.mxu0  ;;  %v8163_v1 = vsel %vm8074_vm8, %v2480_v32, -1e+30  ;;  %v8174_v15 = vsel %vm8043_vm6, %v2388_v27, -1e+30  ;;  %v2305_v0 = vpop.f32.mrf.mxu1  ;;  %v2881_v32 = vperm.slane %v2873_v7, 0 }
 0x2cd   : > { %3009 = vmax.xlane.f32.xlu2 %v8163_v1  ;;  %v8185_v4 = vsel %vm8026_vm4, %v2213_v16, -1e+30  ;;  %v8189_v52 = vsel %vm8050_vm7, %v2305_v0, -1e+30 }
 0x2ce   : > { %4997 = vmatmul.msk.f32.gmra.mxu0 %vm690_vm0, %v10120_v48  ;;  %vm8276_vm13 = vcmp.eq.s32.totalorder %v2881_v32, 1 }
 0x2d1   : > { %3007 = vmax.xlane.f32.xlu1 %v8168_v24 }
 0x2d2   : > { %2991 = vmax.xlane.f32.xlu0 %v8174_v15 }
 0x2d3   : > { %v2391_v21 = vpop.f32.mrf.mxu2  ;;  %v2483_v42 = vpop.f32.mrf.mxu3 }
 0x2d4   : > { %v2216_v8 = vpop.f32.mrf.mxu0  ;;  %v2308_v2 = vpop.f32.mrf.mxu1  ;;  %v8200_v37 = vsel %vm8043_vm6, %v2391_v21, -1e+30  ;;  %v8204_v12 = vsel %vm8074_vm8, %v2483_v42, -1e+30  ;;  %v2871_v42 = vsel %vm2863_vm12, 1, %v5778_v45 }
 0x2d5   : > { %v8180_v38 = vsel %vm8026_vm4, %v2216_v8, -1e+30  ;;  %v8215_v49 = vsel %vm8050_vm7, %v2308_v2, -1e+30  ;;  %v2858_v2 = vld [vmem:[%s8004_s15 + $0x7] sm:$0x1] }
 0x2d6   : > { %2963 = vmax.xlane.f32.xlu2 %v8180_v38  ;;  %vm2866_vm14 = vcmp.gt.f32.partialorder %v2858_v2, 0.5 }
 0x2d9   : > { %2961 = vmax.xlane.f32.xlu1 %v8185_v4 }
 0x2da   : > { %2979 = vmax.xlane.f32.xlu0 %v8189_v52 }
 0x2db   : > { %v2394_v46 = vpop.f32.mrf.mxu2  ;;  %v2486_v30 = vpop.f32.mrf.mxu3 }
 0x2dc   : > { %v2219_v39 = vpop.f32.mrf.mxu0  ;;  %v8195_v18 = vsel %vm8043_vm6, %v2394_v46, -1e+30  ;;  %v2311_v53 = vpop.f32.mrf.mxu1  ;;  %v8235_v56 = vsel %vm8074_vm8, %v2486_v30, -1e+30  ;;  %v2879_v30 = vperm.slane %v2871_v42, 0 }
 0x2dd   : > { %v8219_v41 = vsel %vm8026_vm4, %v2219_v39, -1e+30  ;;  %v8248_v28 = vsel %vm8050_vm7, %v2311_v53, -1e+30 }
 0x2de   : > { %2995 = vmax.xlane.f32.xlu2 %v8195_v18  ;;  %vm8296_vm15 = vcmp.eq.s32.totalorder %v2879_v30, 1 }
 0x2e1   : > { %2993 = vmax.xlane.f32.xlu1 %v8200_v37 }
 0x2e2   : > { %3011 = vmax.xlane.f32.xlu0 %v8204_v12 }
 0x2e3   : > { %v2397_v51 = vpop.f32.mrf.mxu2  ;;  %v2489_v44 = vpop.f32.mrf.mxu3 }
 0x2e4   : > { %v2222_v5 = vpop.f32.mrf.mxu0  ;;  %v8210_v57 = vsel %vm8074_vm8, %v2489_v44, -1e+30  ;;  %v2314_v62 = vpop.f32.mrf.mxu1  ;;  %v8231_v50 = vsel %vm8043_vm6, %v2397_v51, -1e+30 }
 0x2e5   : > { %v8257_v33 = vsel %vm8026_vm4, %v2222_v5, -1e+30  ;;  %v8269_v31 = vsel %vm8050_vm7, %v2314_v62, -1e+30  ;;  %vm4130_vm7 = vcmask 1046534  }
 0x2e6   : > { %3015 = vmax.xlane.f32.xlu2 %v8210_v57 }
 0x2e9   : > { %2981 = vmax.xlane.f32.xlu1 %v8215_v49 }
 0x2ea   : > { %2965 = vmax.xlane.f32.xlu0 %v8219_v41 }
 0x2eb   : > { %v2400_v36 = vpop.f32.mrf.mxu2  ;;  %v2492_v58 = vpop.f32.mrf.mxu3 }
 0x2ec   : > { %v2225_v9 = vpop.f32.mrf.mxu0  ;;  %v8242_v29 = vsel %vm8074_vm8, %v2492_v58, -1e+30  ;;  %v2649_v11 = vpop.f32.mrf.mxu1  ;;  %v8273_v0 = vsel %vm8043_vm6, %v2400_v36, -1e+30  ;;  %v2874_v36 = vsel %vm2866_vm14, 1, %v5778_v45  ;;  %vm4133_vm8 = vcmask 1047559  }
 0x2ed   : > { %v8226_v34 = vsel %vm8026_vm4, %v2225_v9, -1e+30  ;;  %v8263_v19 = vsel %vm8250_vm11, %v2649_v11, -1e+30  ;;  %v2882_v62 = vperm.slane %v2874_v36, 0  ;;  %vm4121_vm4 = vcmask 1043459  }
 0x2ee   : > { %2969 = vmax.xlane.f32.xlu2 %v8226_v34 }
 0x2ef   : > { %vm8316_vm1 = vcmp.eq.s32.totalorder %v2882_v62, 1 }
 0x2f1   : > { %3013 = vmax.xlane.f32.xlu1 %v8235_v56 }
 0x2f2   : > { %2997 = vmax.xlane.f32.xlu0 %v8231_v50 }
 0x2f3   : > { %v2403_v17 = vpop.f32.mrf.mxu2  ;;  %v2827_v27 = vpop.f32.mrf.mxu3 }
 0x2f4   : > { %v2560_v60 = vpop.f32.mrf.mxu0  ;;  %v2652_v46 = vpop.f32.mrf.mxu1  ;;  %v8294_v44 = vsel %vm8043_vm6, %v2403_v17, -1e+30  ;;  %vm4127_vm6 = vcmask 1045509  }
 0x2f5   : > { %v8314_v17 = vsel %vm8296_vm15, %v2560_v60, -1e+30  ;;  %v8350_v2 = vsel %vm8250_vm11, %v2652_v46, -1e+30 }
 0x2f6   : > { %3017 = vmax.xlane.f32.xlu2 %v8242_v29  ;;  %10140 = vst [vmem:[#allocation32_spill] sm:$0xff] %v8350_v2 }
 0x2f9   : > { %2983 = vmax.xlane.f32.xlu1 %v8248_v28 }
 0x2fa   : > { %2967 = vmax.xlane.f32.xlu0 %v8257_v33 }
 0x2fb   : > { %v2738_v63 = vpop.f32.mrf.mxu2  ;;  %v2830_v39 = vpop.f32.mrf.mxu3 }
 0x2fc   : > { %v2563_v16 = vpop.f32.mrf.mxu0  ;;  %v8290_v51 = vsel %vm8276_vm13, %v2738_v63, -1e+30  ;;  %v2655_v20 = vpop.f32.mrf.mxu1  ;;  %v8329_v60 = vsel %vm8316_vm1, %v2830_v39, -1e+30  ;;  %v8333_v63 = vsel %vm8316_vm1, %v2827_v27, -1e+30 }
 0x2fd   : > { %v8310_v58 = vsel %vm8296_vm15, %v2563_v16, -1e+30  ;;  %10137 = vst [vmem:[#allocation29_spill] sm:$0xff] %v8329_v60 }
 0x2fe   : > { %3035 = vmax.xlane.f32.xlu2 %v8263_v19  ;;  %10133 = vst [vmem:[#allocation39_spill] sm:$0xff] %v8310_v58 }
 0x301   : > { %2999 = vmax.xlane.f32.xlu1 %v8273_v0 }
 0x302   : > { %2985 = vmax.xlane.f32.xlu0 %v8269_v31 }
 0x303   : > { %v2741_v8 = vpop.f32.mrf.mxu2  ;;  %v2833_v22 = vpop.f32.mrf.mxu3 }
 0x304   : > { %v8285_v26 = vsel %vm8276_vm13, %v2741_v8, -1e+30  ;;  %v2566_v5 = vpop.f32.mrf.mxu0  ;;  %v8324_v10 = vsel %vm8316_vm1, %v2833_v22, -1e+30  ;;  %v2658_v7 = vpop.f32.mrf.mxu1  ;;  %v8346_v8 = vsel %vm8250_vm11, %v2655_v20, -1e+30 }
 0x305   : > { %10129 = vst [vmem:[#allocation33_spill] sm:$0xff] %v8285_v26  ;;  %v8305_v55 = vsel %vm8296_vm15, %v2566_v5, -1e+30  ;;  %v8339_v23 = vsel %vm8250_vm11, %v2658_v7, -1e+30 }
 0x306   : > { %3053 = vmax.xlane.f32.xlu2 %v8285_v26  ;;  %10132 = vst [vmem:[#allocation34_spill] sm:$0xff] %v8305_v55 }
 0x307   : > { %10136 = vst [vmem:[#allocation40_spill] sm:$0xff] %v8324_v10 }
 0x308   : > { %10138 = vst [vmem:[#allocation30_spill] sm:$0xff] %v8339_v23 }
 0x309   : > { %3001 = vmax.xlane.f32.xlu1 %v8294_v44  ;;  %10139 = vst [vmem:[#allocation31_spill] sm:$0xff] %v8346_v8 }
 0x30a   : > { %3051 = vmax.xlane.f32.xlu0 %v8290_v51 }
 0x30b   : > { %v2744_v9 = vpop.f32.mrf.mxu2  ;;  %v2836_v16 = vpop.f32.mrf.mxu3 }
 0x30c   : > { %v2569_v61 = vpop.f32.mrf.mxu0  ;;  %v2661_v39 = vpop.f32.mrf.mxu1  ;;  %v8367_v46 = vsel %vm8276_vm13, %v2744_v9, -1e+30 }
 0x30d   : > { %10143 = vst [vmem:[#allocation11_spill] sm:$0xff] %v8367_v46 }
 0x30e   : > { %3023 = vmax.xlane.f32.xlu2 %v8305_v55 }
 0x311   : > { %3019 = vmax.xlane.f32.xlu1 %v8314_v17 }
 0x312   : > { %3021 = vmax.xlane.f32.xlu0 %v8310_v58 }
 0x313   : > { %v2747_v11 = vpop.f32.mrf.mxu2  ;;  %v2839_v62 = vpop.f32.mrf.mxu3 }
 0x314   : > { %v2572_v42 = vpop.f32.mrf.mxu0  ;;  %v8363_v20 = vsel %vm8276_vm13, %v2747_v11, -1e+30 }
 0x315   : > { %10142 = vst [vmem:[#allocation10_spill] sm:$0xff] %v8363_v20  ;;  %v8382_v9 = vsel %vm8296_vm15, %v2572_v42, -1e+30 }
 0x316   : > { %3071 = vmax.xlane.f32.xlu2 %v8324_v10  ;;  %v2664_v10 = vpop.f32.mrf.mxu1  ;;  %10145 = vst [vmem:[#allocation13_spill] sm:$0xff] %v8382_v9 }
 0x319   : > { %3067 = vmax.xlane.f32.xlu1 %v8333_v63 }
 0x31a   : > { %3069 = vmax.xlane.f32.xlu0 %v8329_v60 }
 0x31b   : > { %v8341_v32 = vpop.xlane.xlu2 %2955  ;;  %v2750_v27 = vpop.f32.mrf.mxu2 }
 0x31c   : > { %v8358_v5 = vsel %vm8276_vm13, %v2750_v27, -1e+30  ;;  %v2575_v22 = vpop.f32.mrf.mxu0  ;;  %v2842_v55 = vpop.f32.mrf.mxu3 }
 0x31d   : > { %10141 = vst [vmem:[#allocation9_spill] sm:$0xff] %v8358_v5  ;;  %v8373_v7 = vsel %vm8296_vm15, %v2575_v22, -1e+30  ;;  %v8392_v22 = vsel %vm8316_vm1, %v2842_v55, -1e+30 }
 0x31e   : > { %3041 = vmax.xlane.f32.xlu2 %v8339_v23  ;;  %10144 = vst [vmem:[#allocation12_spill] sm:$0xff] %v8373_v7  ;;  %v2667_v42 = vpop.f32.mrf.mxu1 }
 0x31f   : > { %10147 = vst [vmem:[#allocation15_spill] sm:$0xff] %v8392_v22  ;;  %v8413_v55 = vsel %vm8250_vm11, %v2667_v42, -1e+30 }
 0x320   : > { %10150 = vst [vmem:[#allocation18_spill] sm:$0xff] %v8413_v55 }
 0x321   : > { %3037 = vmax.xlane.f32.xlu1 %v8350_v2  ;;  %v8353_v30 = vpop.xlane.xlu0 %2987 }
 0x322   : > { %3039 = vmax.xlane.f32.xlu0 %v8346_v8 }
 0x324   : > { %v2972_v36 = vpop.xlane.xlu2 %2971  ;;  %v2753_v8 = vpop.f32.mrf.mxu2 }
 0x325   : > { %v2845_v42 = vpop.f32.mrf.mxu3  ;;  %v3091_v58 = vsub.f32 %v8066_v3, %v2972_v36 }
 0x326   : > { %3059 = vmax.xlane.f32.xlu2 %v8358_v5 }
 0x329   : > { %3055 = vmax.xlane.f32.xlu1 %v8367_v46 }
 0x32a   : > { %3057 = vmax.xlane.f32.xlu0 %v8363_v20  ;;  %v3004_v27 = vpop.xlane.xlu0 %3003  ;;  %v8386_v20 = vsel %vm8296_vm15, %v2569_v61, -1e+30  ;;  %v8401_v61 = vsel %vm8316_vm1, %v2839_v62, -1e+30  ;;  %v8422_v62 = vsel %vm8250_vm11, %v2664_v10, -1e+30 }
 0x32b   : > { %v8375_v5 = vpop.xlane.xlu1 %2989  ;;  %10146 = vst [vmem:[#allocation14_spill] sm:$0xff] %v8386_v20 }
 0x32c   : > { %10148 = vst [vmem:[#allocation16_spill] sm:$0xff] %v8401_v61 }
 0x32d   : > { %v8378_v11 = vpop.xlane.xlu2 %2957  ;;  %10151 = vst [vmem:[#allocation19_spill] sm:$0xff] %v8422_v62 }
 0x32e   : > { %3029 = vmax.xlane.f32.xlu2 %v8373_v7 }
 0x331   : > { %3025 = vmax.xlane.f32.xlu1 %v8386_v20  ;;  %v8407_v20 = vsel %vm8316_vm1, %v2836_v16, -1e+30 }
 0x332   : > { %3027 = vmax.xlane.f32.xlu0 %v8382_v9  ;;  %10149 = vst [vmem:[#allocation17_spill] sm:$0xff] %v8407_v20 }
 0x334   : > { %v8394_v7 = vpop.xlane.xlu1 %3005 }
 0x335   : > { %v8396_v46 = vpop.xlane.xlu0 %2973 }
 0x336   : > { %3077 = vmax.xlane.f32.xlu2 %v8392_v22 }
 0x338   : > { %v8403_v23 = vpop.xlane.xlu2 %2977 }
 0x339   : > { %3073 = vmax.xlane.f32.xlu1 %v8407_v20 }
 0x33a   : > { %3075 = vmax.xlane.f32.xlu0 %v8401_v61  ;;  %v8428_v61 = vsel %vm8250_vm11, %v2661_v39, -1e+30  ;;  %v8443_v39 = vsel %vm8276_vm13, %v2753_v8, -1e+30 }
 0x33b   : > { %10152 = vst [vmem:[#allocation20_spill] sm:$0xff] %v8428_v61 }
 0x33c   : > { %v8415_v22 = vpop.xlane.xlu1 %2975  ;;  %10154 = vst [vmem:[#allocation22_spill] sm:$0xff] %v8443_v39 }
 0x33d   : > { %v8417_v9 = vpop.xlane.xlu0 %2959  ;;  %v3093_v53 = vsub.f32 %v8149_v13, %v8415_v22 }
 0x33e   : > { %3047 = vmax.xlane.f32.xlu2 %v8413_v55 }
 0x340   : > { %v8424_v16 = vpop.xlane.xlu2 %3009  ;;  %v2670_v26 = vpop.f32.mrf.mxu1 }
 0x341   : > { %v2756_v20 = vpop.f32.mrf.mxu2  ;;  %3043 = vmax.xlane.f32.xlu1 %v8428_v61  ;;  %v8434_v55 = vsel %vm8250_vm11, %v2670_v26, -1e+30  ;;  %v3163_v26 = vmul.f32 1.442695, %v3091_v58  ;;  %v3099_v58 = vsub.f32 %v8060_v47, %v8353_v30  ;;  %v3100_v30 = vsub.f32 %v8094_v54, %v8375_v5 }
 0x342   : > { %3045 = vmax.xlane.f32.xlu0 %v8422_v62  ;;  %10153 = vst [vmem:[#allocation21_spill] sm:$0xff] %v8434_v55  ;;  %v8448_v62 = vsel %vm8276_vm13, %v2756_v20, -1e+30  ;;  %v3108_v54 = vsub.f32 %v8119_v6, %v8394_v7 }
 0x343   : > { %10155 = vst [vmem:[#allocation23_spill] sm:$0xff] %v8448_v62  ;;  %v2578_v2 = vpop.f32.mrf.mxu0  ;;  %5454 = vpow2.f32 %v3163_v26  ;;  %v8489_v26 = vsel %vm8316_vm1, %v2845_v42, -1e+30 }
 0x344   : > { %v8436_v60 = vpop.xlane.xlu1 %3007 }
 0x345   : > { %v8438_v10 = vpop.xlane.xlu0 %2991 }
 0x346   : > { %3049 = vmax.xlane.f32.xlu2 %v8434_v55  ;;  %v3107_v55 = vsub.f32 %v8086_v40, %v3004_v27  ;;  %v3101_v22 = vsub.f32 %v8174_v15, %v8438_v10 }
 0x347   : > { %v2848_v36 = vpop.f32.mrf.mxu3 }
 0x348   : > { %v3195_v40 = vmul.f32 1.442695, %v3107_v55  ;;  %v8472_v21 = vsel %vm8316_vm1, %v2848_v36, -1e+30 }
 0x349   : > { %v8450_v61 = vpop.xlane.xlu2 %2963  ;;  %v2759_v48 = vpop.f32.mrf.mxu2  ;;  %3061 = vmax.xlane.f32.xlu1 %v8443_v39  ;;  %v8466_v39 = vsel %vm8296_vm15, %v2578_v2, -1e+30  ;;  %v3084_v2 = vsub.f32 %v8104_v35, %v8378_v11  ;;  %v3083_v35 = vsub.f32 %v8037_v14, %v8341_v32  ;;  %v3181_v11 = vmul.f32 1.442695, %v3100_v30 }
 0x34a   : > { %3063 = vmax.xlane.f32.xlu0 %v8448_v62  ;;  %v8457_v8 = vsel %vm8276_vm13, %v2759_v48, -1e+30  ;;  %v3179_v48 = vmul.f32 1.442695, %v3099_v58  ;;  %5456 = vpow2.f32 %v3195_v40  ;;  %v3197_v32 = vmul.f32 1.442695, %v3108_v54 }
 0x34b   : > { %10156 = vst [vmem:[#allocation24_spill] sm:$0xff] %v8457_v8  ;;  %v3149_v55 = vmul.f32 1.442695, %v3084_v2  ;;  %v2581_v5 = vpop.f32.mrf.mxu0  ;;  %v3085_v2 = vsub.f32 %v8157_v59, %v8417_v9  ;;  %v3092_v30 = vsub.f32 %v8125_v43, %v8396_v46  ;;  %v3167_v54 = vmul.f32 1.442695, %v3093_v53 }
 0x34c   : > { %v8459_v3 = vpop.xlane.xlu1 %2961  ;;  %5458 = vpow2.f32 %v3179_v48  ;;  %v3147_v48 = vmul.f32 1.442695, %v3083_v35  ;;  %v8510_v14 = vsel %vm8296_vm15, %v2581_v5, -1e+30  ;;  %v3109_v43 = vsub.f32 %v8168_v24, %v8436_v60 }
 0x34d   : > { %v8461_v20 = vpop.xlane.xlu0 %2979  ;;  %5460 = vpow2.f32 %v3149_v55  ;;  %v3151_v55 = vmul.f32 1.442695, %v3085_v2  ;;  %v3094_v53 = vsub.f32 %v8138_v25, %v8403_v23  ;;  %v3087_v25 = vsub.f32 %v8180_v38, %v8450_v61 }
 0x34e   : > { %3065 = vmax.xlane.f32.xlu2 %v8457_v8  ;;  %v8480_v8 = vpop.eup %5454  ;;  %5462 = vpow2.f32 %v3181_v11  ;;  %v3165_v11 = vmul.f32 1.442695, %v3092_v30  ;;  %v3183_v30 = vmul.f32 1.442695, %v3101_v22  ;;  %v3110_v38 = vsub.f32 %v8163_v1, %v8424_v16 }
 0x34f   : > { %5464 = vpow2.f32 %v3147_v48  ;;  %v3199_v48 = vmul.f32 1.442695, %v3109_v43 }
 0x350   : > { %v8491_v36 = vpop.eup %5456  ;;  %5466 = vpow2.f32 %v3197_v32 }
 0x351   : > { %v8474_v27 = vpop.xlane.xlu2 %2995  ;;  %3031 = vmax.xlane.f32.xlu1 %v8466_v39  ;;  %5468 = vpow2.f32 %v3151_v55 }
 0x352   : > { %3081 = vmax.xlane.f32.xlu0 %v8472_v21  ;;  %v8503_v42 = vpop.eup %5458  ;;  %5470 = vpow2.f32 %v3165_v11 }
 0x353   : > { %v8514_v6 = vpop.eup %5460  ;;  %5472 = vpow2.f32 %v3167_v54 }
 0x354   : > { %v2994_v62 = vpop.xlane.xlu1 %2993  ;;  %v8526_v59 = vpop.eup %5462  ;;  %5474 = vpow2.f32 %v3199_v48  ;;  %v3155_v48 = vmul.f32 1.442695, %v3087_v25 }
 0x355   : > { %v8482_v47 = vpop.xlane.xlu0 %3011  ;;  %v8533_v46 = vpop.eup %5464  ;;  %v3102_v32 = vsub.f32 %v8200_v37, %v2994_v62  ;;  %5476 = vpow2.f32 %v3183_v30  ;;  %v3086_v37 = vsub.f32 %v8185_v4, %v8459_v3  ;;  %v3169_v62 = vmul.f32 1.442695, %v3094_v53 }
 0x356   : > { %3291 = vadd.xlane.f32.xlu2 %v8480_v8  ;;  %v8535_v5 = vpop.eup %5466  ;;  %v3103_v4 = vsub.f32 %v8195_v18, %v8474_v27  ;;  %v3111_v53 = vsub.f32 %v8204_v12, %v8482_v47  ;;  %v3095_v12 = vsub.f32 %v8189_v52, %v8461_v20 }
 0x357   : > { %v8546_v24 = vpop.eup %5468  ;;  %v3185_v15 = vmul.f32 1.442695, %v3102_v32  ;;  %v3153_v22 = vmul.f32 1.442695, %v3086_v37  ;;  %v3201_v37 = vmul.f32 1.442695, %v3110_v38 }
 0x358   : > { %v8553_v10 = vpop.eup %5470  ;;  %v3187_v61 = vmul.f32 1.442695, %v3103_v4  ;;  %v3171_v38 = vmul.f32 1.442695, %v3095_v12 }
 0x359   : > { %v8493_v58 = vpop.xlane.xlu2 %3015  ;;  %3079 = vmax.xlane.f32.xlu1 %v8489_v26  ;;  %v8555_v55 = vpop.eup %5472  ;;  %5478 = vpow2.f32 %v3185_v15 }
 0x35a   : > { %3323 = vadd.xlane.f32.xlu0 %v8491_v36  ;;  %v8565_v54 = vpop.eup %5474  ;;  %5480 = vpow2.f32 %v3169_v62  ;;  %v3203_v62 = vmul.f32 1.442695, %v3111_v53 }
 0x35b   : > { %v8572_v3 = vpop.eup %5476  ;;  %5482 = vpow2.f32 %v3153_v22 }
 0x35c   : > { %v8501_v45 = vpop.xlane.xlu1 %2981  ;;  %5484 = vpow2.f32 %v3155_v48 }
 0x35d   : > { %v8505_v40 = vpop.xlane.xlu0 %2965  ;;  %5486 = vpow2.f32 %v3187_v61  ;;  %v3096_v47 = vsub.f32 %v8215_v49, %v8501_v45 }
 0x35e   : > { %3307 = vadd.xlane.f32.xlu2 %v8503_v42  ;;  %v3088_v1 = vsub.f32 %v8219_v41, %v8505_v40  ;;  %5488 = vpow2.f32 %v3201_v37 }
 0x35f   : > { %v8574_v32 = vpop.eup %5478  ;;  %5490 = vpow2.f32 %v3203_v62  ;;  %v3173_v61 = vmul.f32 1.442695, %v3096_v47 }
 0x360   : > { %v8586_v27 = vpop.eup %5480  ;;  %v3157_v48 = vmul.f32 1.442695, %v3088_v1 }
 0x361   : > { %v8516_v7 = vpop.xlane.xlu2 %2969  ;;  %3033 = vmax.xlane.f32.xlu1 %v8510_v14  ;;  %v8593_v16 = vpop.eup %5482 }
 0x362   : > { %3277 = vadd.xlane.f32.xlu0 %v8514_v6  ;;  %v8595_v25 = vpop.eup %5484  ;;  %5492 = vpow2.f32 %v3157_v48 }
 0x363   : > { %v8607_v40 = vpop.eup %5486  ;;  %5494 = vpow2.f32 %v3171_v38 }
 0x364   : > { %v8524_v35 = vpop.xlane.xlu1 %3013  ;;  %v8614_v20 = vpop.eup %5488  ;;  %5496 = vpow2.f32 %v3173_v61 }
 0x365   : > { %v8528_v9 = vpop.xlane.xlu0 %2997  ;;  %v3112_v52 = vsub.f32 %v8235_v56, %v8524_v35  ;;  %v8616_v53 = vpop.eup %5490 }
 0x366   : > { %3309 = vadd.xlane.f32.xlu2 %v8526_v59  ;;  %v3104_v45 = vsub.f32 %v8231_v50, %v8528_v9 }
 0x367   : > { %v3205_v37 = vmul.f32 1.442695, %v3112_v52 }
 0x368   : > { %v8627_v56 = vpop.eup %5492  ;;  %v3189_v12 = vmul.f32 1.442695, %v3104_v45 }
 0x369   : > { %v8537_v13 = vpop.xlane.xlu2 %3017  ;;  %3275 = vadd.xlane.f32.xlu1 %v8533_v46  ;;  %5498 = vpow2.f32 %v3205_v37  ;;  %v8634_v9 = vpop.eup %5494 }
 0x36a   : > { %3325 = vadd.xlane.f32.xlu0 %v8535_v5  ;;  %v8636_v48 = vpop.eup %5496  ;;  %5500 = vpow2.f32 %v3189_v12  ;;  %v3114_v12 = vsub.f32 %v8242_v29, %v8537_v13 }
 0x36c   : > { %v8544_v2 = vpop.xlane.xlu1 %2983 }
 0x36d   : > { %v8548_v60 = vpop.xlane.xlu0 %2967  ;;  %v3097_v47 = vsub.f32 %v8248_v28, %v8544_v2 }
 0x36e   : > { %3279 = vadd.xlane.f32.xlu2 %v8546_v24 }
 0x36f   : > { %v3175_v61 = vmul.f32 1.442695, %v3097_v47  ;;  %v8646_v2 = vpop.eup %5498 }
 0x371   : > { %v8557_v11 = vpop.xlane.xlu2 %3035  ;;  %3293 = vadd.xlane.f32.xlu1 %v8553_v10 }
 0x372   : > { %3295 = vadd.xlane.f32.xlu0 %v8555_v55 }
 0x374   : > { %v3000_v23 = vpop.xlane.xlu1 %2999 }
 0x375   : > { %v8567_v43 = vpop.xlane.xlu0 %2985  ;;  %v3105_v62 = vsub.f32 %v8273_v0, %v3000_v23  ;;  %v3089_v0 = vsub.f32 %v8257_v33, %v8548_v60  ;;  %v3090_v23 = vsub.f32 %v8226_v34, %v8516_v7  ;;  %v8653_v60 = vpop.eup %5500  ;;  %v3113_v7 = vsub.f32 %v8210_v57, %v8493_v58 }
 0x376   : > { %3327 = vadd.xlane.f32.xlu2 %v8565_v54  ;;  %v3098_v13 = vsub.f32 %v8269_v31, %v8567_v43 }
 0x377   : > { %v3191_v50 = vmul.f32 1.442695, %v3105_v62  ;;  %v3159_v45 = vmul.f32 1.442695, %v3089_v0  ;;  %v3161_v37 = vmul.f32 1.442695, %v3090_v23 }
 0x378   : > { %v3207_v0 = vmul.f32 1.442695, %v3113_v7  ;;  %v3209_v23 = vmul.f32 1.442695, %v3114_v12  ;;  %v3177_v7 = vmul.f32 1.442695, %v3098_v13 }
 0x379   : > { %v8576_v30 = vpop.xlane.xlu2 %3053  ;;  %3311 = vadd.xlane.f32.xlu1 %v8572_v3  ;;  %5502 = vpow2.f32 %v3191_v50 }
 0x37a   : > { %3313 = vadd.xlane.f32.xlu0 %v8574_v32  ;;  %5504 = vpow2.f32 %v3175_v61 }
 0x37b   : > { %5506 = vpow2.f32 %v3159_v45  ;;  %v3123_v45 = vsub.f32 %v8263_v19, %v8557_v11 }
 0x37c   : > { %v8584_v18 = vpop.xlane.xlu1 %3001  ;;  %5508 = vpow2.f32 %v3161_v37 }
 0x37d   : > { %v8588_v15 = vpop.xlane.xlu0 %3051  ;;  %v3106_v33 = vsub.f32 %v8294_v44, %v8584_v18  ;;  %v3227_v12 = vmul.f32 1.442695, %v3123_v45 }
 0x37e   : > { %3297 = vadd.xlane.f32.xlu2 %v8586_v27  ;;  %v3131_v11 = vsub.f32 %v8290_v51, %v8588_v15 }
 0x37f   : > { %v8655_v62 = vpop.eup %5502  ;;  %v3193_v47 = vmul.f32 1.442695, %v3106_v33 }
 0x380   : > { %v8667_v18 = vpop.eup %5504  ;;  %v3243_v45 = vmul.f32 1.442695, %v3131_v11  ;;  %v10164_v11 = vld [vmem:[#allocation33_spill] sm:$0xff] }
 0x381   : > { %v8597_v22 = vpop.xlane.xlu2 %3023  ;;  %3281 = vadd.xlane.f32.xlu1 %v8593_v16  ;;  %5510 = vpow2.f32 %v3193_v47  ;;  %v8674_v58 = vpop.eup %5506 }
 0x382   : > { %3283 = vadd.xlane.f32.xlu0 %v8595_v25  ;;  %v8676_v61 = vpop.eup %5508  ;;  %5512 = vpow2.f32 %v3207_v0 }
 0x383   : > { %5514 = vpow2.f32 %v3209_v23  ;;  %v10159_v23 = vld [vmem:[#allocation32_spill] sm:$0xff] }
 0x384   : > { %v8605_v41 = vpop.xlane.xlu1 %3019 }
 0x385   : > { %v8609_v4 = vpop.xlane.xlu0 %3021  ;;  %v3115_v57 = vsub.f32 %v8314_v17, %v8605_v41 }
 0x386   : > { %3315 = vadd.xlane.f32.xlu2 %v8607_v40 }
 0x387   : > { %v3211_v37 = vmul.f32 1.442695, %v3115_v57  ;;  %v8688_v41 = vpop.eup %5510 }
 0x388   : > { %10157 = vst [vmem:[#allocation25_spill] sm:$0xff] %v8688_v41  ;;  %v8695_v43 = vpop.eup %5512 }
 0x389   : > { %v8618_v49 = vpop.xlane.xlu2 %3071  ;;  %3329 = vadd.xlane.f32.xlu1 %v8614_v20  ;;  %5516 = vpow2.f32 %v3211_v37  ;;  %v8697_v47 = vpop.eup %5514  ;;  %v10161_v37 = vld [vmem:[#allocation39_spill] sm:$0xff] }
 0x38a   : > { %3331 = vadd.xlane.f32.xlu0 %v8616_v53  ;;  %10158 = vst [vmem:[#allocation26_spill] sm:$0xff] %v8697_v47  ;;  %5518 = vpow2.f32 %v3177_v7  ;;  %v3116_v7 = vsub.f32 %v10161_v37, %v8609_v4 }
 0x38b   : > { %5520 = vpow2.f32 %v3227_v12 }
 0x38c   : > { %v8625_v1 = vpop.xlane.xlu1 %3067  ;;  %v3213_v4 = vmul.f32 1.442695, %v3116_v7 }
 0x38d   : > { %v8629_v35 = vpop.xlane.xlu0 %3069  ;;  %v3139_v31 = vsub.f32 %v8333_v63, %v8625_v1 }
 0x38e   : > { %3285 = vadd.xlane.f32.xlu2 %v8627_v56 }
 0x38f   : > { %v3259_v0 = vmul.f32 1.442695, %v3139_v31  ;;  %v8706_v63 = vpop.eup %5516 }
 0x390   : > { %10160 = vst [vmem:[#allocation27_spill] sm:$0xff] %v8706_v63  ;;  %v8713_v51 = vpop.eup %5518 }
 0x391   : > { %v8638_v38 = vpop.xlane.xlu2 %3041  ;;  %3299 = vadd.xlane.f32.xlu1 %v8634_v9  ;;  %5522 = vpow2.f32 %v3259_v0  ;;  %v8715_v15 = vpop.eup %5520 }
 0x392   : > { %3301 = vadd.xlane.f32.xlu0 %v8636_v48  ;;  %10162 = vst [vmem:[#allocation28_spill] sm:$0xff] %v8715_v15  ;;  %5524 = vpow2.f32 %v3243_v45 }
 0x394   : > { %v3038_v28 = vpop.xlane.xlu1 %3037 }
 0x395   : > { %v8648_v52 = vpop.xlane.xlu0 %3039  ;;  %v3124_v57 = vsub.f32 %v10159_v23, %v3038_v28  ;;  %v10163_v28 = vld [vmem:[#allocation29_spill] sm:$0xff]  ;;  %v3132_v23 = vsub.f32 %v10164_v11, %v8576_v30  ;;  %v10170_v11 = vld [vmem:[#allocation11_spill] sm:$0xff] }
 0x396   : > { %3333 = vadd.xlane.f32.xlu2 %v8646_v2  ;;  %v3140_v31 = vsub.f32 %v10163_v28, %v8629_v35  ;;  %v10166_v35 = vld [vmem:[#allocation30_spill] sm:$0xff] }
 0x397   : > { %v3245_v45 = vmul.f32 1.442695, %v3132_v23  ;;  %v3126_v28 = vsub.f32 %v10166_v35, %v8638_v38 }
 0x399   : > { %v8657_v34 = vpop.xlane.xlu2 %3059  ;;  %3317 = vadd.xlane.f32.xlu1 %v8653_v60 }
 0x39a   : > { %3319 = vadd.xlane.f32.xlu0 %v8655_v62 }
 0x39c   : > { %v8665_v44 = vpop.xlane.xlu1 %3055 }
 0x39d   : > { %v8669_v50 = vpop.xlane.xlu0 %3057  ;;  %v3133_v23 = vsub.f32 %v10170_v11, %v8665_v44 }
 0x39e   : > { %3303 = vadd.xlane.f32.xlu2 %v8667_v18 }
 0x3a1   : > { %v8678_v29 = vpop.xlane.xlu2 %3029  ;;  %3287 = vadd.xlane.f32.xlu1 %v8674_v58 }
 0x3a2   : > { %3289 = vadd.xlane.f32.xlu0 %v8676_v61 }
 0x3a4   : > { %v8686_v17 = vpop.xlane.xlu1 %3025 }
 0x3a5   : > { %v8690_v33 = vpop.xlane.xlu0 %3027 }
 0x3a6   : > { %3321 = vadd.xlane.f32.xlu2 %v8688_v41  ;;  %v3229_v41 = vmul.f32 1.442695, %v3124_v57  ;;  %v8727_v57 = vpop.eup %5522 }
 0x3a7   : > { %10165 = vst [vmem:[#allocation35_spill] sm:$0xff] %v8727_v57 }
 0x3a8   : > { %5526 = vpow2.f32 %v3229_v41  ;;  %v10169_v41 = vld [vmem:[#allocation31_spill] sm:$0xff] }
 0x3a9   : > { %v8699_v19 = vpop.xlane.xlu2 %3077  ;;  %3335 = vadd.xlane.f32.xlu1 %v8695_v43  ;;  %5528 = vpow2.f32 %v3213_v4  ;;  %v3125_v7 = vsub.f32 %v10169_v41, %v8648_v52 }
 0x3aa   : > { %3337 = vadd.xlane.f32.xlu0 %v8697_v47 }
 0x3ac   : > { %v3074_v13 = vpop.xlane.xlu1 %3073 }
 0x3ad   : > { %v8708_v1 = vpop.xlane.xlu0 %3075 }
 0x3ae   : > { %3339 = vadd.xlane.f32.xlu2 %v8706_v63  ;;  %v3261_v63 = vmul.f32 1.442695, %v3140_v31  ;;  %v3233_v31 = vmul.f32 1.442695, %v3126_v28  ;;  %v10175_v28 = vld [vmem:[#allocation34_spill] sm:$0xff] }
 0x3af   : > { %v3117_v44 = vsub.f32 %v10175_v28, %v8597_v22  ;;  %v10178_v28 = vld [vmem:[#allocation9_spill] sm:$0xff] }
 0x3b0   : > { %5530 = vpow2.f32 %v3261_v63  ;;  %v3247_v63 = vmul.f32 1.442695, %v3133_v23 }
 0x3b1   : > { %v8717_v12 = vpop.xlane.xlu2 %3047  ;;  %3305 = vadd.xlane.f32.xlu1 %v8713_v51  ;;  %5532 = vpow2.f32 %v3245_v45  ;;  %v3215_v23 = vmul.f32 1.442695, %v3117_v44 }
 0x3b2   : > { %3355 = vadd.xlane.f32.xlu0 %v8715_v15  ;;  %v8734_v15 = vpop.eup %5524  ;;  %5534 = vpow2.f32 %v3233_v31 }
 0x3b3   : > { %10167 = vst [vmem:[#allocation36_spill] sm:$0xff] %v8734_v15  ;;  %v8736_v47 = vpop.eup %5526 }
 0x3b4   : > { %v8725_v0 = vpop.xlane.xlu1 %3043  ;;  %10168 = vst [vmem:[#allocation37_spill] sm:$0xff] %v8736_v47  ;;  %v8748_v4 = vpop.eup %5528 }
 0x3b5   : > { %v8729_v37 = vpop.xlane.xlu0 %3045  ;;  %10171 = vst [vmem:[#allocation38_spill] sm:$0xff] %v8748_v4 }
 0x3b6   : > { %3387 = vadd.xlane.f32.xlu2 %v8727_v57  ;;  %v3231_v57 = vmul.f32 1.442695, %v3125_v7  ;;  %v8754_v41 = vpop.eup %5530 }
 0x3b7   : > { %10173 = vst [vmem:[#allocation47_spill] sm:$0xff] %v8754_v41  ;;  %v8756_v45 = vpop.eup %5532 }
 0x3b8   : > { %10174 = vst [vmem:[#allocation48_spill] sm:$0xff] %v8756_v45  ;;  %5536 = vpow2.f32 %v3231_v57  ;;  %v10180_v57 = vld [vmem:[#allocation10_spill] sm:$0xff] }
 0x3b9   : > { %v8738_v30 = vpop.xlane.xlu2 %3049  ;;  %3371 = vadd.xlane.f32.xlu1 %v8734_v15  ;;  %v10172_v15 = vld [vmem:[#allocation17_spill] sm:$0xff]  ;;  %5538 = vpow2.f32 %v3247_v63  ;;  %v3134_v63 = vsub.f32 %v10180_v57, %v8669_v50 }
 0x3ba   : > { %3357 = vadd.xlane.f32.xlu0 %v8736_v47  ;;  %v3142_v52 = vsub.f32 %v10172_v15, %v3074_v13  ;;  %v10176_v47 = vld [vmem:[#allocation40_spill] sm:$0xff]  ;;  %v8768_v15 = vpop.eup %5534 }
 0x3bb   : > { %v3141_v7 = vsub.f32 %v10176_v47, %v8618_v49  ;;  %10177 = vst [vmem:[#allocation49_spill] sm:$0xff] %v8768_v15 }
 0x3bc   : > { %v8746_v38 = vpop.xlane.xlu1 %3061  ;;  %v3265_v31 = vmul.f32 1.442695, %v3142_v52 }
 0x3bd   : > { %v8750_v35 = vpop.xlane.xlu0 %3063  ;;  %v3263_v22 = vmul.f32 1.442695, %v3141_v7  ;;  %v10181_v7 = vld [vmem:[#allocation16_spill] sm:$0xff] }
 0x3be   : > { %3341 = vadd.xlane.f32.xlu2 %v8748_v4  ;;  %5540 = vpow2.f32 %v3265_v31  ;;  %v8775_v49 = vpop.eup %5536 }
 0x3bf   : > { %v8777_v47 = vpop.eup %5538  ;;  %5542 = vpow2.f32 %v3215_v23  ;;  %v10183_v23 = vld [vmem:[#allocation13_spill] sm:$0xff] }
 0x3c0   : > { %10179 = vst [vmem:[#allocation50_spill] sm:$0xff] %v8777_v47  ;;  %5544 = vpow2.f32 %v3263_v22  ;;  %v3119_v22 = vsub.f32 %v10183_v23, %v8690_v33  ;;  %v10185_v33 = vld [vmem:[#allocation22_spill] sm:$0xff] }
 0x3c1   : > { %v8760_v11 = vpop.xlane.xlu2 %3065  ;;  %3389 = vadd.xlane.f32.xlu1 %v8754_v41  ;;  %v3135_v41 = vsub.f32 %v10178_v28, %v8657_v34  ;;  %v3249_v28 = vmul.f32 1.442695, %v3134_v63 }
 0x3c2   : > { %3373 = vadd.xlane.f32.xlu0 %v8756_v45 }
 0x3c3   : > { %v3251_v44 = vmul.f32 1.442695, %v3135_v41 }
 0x3c4   : > { %v8766_v13 = vpop.xlane.xlu1 %3031  ;;  %v8785_v31 = vpop.eup %5540 }
 0x3c5   : > { %v8770_v4 = vpop.xlane.xlu0 %3081  ;;  %10182 = vst [vmem:[#allocation57_spill] sm:$0xff] %v8785_v31  ;;  %v8788_v50 = vpop.eup %5542 }
 0x3c6   : > { %3361 = vadd.xlane.f32.xlu2 %v8768_v15  ;;  %v3143_v15 = vsub.f32 %v10181_v7, %v8708_v1  ;;  %v8792_v41 = vpop.eup %5544  ;;  %v10184_v1 = vld [vmem:[#allocation14_spill] sm:$0xff] }
 0x3c8   : > { %v3267_v57 = vmul.f32 1.442695, %v3143_v15  ;;  %v3136_v15 = vsub.f32 %v10185_v33, %v8746_v38  ;;  %v10187_v33 = vld [vmem:[#allocation20_spill] sm:$0xff] }
 0x3c9   : > { %v3292_v52 = vpop.xlane.xlu2 %3291  ;;  %3359 = vadd.xlane.f32.xlu1 %v8775_v49 }
 0x3ca   : > { %3375 = vadd.xlane.f32.xlu0 %v8777_v47  ;;  %5546 = vrcp.f32 %v3292_v52  ;;  %v3118_v52 = vsub.f32 %v10184_v1, %v8686_v17 }
 0x3cc   : > { %v3080_v34 = vpop.xlane.xlu1 %3079  ;;  %v3217_v17 = vmul.f32 1.442695, %v3118_v52 }
 0x3cd   : > { %v3324_v45 = vpop.xlane.xlu0 %3323 }
 0x3ce   : > { %3393 = vadd.xlane.f32.xlu2 %v8785_v31  ;;  %5548 = vrcp.f32 %v3324_v45  ;;  %v3219_v45 = vmul.f32 1.442695, %v3119_v22  ;;  %v3145_v22 = vsub.f32 %v8489_v26, %v3080_v34 }
 0x3cf   : > { %5550 = vpow2.f32 %v3251_v44 }
 0x3d0   : > { %v5547_v47 = vpop.eup %5546  ;;  %5552 = vpow2.f32 %v3249_v28  ;;  %v3271_v26 = vmul.f32 1.442695, %v3145_v22 }
 0x3d1   : > { %v3308_v7 = vpop.xlane.xlu2 %3307  ;;  %3391 = vadd.xlane.f32.xlu1 %v8792_v41  ;;  %v3475_v63 = vmul.f32 %v5547_v47, %v8480_v8  ;;  %v3253_v47 = vmul.f32 1.442695, %v3136_v15 }
 0x3d2   : > { %5554 = vrcp.f32 %v3308_v7  ;;  %3343 = vadd.xlane.f32.xlu0 %v8788_v50  ;;  %v10186_v7 = vld [vmem:[#allocation15_spill] sm:$0xff] }
 0x3d3   : > { %5556 = vpow2.f32 %v3267_v57  ;;  %3588 = vmatmul.f32.vlgmr.msra.gmra.mxu1 %v3475_v63  ;;  %v3144_v63 = vsub.f32 %v10186_v7, %v8699_v19 }
 0x3d4   : > { %v5549_v44 = vpop.eup %5548  ;;  %v8801_v23 = vpop.xlane.xlu1 %3033  ;;  %5558 = vpow2.f32 %v3219_v45 }
 0x3d5   : > { %v8803_v28 = vpop.eup %5550  ;;  %v3491_v1 = vmul.f32 %v5549_v44, %v8491_v36  ;;  %v3278_v31 = vpop.xlane.xlu0 %3277  ;;  %5560 = vpow2.f32 %v3217_v17  ;;  %v3127_v44 = vsub.f32 %v10187_v33, %v8725_v0  ;;  %v3269_v15 = vmul.f32 1.442695, %v3144_v63  ;;  %v10188_v0 = vld [vmem:[#allocation24_spill] sm:$0xff]  ;;  %v10190_v63 = vld [vmem:[#allocation23_spill] sm:$0xff] }
 0x3d6   : > { %3379 = vadd.xlane.f32.xlu2 %v8803_v28  ;;  %v8807_v8 = vpop.eup %5552 }
 0x3d7   : > { %3670 = vmatmul.f32.vlgmr.msra.gmra.mxu3 %v3491_v1  ;;  %v3235_v19 = vmul.f32 1.442695, %v3127_v44  ;;  %v3138_v1 = vsub.f32 %v10188_v0, %v8760_v11 }
 0x3d8   : > { %v5555_v38 = vpop.eup %5554 }
 0x3d9   : > { %v8810_v57 = vpop.eup %5556  ;;  %v3483_v52 = vmul.f32 %v5555_v38, %v8503_v42  ;;  %v3310_v36 = vpop.xlane.xlu2 %3309  ;;  %3377 = vadd.xlane.f32.xlu1 %v8807_v8  ;;  %v3257_v44 = vmul.f32 1.442695, %v3138_v1 }
 0x3da   : > { %5562 = vrcp.f32 %v3310_v36  ;;  %3395 = vadd.xlane.f32.xlu0 %v8810_v57  ;;  %v8819_v45 = vpop.eup %5558 }
 0x3db   : > { %5564 = vpow2.f32 %v3253_v47  ;;  %3629 = vmatmul.f32.vlgmr.msra.gmra.mxu2 %v3483_v52  ;;  %v8822_v42 = vpop.eup %5560  ;;  %v10189_v47 = vld [vmem:[#allocation12_spill] sm:$0xff]  ;;  %v3137_v52 = vsub.f32 %v10190_v63, %v8750_v35 }
 0x3dc   : > { %v3276_v34 = vpop.xlane.xlu1 %3275  ;;  %v3120_v22 = vsub.f32 %v10189_v47, %v8678_v29  ;;  %v10192_v47 = vld [vmem:[#allocation19_spill] sm:$0xff] }
 0x3dd   : > { %v3326_v17 = vpop.xlane.xlu0 %3325  ;;  %5566 = vrcp.f32 %v3276_v34  ;;  %v3255_v35 = vmul.f32 1.442695, %v3137_v52 }
 0x3de   : > { %3347 = vadd.xlane.f32.xlu2 %v8819_v45  ;;  %5568 = vrcp.f32 %v3326_v17  ;;  %v3221_v29 = vmul.f32 1.442695, %v3120_v22  ;;  %v3128_v22 = vsub.f32 %v10192_v47, %v8729_v37 }
 0x3df   : > { %5570 = vpow2.f32 %v3271_v26 }
 0x3e0   : > { %v5563_v38 = vpop.eup %5562  ;;  %5572 = vpow2.f32 %v3269_v15 }
 0x3e1   : > { %v8828_v7 = vpop.eup %5564  ;;  %v3280_v36 = vpop.xlane.xlu2 %3279  ;;  %v3484_v33 = vmul.f32 %v5563_v38, %v8526_v59  ;;  %3345 = vadd.xlane.f32.xlu1 %v8822_v42  ;;  %5574 = vpow2.f32 %v3235_v19 }
 0x3e2   : > { %3381 = vadd.xlane.f32.xlu0 %v8828_v7  ;;  %5576 = vrcp.f32 %v3278_v31  ;;  %v10191_v31 = vld [vmem:[#allocation18_spill] sm:$0xff] }
 0x3e3   : > { %v5567_v11 = vpop.eup %5566  ;;  %3632 = vmatmul.f32.gmra.mxu2 %v3484_v33  ;;  %v3129_v1 = vsub.f32 %v10191_v31, %v8717_v12 }
 0x3e4   : > { %v5569_v26 = vpop.eup %5568  ;;  %v3467_v34 = vmul.f32 %v5567_v11, %v8533_v46  ;;  %v3294_v15 = vpop.xlane.xlu1 %3293 }
 0x3e5   : > { %v8836_v17 = vpop.eup %5570  ;;  %v3296_v0 = vpop.xlane.xlu0 %3295  ;;  %5578 = vrcp.f32 %v3294_v15  ;;  %v3492_v59 = vmul.f32 %v5569_v26, %v8535_v5  ;;  %v3146_v5 = vsub.f32 %v8472_v21, %v8770_v4  ;;  %v3239_v52 = vmul.f32 1.442695, %v3129_v1 }
 0x3e6   : > { %3399 = vadd.xlane.f32.xlu2 %v8836_v17  ;;  %3547 = vmatmul.f32.vlgmr.msra.gmra.mxu0 %v3467_v34  ;;  %v8840_v19 = vpop.eup %5572  ;;  %5580 = vpow2.f32 %v3257_v44  ;;  %v3237_v26 = vmul.f32 1.442695, %v3128_v22 }
 0x3e7   : > { %3673 = vmatmul.f32.gmra.mxu3 %v3492_v59  ;;  %v8844_v38 = vpop.eup %5574  ;;  %5582 = vpow2.f32 %v3221_v29  ;;  %v3273_v21 = vmul.f32 1.442695, %v3146_v5  ;;  %v3122_v59 = vsub.f32 %v8510_v14, %v8801_v23 }
 0x3e8   : > { %v5577_v46 = vpop.eup %5576  ;;  %5584 = vpow2.f32 %v3255_v35 }
 0x3e9   : > { %v3328_v63 = vpop.xlane.xlu2 %3327  ;;  %3397 = vadd.xlane.f32.xlu1 %v8840_v19  ;;  %v3468_v11 = vmul.f32 %v5577_v46, %v8514_v6  ;;  %v3121_v6 = vsub.f32 %v8466_v39, %v8766_v13 }
 0x3ea   : > { %5586 = vrcp.f32 %v3328_v63  ;;  %3363 = vadd.xlane.f32.xlu0 %v8844_v38  ;;  %v3225_v63 = vmul.f32 1.442695, %v3122_v59 }
 0x3eb   : > { %v5579_v12 = vpop.eup %5578  ;;  %5588 = vrcp.f32 %v3280_v36 }
 0x3ec   : > { %5590 = vrcp.f32 %v3296_v0  ;;  %v3312_v33 = vpop.xlane.xlu1 %3311  ;;  %v3476_v44 = vmul.f32 %v5579_v12, %v8553_v10  ;;  %v8854_v37 = vpop.eup %5580  ;;  %v10193_v12 = vld [vmem:[#allocation21_spill] sm:$0xff] }
 0x3ed   : > { %v3314_v29 = vpop.xlane.xlu0 %3313  ;;  %5592 = vrcp.f32 %v3312_v33  ;;  %v8856_v34 = vpop.eup %5582 }
 0x3ee   : > { %3385 = vadd.xlane.f32.xlu2 %v8854_v37  ;;  %3550 = vmatmul.f32.gmra.mxu0 %v3468_v11  ;;  %v8859_v4 = vpop.eup %5584  ;;  %5594 = vpow2.f32 %v3239_v52  ;;  %v3130_v52 = vsub.f32 %v10193_v12, %v8738_v30 }
 0x3ef   : > { %3591 = vmatmul.f32.gmra.mxu1 %v3476_v44  ;;  %5596 = vpow2.f32 %v3237_v26 }
 0x3f0   : > { %v5587_v36 = vpop.eup %5586  ;;  %5598 = vpow2.f32 %v3273_v21  ;;  %v3241_v21 = vmul.f32 1.442695, %v3130_v52 }
 0x3f1   : > { %v5589_v15 = vpop.eup %5588  ;;  %v3298_v10 = vpop.xlane.xlu2 %3297  ;;  %v3493_v35 = vmul.f32 %v5587_v36, %v8565_v54  ;;  %3383 = vadd.xlane.f32.xlu1 %v8859_v4  ;;  %5600 = vrcp.f32 %v3314_v29  ;;  %v3223_v54 = vmul.f32 1.442695, %v3121_v6 }
 0x3f2   : > { %v5591_v0 = vpop.eup %5590  ;;  %3349 = vadd.xlane.f32.xlu0 %v8856_v34  ;;  %5602 = vrcp.f32 %v3298_v10  ;;  %v3469_v46 = vmul.f32 %v5589_v15, %v8546_v24 }
 0x3f3   : > { %v5593_v31 = vpop.eup %5592  ;;  %3676 = vmatmul.f32.gmra.mxu3 %v3493_v35  ;;  %v3477_v22 = vmul.f32 %v5591_v0, %v8555_v55 }
 0x3f4   : > { %v3282_v1 = vpop.xlane.xlu1 %3281  ;;  %v3485_v39 = vmul.f32 %v5593_v31, %v8572_v3  ;;  %v8870_v13 = vpop.eup %5594 }
 0x3f5   : > { %v3284_v47 = vpop.xlane.xlu0 %3283  ;;  %5604 = vrcp.f32 %v3282_v1  ;;  %v8874_v14 = vpop.eup %5596 }
 0x3f6   : > { %3367 = vadd.xlane.f32.xlu2 %v8870_v13  ;;  %3553 = vmatmul.f32.gmra.mxu0 %v3469_v46  ;;  %v8876_v23 = vpop.eup %5598  ;;  %5606 = vpow2.f32 %v3223_v54 }
 0x3f7   : > { %3594 = vmatmul.f32.gmra.mxu1 %v3477_v22  ;;  %3635 = vmatmul.f32.gmra.mxu2 %v3485_v39  ;;  %v5601_v24 = vpop.eup %5600  ;;  %5608 = vpow2.f32 %v3225_v63 }
 0x3f8   : > { %v5603_v5 = vpop.eup %5602  ;;  %5610 = vrcp.f32 %v3284_v47  ;;  %v3486_v29 = vmul.f32 %v5601_v24, %v8574_v32 }
 0x3f9   : > { %v3316_v3 = vpop.xlane.xlu2 %3315  ;;  %3365 = vadd.xlane.f32.xlu1 %v8874_v14  ;;  %v3478_v26 = vmul.f32 %v5603_v5, %v8586_v27 }
 0x3fa   : > { %3401 = vadd.xlane.f32.xlu0 %v8876_v23  ;;  %5612 = vrcp.f32 %v3316_v3 }
 0x3fb   : > { %v5605_v55 = vpop.eup %5604 }
 0x3fc   : > { %v3330_v33 = vpop.xlane.xlu1 %3329  ;;  %v3470_v11 = vmul.f32 %v5605_v55, %v8593_v16  ;;  %v8885_v36 = vpop.eup %5606 }
 0x3fd   : > { %v3332_v44 = vpop.xlane.xlu0 %3331  ;;  %5614 = vrcp.f32 %v3330_v33  ;;  %v8887_v30 = vpop.eup %5608 }
 0x3fe   : > { %3556 = vmatmul.f32.gmra.mxu0 %v3470_v11  ;;  %v5611_v15 = vpop.eup %5610  ;;  %5616 = vpow2.f32 %v3241_v21 }
 0x3ff   : > { %3597 = vmatmul.f32.gmra.mxu1 %v3478_v26  ;;  %3638 = vmatmul.f32.gmra.mxu2 %v3486_v29  ;;  %v3471_v27 = vmul.f32 %v5611_v15, %v8595_v25 }
 0x400   : > { %v5613_v10 = vpop.eup %5612 }
 0x401   : > { %v3286_v6 = vpop.xlane.xlu2 %3285  ;;  %3351 = vadd.xlane.f32.xlu1 %v8885_v36  ;;  %v3487_v59 = vmul.f32 %v5613_v10, %v8607_v40 }
 0x402   : > { %3353 = vadd.xlane.f32.xlu0 %v8887_v30  ;;  %5618 = vrcp.f32 %v3286_v6 }
 0x403   : > { %v5615_v16 = vpop.eup %5614  ;;  %5620 = vrcp.f32 %v3332_v44 }
 0x404   : > { %v3300_v32 = vpop.xlane.xlu1 %3299  ;;  %v3494_v35 = vmul.f32 %v5615_v16, %v8614_v20  ;;  %v8894_v31 = vpop.eup %5616 }
 0x405   : > { %v3302_v0 = vpop.xlane.xlu0 %3301  ;;  %5622 = vrcp.f32 %v3300_v32 }
 0x406   : > { %3559 = vmatmul.f32.gmra.mxu0 %v3471_v27  ;;  %3679 = vmatmul.f32.gmra.mxu3 %v3494_v35  ;;  %5624 = vrcp.f32 %v3302_v0 }
 0x407   : > { %3641 = vmatmul.f32.gmra.mxu2 %v3487_v59 }
 0x408   : > { %v5619_v1 = vpop.eup %5618 }
 0x409   : > { %v3334_v46 = vpop.xlane.xlu2 %3333  ;;  %3369 = vadd.xlane.f32.xlu1 %v8894_v31  ;;  %v5621_v39 = vpop.eup %5620  ;;  %v3472_v20 = vmul.f32 %v5619_v1, %v8627_v56 }
 0x40a   : > { %5626 = vrcp.f32 %v3334_v46  ;;  %v3495_v40 = vmul.f32 %v5621_v39, %v8616_v53 }
 0x40b   : > { %v5623_v54 = vpop.eup %5622 }
 0x40c   : > { %v3318_v25 = vpop.xlane.xlu1 %3317  ;;  %v3479_v47 = vmul.f32 %v5623_v54, %v8634_v9  ;;  %v5625_v63 = vpop.eup %5624  ;;  %v10195_v54 = vld [vmem:[#allocation26_spill] sm:$0xff] }
 0x40d   : > { %v3320_v22 = vpop.xlane.xlu0 %3319  ;;  %5628 = vrcp.f32 %v3318_v25  ;;  %v3480_v52 = vmul.f32 %v5625_v63, %v8636_v48  ;;  %v10196_v25 = vld [vmem:[#allocation27_spill] sm:$0xff] }
 0x40e   : > { %3562 = vmatmul.f32.gmra.mxu0 %v3472_v20  ;;  %3600 = vmatmul.f32.gmra.mxu1 %v3479_v47 }
 0x40f   : > { %3682 = vmatmul.f32.gmra.mxu3 %v3495_v40 }
 0x410   : > { %v5627_v3 = vpop.eup %5626 }
 0x411   : > { %v3304_v24 = vpop.xlane.xlu2 %3303  ;;  %v3496_v9 = vmul.f32 %v5627_v3, %v8646_v2 }
 0x412   : > { %5630 = vrcp.f32 %v3304_v24  ;;  %v10197_v24 = vld [vmem:[#allocation28_spill] sm:$0xff] }
 0x413   : > { %v5629_v5 = vpop.eup %5628  ;;  %5632 = vrcp.f32 %v3320_v22 }
 0x414   : > { %v3288_v12 = vpop.xlane.xlu1 %3287  ;;  %v3488_v56 = vmul.f32 %v5629_v5, %v8653_v60  ;;  %v10198_v5 = vld [vmem:[#allocation36_spill] sm:$0xff] }
 0x415   : > { %v3290_v55 = vpop.xlane.xlu0 %3289  ;;  %5634 = vrcp.f32 %v3288_v12 }
 0x416   : > { %3603 = vmatmul.f32.gmra.mxu1 %v3480_v52  ;;  %3644 = vmatmul.f32.gmra.mxu2 %v3488_v56  ;;  %5636 = vrcp.f32 %v3290_v55  ;;  %v10199_v52 = vld [vmem:[#allocation35_spill] sm:$0xff] }
 0x417   : > { %3685 = vmatmul.f32.gmra.mxu3 %v3496_v9 }
 0x418   : > { %v5631_v53 = vpop.eup %5630 }
 0x419   : > { %v3322_v33 = vpop.xlane.xlu2 %3321  ;;  %v5633_v11 = vpop.eup %5632  ;;  %v3481_v48 = vmul.f32 %v5631_v53, %v8667_v18  ;;  %v10194_v18 = vld [vmem:[#allocation25_spill] sm:$0xff] }
 0x41a   : > { %5638 = vrcp.f32 %v3322_v33  ;;  %v3489_v60 = vmul.f32 %v5633_v11, %v8655_v62  ;;  %v10200_v11 = vld [vmem:[#allocation38_spill] sm:$0xff] }
 0x41b   : > { %v5635_v44 = vpop.eup %5634 }
 0x41c   : > { %v3336_v26 = vpop.xlane.xlu1 %3335  ;;  %v3473_v29 = vmul.f32 %v5635_v44, %v8674_v58  ;;  %v5637_v2 = vpop.eup %5636 }
 0x41d   : > { %v3338_v21 = vpop.xlane.xlu0 %3337  ;;  %5640 = vrcp.f32 %v3336_v26  ;;  %v3474_v32 = vmul.f32 %v5637_v2, %v8676_v61  ;;  %v10202_v2 = vld [vmem:[#allocation47_spill] sm:$0xff] }
 0x41e   : > { %3565 = vmatmul.f32.gmra.mxu0 %v3473_v29  ;;  %3606 = vmatmul.f32.gmra.mxu1 %v3481_v48  ;;  %5642 = vrcp.f32 %v3338_v21  ;;  %v10201_v21 = vld [vmem:[#allocation37_spill] sm:$0xff] }
 0x41f   : > { %3647 = vmatmul.f32.gmra.mxu2 %v3489_v60 }
 0x420   : > { %v5639_v6 = vpop.eup %5638 }
 0x421   : > { %v3340_v15 = vpop.xlane.xlu2 %3339  ;;  %v3490_v35 = vmul.f32 %v5639_v6, %v10194_v18 }
 0x422   : > { %5644 = vrcp.f32 %v3340_v15 }
 0x423   : > { %v5641_v10 = vpop.eup %5640 }
 0x424   : > { %v3306_v16 = vpop.xlane.xlu1 %3305  ;;  %v3497_v58 = vmul.f32 %v5641_v10, %v8695_v43  ;;  %v5643_v62 = vpop.eup %5642  ;;  %v10203_v10 = vld [vmem:[#allocation48_spill] sm:$0xff] }
 0x425   : > { %v3356_v27 = vpop.xlane.xlu0 %3355  ;;  %5646 = vrcp.f32 %v3306_v16  ;;  %v3498_v61 = vmul.f32 %v5643_v62, %v10195_v54 }
 0x426   : > { %3568 = vmatmul.f32.gmra.mxu0 %v3474_v32  ;;  %3688 = vmatmul.f32.gmra.mxu3 %v3497_v58  ;;  %5648 = vrcp.f32 %v3356_v27 }
 0x427   : > { %3650 = vmatmul.f32.gmra.mxu2 %v3490_v35 }
 0x428   : > { %v5645_v59 = vpop.eup %5644 }
 0x429   : > { %v3388_v0 = vpop.xlane.xlu2 %3387  ;;  %v3499_v43 = vmul.f32 %v5645_v59, %v10196_v25  ;;  %v10205_v25 = vld [vmem:[#allocation49_spill] sm:$0xff] }
 0x42a   : > { %5650 = vrcp.f32 %v3388_v0  ;;  %v10204_v0 = vld [vmem:[#allocation50_spill] sm:$0xff] }
 0x42b   : > { %v5647_v1 = vpop.eup %5646 }
 0x42c   : > { %v3372_v46 = vpop.xlane.xlu1 %3371  ;;  %v3482_v39 = vmul.f32 %v5647_v1, %v8713_v51  ;;  %v5649_v47 = vpop.eup %5648 }
 0x42d   : > { %v3358_v20 = vpop.xlane.xlu0 %3357  ;;  %5652 = vrcp.f32 %v3372_v46  ;;  %v3507_v3 = vmul.f32 %v5649_v47, %v10197_v24 }
 0x42e   : > { %3609 = vmatmul.f32.gmra.mxu1 %v3482_v39  ;;  %3691 = vmatmul.f32.gmra.mxu3 %v3498_v61 }
 0x42f   : > { %3711 = vmatmul.f32.vlgmr.msrb.gmra.mxu0 %v3499_v43 }
 0x430   : > { %v5651_v40 = vpop.eup %5650 }
 0x431   : > { %v3342_v22 = vpop.xlane.xlu2 %3341  ;;  %v3523_v56 = vmul.f32 %v5651_v40, %v10199_v52 }
 0x432   : > { %5654 = vrcp.f32 %v3342_v22 }
 0x433   : > { %v5653_v63 = vpop.eup %5652  ;;  %5656 = vrcp.f32 %v3358_v20 }
 0x434   : > { %v3515_v12 = vmul.f32 %v5653_v63, %v10198_v5  ;;  %v3390_v51 = vpop.xlane.xlu1 %3389  ;;  %v10206_v5 = vld [vmem:[#allocation57_spill] sm:$0xff] }
 0x435   : > { %v3374_v55 = vpop.xlane.xlu0 %3373  ;;  %5658 = vrcp.f32 %v3390_v51 }
 0x436   : > { %5660 = vrcp.f32 %v3374_v55  ;;  %3752 = vmatmul.f32.vlgmr.msrb.gmra.mxu1 %v3507_v3  ;;  %3793 = vmatmul.f32.vlgmr.msrb.gmra.mxu2 %v3515_v12 }
 0x437   : > { %3834 = vmatmul.f32.vlgmr.msrb.gmra.mxu3 %v3523_v56 }
 0x438   : > { %v5655_v9 = vpop.eup %5654 }
 0x439   : > { %v5657_v53 = vpop.eup %5656  ;;  %v3362_v33 = vpop.xlane.xlu2 %3361  ;;  %v3500_v44 = vmul.f32 %v5655_v9, %v10200_v11 }
 0x43a   : > { %v3508_v60 = vmul.f32 %v5657_v53, %v10201_v21 }
 0x43b   : > { %v5659_v26 = vpop.eup %5658  ;;  %3714 = vmatmul.f32.gmra.mxu0 %v3500_v44 }
 0x43c   : > { %v5661_v29 = vpop.eup %5660  ;;  %v3360_v48 = vpop.xlane.xlu1 %3359  ;;  %v3524_v15 = vmul.f32 %v5659_v26, %v10202_v2 }
 0x43d   : > { %v3376_v6 = vpop.xlane.xlu0 %3375  ;;  %5662 = vrcp.f32 %v3360_v48  ;;  %v3516_v16 = vmul.f32 %v5661_v29, %v10203_v10 }
 0x43e   : > { %5664 = vrcp.f32 %v3376_v6  ;;  %3755 = vmatmul.f32.gmra.mxu1 %v3508_v60 }
 0x43f   : > { %3796 = vmatmul.f32.gmra.mxu2 %v3516_v16  ;;  %3837 = vmatmul.f32.gmra.mxu3 %v3524_v15  ;;  %5666 = vrcp.f32 %v3362_v33 }
 0x441   : > { %v3394_v32 = vpop.xlane.xlu2 %3393 }
 0x443   : > { %v5663_v58 = vpop.eup %5662 }
 0x444   : > { %v5665_v27 = vpop.eup %5664  ;;  %v3392_v18 = vpop.xlane.xlu1 %3391  ;;  %v3509_v35 = vmul.f32 %v5663_v58, %v8775_v49 }
 0x445   : > { %v3344_v62 = vpop.xlane.xlu0 %3343  ;;  %5668 = vrcp.f32 %v3392_v18  ;;  %v3517_v59 = vmul.f32 %v5665_v27, %v10204_v0  ;;  %v5667_v1 = vpop.eup %5666 }
 0x446   : > { %5670 = vrcp.f32 %v3344_v62  ;;  %3758 = vmatmul.f32.gmra.mxu1 %v3509_v35  ;;  %v3510_v43 = vmul.f32 %v5667_v1, %v10205_v25 }
 0x447   : > { %3799 = vmatmul.f32.gmra.mxu2 %v3517_v59  ;;  %5672 = vrcp.f32 %v3394_v32 }
 0x449   : > { %v3380_v46 = vpop.xlane.xlu2 %3379 }
 0x44b   : > { %v5669_v39 = vpop.eup %5668 }
 0x44c   : > { %v5671_v54 = vpop.eup %5670  ;;  %v3378_v61 = vpop.xlane.xlu1 %3377  ;;  %v3525_v20 = vmul.f32 %v5669_v39, %v8792_v41 }
 0x44d   : > { %v3396_v47 = vpop.xlane.xlu0 %3395  ;;  %5674 = vrcp.f32 %v3378_v61  ;;  %v3501_v49 = vmul.f32 %v5671_v54, %v8788_v50  ;;  %v5673_v22 = vpop.eup %5672 }
 0x44e   : > { %3761 = vmatmul.f32.gmra.mxu1 %v3510_v43  ;;  %3840 = vmatmul.f32.gmra.mxu3 %v3525_v20  ;;  %5676 = vrcp.f32 %v3380_v46  ;;  %v3526_v12 = vmul.f32 %v5673_v22, %v10206_v5 }
 0x44f   : > { %3717 = vmatmul.f32.gmra.mxu0 %v3501_v49  ;;  %5678 = vrcp.f32 %v3396_v47 }
 0x450   : > { %v8935_v10 = vpop.f32.mrf.mxu1 }
 0x451   : > { %v3348_v40 = vpop.xlane.xlu2 %3347 }
 0x453   : > { %v5675_v63 = vpop.eup %5674 }
 0x454   : > { %v3346_v24 = vpop.xlane.xlu1 %3345  ;;  %v3518_v3 = vmul.f32 %v5675_v63, %v8807_v8  ;;  %v5677_v41 = vpop.eup %5676 }
 0x455   : > { %v3382_v51 = vpop.xlane.xlu0 %3381  ;;  %5680 = vrcp.f32 %v3346_v24  ;;  %v5679_v52 = vpop.eup %5678  ;;  %v3519_v53 = vmul.f32 %v5677_v41, %v8803_v28 }
 0x456   : > { %3802 = vmatmul.f32.gmra.mxu2 %v3518_v3  ;;  %3843 = vmatmul.f32.gmra.mxu3 %v3526_v12  ;;  %5682 = vrcp.f32 %v3348_v40  ;;  %v3527_v8 = vmul.f32 %v5679_v52, %v8810_v57 }
 0x457   : > { %5684 = vrcp.f32 %v3382_v51 }
 0x459   : > { %v3400_v56 = vpop.xlane.xlu2 %3399 }
 0x45a   : > { %v8946_v46 = vpop.f32.mrf.mxu3 }
 0x45b   : > { %v5681_v50 = vpop.eup %5680 }
 0x45c   : > { %v3398_v55 = vpop.xlane.xlu1 %3397  ;;  %v3502_v9 = vmul.f32 %v5681_v50, %v8822_v42  ;;  %v5683_v11 = vpop.eup %5682 }
 0x45d   : > { %v3364_v33 = vpop.xlane.xlu0 %3363  ;;  %5686 = vrcp.f32 %v3398_v55  ;;  %v5685_v44 = vpop.eup %5684  ;;  %v3503_v42 = vmul.f32 %v5683_v11, %v8819_v45  ;;  %v8979_v11 = vld [vmem:[%s9499_s5 + $0x30] sm:$0xff] }
 0x45e   : > { %5688 = vrcp.f32 %v3364_v33  ;;  %3720 = vmatmul.f32.gmra.mxu0 %v3502_v9  ;;  %3805 = vmatmul.f32.gmra.mxu2 %v3519_v53  ;;  %v3520_v28 = vmul.f32 %v5685_v44, %v8828_v7  ;;  %v8937_v32 = vpop.f32.mrf.mxu2 }
 0x45f   : > { %3846 = vmatmul.f32.gmra.mxu3 %v3527_v8  ;;  %5690 = vrcp.f32 %v3400_v56 }
 0x461   : > { %v3386_v15 = vpop.xlane.xlu2 %3385 }
 0x463   : > { %v5687_v26 = vpop.eup %5686  ;;  %v8929_v29 = vpop.f32.mrf.mxu0 }
 0x464   : > { %v5689_v48 = vpop.eup %5688  ;;  %v3384_v21 = vpop.xlane.xlu1 %3383  ;;  %v3528_v60 = vmul.f32 %v5687_v26, %v8840_v19 }
 0x465   : > { %v3350_v2 = vpop.xlane.xlu0 %3349  ;;  %5692 = vrcp.f32 %v3384_v21  ;;  %v3511_v57 = vmul.f32 %v5689_v48, %v8844_v38  ;;  %v5691_v6 = vpop.eup %5690  ;;  %v8985_v21 = vld [vmem:[%s9499_s5 + $0x28] sm:$0xff] }
 0x466   : > { %5694 = vrcp.f32 %v3350_v2  ;;  %3723 = vmatmul.f32.gmra.mxu0 %v3503_v42  ;;  %3808 = vmatmul.f32.gmra.mxu2 %v3520_v28  ;;  %v3529_v18 = vmul.f32 %v5691_v6, %v8836_v17  ;;  %v8950_v54 = vpop.f32.mrf.mxu2  ;;  %v8991_v28 = vld [vmem:[%s9499_s5 + $0x20] sm:$0xff]  ;;  %v8997_v2 = vld [vmem:[%s9499_s5 + $0x18] sm:$0xff] }
 0x467   : > { %3764 = vmatmul.f32.gmra.mxu1 %v3511_v57  ;;  %3849 = vmatmul.f32.gmra.mxu3 %v3528_v60  ;;  %5696 = vrcp.f32 %v3386_v15 }
 0x469   : > { %v3368_v35 = vpop.xlane.xlu2 %3367 }
 0x46a   : > { %v8955_v47 = vpop.f32.mrf.mxu3 }
 0x46b   : > { %v5693_v16 = vpop.eup %5692  ;;  %v8939_v45 = vpop.f32.mrf.mxu0 }
 0x46c   : > { %v5695_v7 = vpop.eup %5694  ;;  %v3366_v19 = vpop.xlane.xlu1 %3365  ;;  %v3521_v58 = vmul.f32 %v5693_v16, %v8859_v4  ;;  %v9003_v16 = vld [vmem:[%s9499_s5 + $0x10] sm:$0xff] }
 0x46d   : > { %v3402_v38 = vpop.xlane.xlu0 %3401  ;;  %5698 = vrcp.f32 %v3366_v19  ;;  %v3504_v27 = vmul.f32 %v5695_v7, %v8856_v34  ;;  %v5697_v62 = vpop.eup %5696 }
 0x46e   : > { %5700 = vrcp.f32 %v3402_v38  ;;  %3811 = vmatmul.f32.gmra.mxu2 %v3521_v58  ;;  %v8944_v59 = vpop.f32.mrf.mxu1  ;;  %v3522_v34 = vmul.f32 %v5697_v62, %v8854_v37  ;;  %v9015_v62 = vld [vmem:[%s9499_s5 + $0x8] sm:$0xff] }
 0x46f   : > { %3726 = vmatmul.f32.gmra.mxu0 %v3504_v27  ;;  %3852 = vmatmul.f32.gmra.mxu3 %v3529_v18  ;;  %5702 = vrcp.f32 %v3368_v35 }
 0x473   : > { %v5699_v0 = vpop.eup %5698  ;;  %v8952_v17 = vpop.f32.mrf.mxu0 }
 0x474   : > { %v5701_v1 = vpop.eup %5700  ;;  %v3352_v4 = vpop.xlane.xlu1 %3351  ;;  %v3512_v39 = vmul.f32 %v5699_v0, %v8874_v14  ;;  %v3869_v18 = vmul.f32 %v9003_v16, %v8952_v17 }
 0x475   : > { %5704 = vrcp.f32 %v3352_v4  ;;  %v3530_v61 = vmul.f32 %v5701_v1, %v8876_v23  ;;  %v3354_v25 = vpop.xlane.xlu0 %3353  ;;  %v5703_v43 = vpop.eup %5702  ;;  %v3868_v1 = vmul.f32 %v9015_v62, %v8939_v45 }
 0x476   : > { %3767 = vmatmul.f32.gmra.mxu1 %v3512_v39  ;;  %3814 = vmatmul.f32.gmra.mxu2 %v3522_v34  ;;  %5706 = vrcp.f32 %v3354_v25  ;;  %v3513_v37 = vmul.f32 %v5703_v43, %v8870_v13  ;;  %v8959_v22 = vpop.f32.mrf.mxu1  ;;  %v8965_v12 = vpop.f32.mrf.mxu3  ;;  %v9024_v39 = vld [vmem:[%s9499_s5] sm:$0xff] }
 0x477   : > { %3855 = vmatmul.f32.gmra.mxu3 %v3530_v61  ;;  %v3867_v61 = vmul.f32 %v9024_v39, %v8929_v29  ;;  %v3877_v29 = vmul.f32 %v9003_v16, %v8959_v22  ;;  %v3875_v22 = vmul.f32 %v9024_v39, %v8935_v10  ;;  %v3891_v10 = vmul.f32 %v9024_v39, %v8946_v46 }
 0x47a   : > { %v8961_v40 = vpop.f32.mrf.mxu2 }
 0x47b   : > { %v5705_v20 = vpop.eup %5704  ;;  %v3557_v23 = vpop.f32.mrf.mxu0 }
 0x47c   : > { %v3370_v49 = vpop.xlane.xlu1 %3369  ;;  %v3505_v14 = vmul.f32 %v5705_v20, %v8885_v36  ;;  %v5707_v63 = vpop.eup %5706  ;;  %v3870_v58 = vmul.f32 %v8997_v2, %v3557_v23 }
 0x47d   : > { %5708 = vrcp.f32 %v3370_v49  ;;  %v3506_v3 = vmul.f32 %v5707_v63, %v8887_v30  ;;  %v3885_v49 = vmul.f32 %v9003_v16, %v8961_v40  ;;  %v3876_v63 = vmul.f32 %v9015_v62, %v8944_v59 }
 0x47e   : > { %3729 = vmatmul.f32.gmra.mxu0 %v3505_v14  ;;  %3770 = vmatmul.f32.gmra.mxu1 %v3513_v37  ;;  %v3598_v36 = vpop.f32.mrf.mxu1  ;;  %v3884_v37 = vmul.f32 %v9015_v62, %v8950_v54  ;;  %v3883_v40 = vmul.f32 %v9024_v39, %v8937_v32  ;;  %v3893_v59 = vmul.f32 %v9003_v16, %v8965_v12 }
 0x47f   : > { %v3878_v20 = vmul.f32 %v8997_v2, %v3598_v36  ;;  %v3892_v32 = vmul.f32 %v9015_v62, %v8955_v47 }
 0x482   : > { %v3639_v13 = vpop.f32.mrf.mxu2 }
 0x483   : > { %v5709_v24 = vpop.eup %5708  ;;  %v3560_v51 = vpop.f32.mrf.mxu0  ;;  %v3886_v43 = vmul.f32 %v8997_v2, %v3639_v13 }
 0x484   : > { %v3514_v5 = vmul.f32 %v5709_v24, %v8894_v31  ;;  %v8974_v31 = vld [vmem:[%s9499_s5 + $0x38] sm:$0xff]  ;;  %v3871_v15 = vmul.f32 %v8991_v28, %v3560_v51 }
 0x486   : > { %3732 = vmatmul.f32.gmra.mxu0 %v3506_v3  ;;  %3773 = vmatmul.f32.gmra.mxu1 %v3514_v5 }
 0x489   : > { %v8967_v41 = vpop.f32.mrf.mxu3 }
 0x48a   : > { %v3642_v50 = vpop.f32.mrf.mxu2  ;;  %v3894_v54 = vmul.f32 %v8997_v2, %v8967_v41 }
 0x48b   : > { %v3601_v52 = vpop.f32.mrf.mxu1  ;;  %v3563_v56 = vpop.f32.mrf.mxu0  ;;  %v3887_v34 = vmul.f32 %v8991_v28, %v3642_v50 }
 0x48c   : > { %v3872_v60 = vmul.f32 %v8985_v21, %v3563_v56  ;;  %v3879_v25 = vmul.f32 %v8991_v28, %v3601_v52 }
 0x492   : > { %v8969_v55 = vpop.f32.mrf.mxu3 }
 0x493   : > { %v3604_v9 = vpop.f32.mrf.mxu1  ;;  %v3895_v24 = vmul.f32 %v8991_v28, %v8969_v55 }
 0x494   : > { %v3880_v4 = vmul.f32 %v8985_v21, %v3604_v9 }
 0x499   : > { %v3645_v53 = vpop.f32.mrf.mxu2 }
 0x49a   : > { %v3686_v30 = vpop.f32.mrf.mxu3  ;;  %v3888_v0 = vmul.f32 %v8985_v21, %v3645_v53 }
 0x49b   : > { %v3566_v33 = vpop.f32.mrf.mxu0  ;;  %v3607_v44 = vpop.f32.mrf.mxu1  ;;  %v3896_v23 = vmul.f32 %v8985_v21, %v3686_v30 }
 0x49c   : > { %v3873_v42 = vmul.f32 %v8979_v11, %v3566_v33  ;;  %v3881_v35 = vmul.f32 %v8979_v11, %v3607_v44  ;;  %v9080_v44 = vld [vmem:[%s9500_s6] sm:$0xff] }
 0x4a2   : > { %v3648_v8 = vpop.f32.mrf.mxu2 }
 0x4a3   : > { %v3569_v26 = vpop.f32.mrf.mxu0  ;;  %v3889_v27 = vmul.f32 %v8979_v11, %v3648_v8 }
 0x4a4   : > { %v3874_v48 = vmul.f32 %v8974_v31, %v3569_v26 }
 0x4a6   : > { %3942 = vmatpush.msra.mxu0 %v3874_v48 }
 0x4a8   : > { %3943 = vmatpush.msra.mxu0 %v3873_v42 }
 0x4a9   : > { %v3689_v57 = vpop.f32.mrf.mxu3 }
 0x4aa   : > { %v3651_v6 = vpop.f32.mrf.mxu2  ;;  %3944 = vmatpush.msra.mxu0 %v3872_v60  ;;  %v3897_v14 = vmul.f32 %v8979_v11, %v3689_v57 }
 0x4ab   : > { %v3890_v7 = vmul.f32 %v8974_v31, %v3651_v6  ;;  %v3610_v19 = vpop.f32.mrf.mxu1 }
 0x4ac   : > { %v3882_v38 = vmul.f32 %v8974_v31, %v3610_v19  ;;  %3945 = vmatpush.msra.mxu0 %v3871_v15  ;;  %v9063_v13 = vpop.f32.mrf.mxu0 }
 0x4ad   : > { %3982 = vmatpush.msra.mxu2 %v3890_v7 }
 0x4ae   : > { %3946 = vmatpush.msra.mxu0 %v3870_v58  ;;  %3962 = vmatpush.msra.mxu1 %v3882_v38 }
 0x4af   : > { %3983 = vmatpush.msra.mxu2 %v3889_v27 }
 0x4b0   : > { %3947 = vmatpush.msra.mxu0 %v3869_v18  ;;  %3963 = vmatpush.msra.mxu1 %v3881_v35 }
 0x4b1   : > { %3984 = vmatpush.msra.mxu2 %v3888_v0  ;;  %v3692_v17 = vpop.f32.mrf.mxu3 }
 0x4b2   : > { %v3898_v45 = vmul.f32 %v8974_v31, %v3692_v17  ;;  %3948 = vmatpush.msra.mxu0 %v3868_v1  ;;  %3964 = vmatpush.msra.mxu1 %v3880_v4 }
 0x4b3   : > { %3985 = vmatpush.msra.mxu2 %v3887_v34  ;;  %v9061_v36 = vpop.f32.mrf.mxu1 }
 0x4b4   : > { %3949 = vmatpush.msra.mxu0 %v3867_v61  ;;  %3965 = vmatpush.msra.mxu1 %v3879_v25 }
 0x4b5   : > { %3986 = vmatpush.msra.mxu2 %v3886_v43  ;;  %4002 = vmatpush.msra.mxu3 %v3898_v45 }
 0x4b6   : > { %3966 = vmatpush.msra.mxu1 %v3878_v20  ;;  %5070 = vmatmul.msk.f32.vlgmr.msra.gmra.mxu0 %vm690_vm0, %v9080_v44 }
 0x4b7   : > { %3987 = vmatpush.msra.mxu2 %v3885_v49  ;;  %4003 = vmatpush.msra.mxu3 %v3897_v14 }
 0x4b8   : > { %3967 = vmatpush.msra.mxu1 %v3877_v29  ;;  %v9067_v52 = vpop.f32.mrf.mxu0 }
 0x4b9   : > { %3988 = vmatpush.msra.mxu2 %v3884_v37  ;;  %4004 = vmatpush.msra.mxu3 %v3896_v23  ;;  %v9053_v3 = vpop.f32.mrf.mxu2 }
 0x4ba   : > { %3968 = vmatpush.msra.mxu1 %v3876_v63  ;;  %v9057_v5 = vpop.f32.mrf.mxu3 }
 0x4bb   : > { %3989 = vmatpush.msra.mxu2 %v3883_v40  ;;  %4005 = vmatpush.msra.mxu3 %v3895_v24  ;;  %v9065_v41 = vpop.f32.mrf.mxu1 }
 0x4bc   : > { %3969 = vmatpush.msra.mxu1 %v3875_v22  ;;  %5072 = vmatmul.msk.f32.vlgmr.msra.gmra.mxu2 %vm690_vm0, %v9080_v44 }
 0x4bd   : > { %4006 = vmatpush.msra.mxu3 %v3894_v54  ;;  %5071 = vmatmul.msk.f32.vlgmr.msra.gmra.mxu1 %vm690_vm0, %v9080_v44  ;;  %v3915_v54 = vmul.f32 %v9024_v39, %v9053_v3  ;;  %v4210_v3 = vld [vmem:[%s9501_s7 + $0xb8] sm:$0xff] }
 0x4bf   : > { %4007 = vmatpush.msra.mxu3 %v3893_v59 }
 0x4c1   : > { %4008 = vmatpush.msra.mxu3 %v3892_v32 }
 0x4c2   : > { %v3797_v51 = vpop.f32.mrf.mxu2  ;;  %v3838_v12 = vpop.f32.mrf.mxu3 }
 0x4c3   : > { %4009 = vmatpush.msra.mxu3 %v3891_v10  ;;  %v9071_v55 = vpop.f32.mrf.mxu1  ;;  %v3916_v40 = vmul.f32 %v9015_v62, %v3797_v51  ;;  %v3924_v24 = vmul.f32 %v9015_v62, %v3838_v12  ;;  %v4209_v51 = vld [vmem:[%s9501_s7 + $0xb0] sm:$0xff] }
 0x4c4   : > { %5073 = vmatmul.msk.f32.vlgmr.msra.gmra.mxu3 %vm690_vm0, %v9080_v44  ;;  %v4254_v12 = vld [vmem:[%s9501_s7 + $0xf0] sm:$0xff] }
 0x4ca   : > { %v3800_v50 = vpop.f32.mrf.mxu2 }
 0x4cb   : > { %v9075_v8 = vpop.f32.mrf.mxu1  ;;  %v3917_v29 = vmul.f32 %v9003_v16, %v3800_v50  ;;  %v3900_v50 = vmul.f32 %v9015_v62, %v9067_v52  ;;  %v3907_v52 = vmul.f32 %v9024_v39, %v9061_v36  ;;  %v4164_v36 = vld [vmem:[%s9501_s7 + $0x70] sm:$0xff] }
 0x4cc   : > { %v9069_v56 = vpop.f32.mrf.mxu0 }
 0x4d1   : > { %v3841_v47 = vpop.f32.mrf.mxu3 }
 0x4d2   : > { %v3925_v37 = vmul.f32 %v9003_v16, %v3841_v47  ;;  %v3908_v47 = vmul.f32 %v9015_v62, %v9065_v41  ;;  %v4105_v62 = vld [vmem:[%s9501_s7 + $0x38] sm:$0xff] }
 0x4d3   : > { %v4165_v41 = vld [vmem:[%s9501_s7 + $0x78] sm:$0xff] }
 0x4d9   : > { %v3803_v9 = vpop.f32.mrf.mxu2  ;;  %v3844_v46 = vpop.f32.mrf.mxu3 }
 0x4da   : > { %v3918_v25 = vmul.f32 %v8997_v2, %v3803_v9  ;;  %v3926_v45 = vmul.f32 %v8997_v2, %v3844_v46  ;;  %v4163_v9 = vld [vmem:[%s9501_s7 + $0x68] sm:$0xff]  ;;  %v4102_v46 = vld [vmem:[%s9501_s7 + $0x20] sm:$0xff] }
 0x4db   : > { %v9073_v53 = vpop.f32.mrf.mxu0 }
 0x4dc   : > { %v3902_v10 = vmul.f32 %v8997_v2, %v9073_v53  ;;  %v4162_v53 = vld [vmem:[%s9501_s7 + $0x60] sm:$0xff] }
 0x4e1   : > { %v3806_v33 = vpop.f32.mrf.mxu2 }
 0x4e2   : > { %v3847_v30 = vpop.f32.mrf.mxu3  ;;  %v3919_v17 = vmul.f32 %v8991_v28, %v3806_v33  ;;  %v4207_v33 = vld [vmem:[%s9501_s7 + $0xa0] sm:$0xff] }
 0x4e3   : > { %v3724_v26 = vpop.f32.mrf.mxu0  ;;  %v3927_v61 = vmul.f32 %v8991_v28, %v3847_v30  ;;  %v4252_v30 = vld [vmem:[%s9501_s7 + $0xe0] sm:$0xff] }
 0x4e4   : > { %v3765_v60 = vpop.f32.mrf.mxu1  ;;  %v3903_v59 = vmul.f32 %v8991_v28, %v3724_v26  ;;  %v4206_v26 = vld [vmem:[%s9501_s7 + $0x98] sm:$0xff] }
 0x4e5   : > { %v3911_v32 = vmul.f32 %v8991_v28, %v3765_v60  ;;  %v4255_v28 = vld [vmem:[%s9501_s7 + $0xf8] sm:$0xff]  ;;  %v4160_v60 = vld [vmem:[%s9501_s7 + $0x50] sm:$0xff] }
 0x4e9   : > { %v3809_v48 = vpop.f32.mrf.mxu2 }
 0x4ea   : > { %v3850_v42 = vpop.f32.mrf.mxu3  ;;  %v3920_v4 = vmul.f32 %v8985_v21, %v3809_v48  ;;  %v4251_v48 = vld [vmem:[%s9501_s7 + $0xd8] sm:$0xff] }
 0x4eb   : > { %v3928_v34 = vmul.f32 %v8985_v21, %v3850_v42  ;;  %v4100_v42 = vld [vmem:[%s9501_s7 + $0x10] sm:$0xff] }
 0x4ec   : > { %v3727_v6 = vpop.f32.mrf.mxu0 }
 0x4f1   : > { %v3812_v57 = vpop.f32.mrf.mxu2 }
 0x4f2   : > { %v3853_v15 = vpop.f32.mrf.mxu3  ;;  %v3921_v0 = vmul.f32 %v8979_v11, %v3812_v57  ;;  %v4205_v57 = vld [vmem:[%s9501_s7 + $0x90] sm:$0xff] }
 0x4f3   : > { %v3768_v7 = vpop.f32.mrf.mxu1  ;;  %v3929_v1 = vmul.f32 %v8979_v11, %v3853_v15  ;;  %v4250_v15 = vld [vmem:[%s9501_s7 + $0xd0] sm:$0xff] }
 0x4f4   : > { %v3912_v22 = vmul.f32 %v8985_v21, %v3768_v7  ;;  %v4159_v7 = vld [vmem:[%s9501_s7 + $0x48] sm:$0xff] }
 0x4f9   : > { %v3815_v19 = vpop.f32.mrf.mxu2 }
 0x4fa   : > { %v3922_v58 = vmul.f32 %v8974_v31, %v3815_v19  ;;  %v3856_v38 = vpop.f32.mrf.mxu3  ;;  %v4204_v19 = vld [vmem:[%s9501_s7 + $0x88] sm:$0xff] }
 0x4fb   : > { %v3930_v27 = vmul.f32 %v8974_v31, %v3856_v38  ;;  %v3730_v18 = vpop.f32.mrf.mxu0  ;;  %v3771_v35 = vpop.f32.mrf.mxu1  ;;  %v4098_v38 = vld [vmem:[%s9501_s7] sm:$0xff] }
 0x4fc   : > { %4062 = vmatpush.msrb.mxu2 %v3922_v58  ;;  %v3905_v23 = vmul.f32 %v8979_v11, %v3730_v18  ;;  %v3913_v63 = vmul.f32 %v8979_v11, %v3771_v35  ;;  %v3923_v11 = vmul.f32 %v9024_v39, %v9057_v5  ;;  %v3909_v5 = vmul.f32 %v9003_v16, %v9071_v55  ;;  %v4249_v58 = vld [vmem:[%s9501_s7 + $0xc8] sm:$0xff]  ;;  %v4203_v18 = vld [vmem:[%s9501_s7 + $0x80] sm:$0xff] }
 0x4fd   : > { %4082 = vmatpush.msrb.mxu3 %v3930_v27  ;;  %v3899_v55 = vmul.f32 %v9024_v39, %v9063_v13  ;;  %v4104_v39 = vld [vmem:[%s9501_s7 + $0x30] sm:$0xff]  ;;  %v4103_v13 = vld [vmem:[%s9501_s7 + $0x28] sm:$0xff]  ;;  %v4158_v27 = vld [vmem:[%s9501_s7 + $0x40] sm:$0xff] }
 0x4fe   : > { %4063 = vmatpush.msrb.mxu2 %v3921_v0  ;;  %v4248_v35 = vld [vmem:[%s9501_s7 + $0xc0] sm:$0xff]  ;;  %v4300_v0 = vld [vmem:[%s9501_s7 + $0x138] sm:$0xff] }
 0x4ff   : > { %4083 = vmatpush.msrb.mxu3 %v3929_v1  ;;  %v4345_v1 = vld [vmem:[%s9501_s7 + $0x178] sm:$0xff] }
 0x500   : > { %4064 = vmatpush.msrb.mxu2 %v3920_v4  ;;  %v4390_v4 = vld [vmem:[%s9501_s7 + $0x1b8] sm:$0xff] }
 0x501   : > { %4084 = vmatpush.msrb.mxu3 %v3928_v34  ;;  %v4435_v34 = vld [vmem:[%s9501_s7 + $0x1f8] sm:$0xff] }
 0x502   : > { %4065 = vmatpush.msrb.mxu2 %v3919_v17  ;;  %v4299_v17 = vld [vmem:[%s9501_s7 + $0x130] sm:$0xff] }
 0x503   : > { %4085 = vmatpush.msrb.mxu3 %v3927_v61  ;;  %v3733_v43 = vpop.f32.mrf.mxu0  ;;  %v3774_v20 = vpop.f32.mrf.mxu1  ;;  %v4344_v61 = vld [vmem:[%s9501_s7 + $0x170] sm:$0xff] }
 0x504   : > { %v3906_v49 = vmul.f32 %v8974_v31, %v3733_v43  ;;  %v3914_v14 = vmul.f32 %v8974_v31, %v3774_v20  ;;  %4066 = vmatpush.msrb.mxu2 %v3918_v25  ;;  %v3904_v31 = vmul.f32 %v8985_v21, %v3727_v6  ;;  %v3910_v21 = vmul.f32 %v8997_v2, %v9075_v8  ;;  %v4101_v8 = vld [vmem:[%s9501_s7 + $0x18] sm:$0xff]  ;;  %v4099_v6 = vld [vmem:[%s9501_s7 + $0x8] sm:$0xff]  ;;  %v4389_v25 = vld [vmem:[%s9501_s7 + $0x1b0] sm:$0xff] }
 0x505   : > { %4086 = vmatpush.msrb.mxu3 %v3926_v45  ;;  %v3901_v2 = vmul.f32 %v9003_v16, %v9069_v56  ;;  %v4208_v16 = vld [vmem:[%s9501_s7 + $0xa8] sm:$0xff]  ;;  %v4434_v45 = vld [vmem:[%s9501_s7 + $0x1f0] sm:$0xff] }
 0x506   : > { %4022 = vmatpush.msrb.mxu0 %v3906_v49  ;;  %4042 = vmatpush.msrb.mxu1 %v3914_v14  ;;  %v4253_v56 = vld [vmem:[%s9501_s7 + $0xe8] sm:$0xff] }
 0x507   : > { %4067 = vmatpush.msrb.mxu2 %v3917_v29  ;;  %4087 = vmatpush.msrb.mxu3 %v3925_v37  ;;  %v4298_v43 = vld [vmem:[%s9501_s7 + $0x128] sm:$0xff]  ;;  %v4297_v29 = vld [vmem:[%s9501_s7 + $0x120] sm:$0xff] }
 0x508   : > { %4023 = vmatpush.msrb.mxu0 %v3905_v23  ;;  %4043 = vmatpush.msrb.mxu1 %v3913_v63  ;;  %v4343_v20 = vld [vmem:[%s9501_s7 + $0x168] sm:$0xff]  ;;  %v4342_v37 = vld [vmem:[%s9501_s7 + $0x160] sm:$0xff] }
 0x509   : > { %4068 = vmatpush.msrb.mxu2 %v3916_v40  ;;  %4088 = vmatpush.msrb.mxu3 %v3924_v24  ;;  %v4388_v49 = vld [vmem:[%s9501_s7 + $0x1a8] sm:$0xff]  ;;  %v4387_v23 = vld [vmem:[%s9501_s7 + $0x1a0] sm:$0xff]  ;;  %v4296_v40 = vld [vmem:[%s9501_s7 + $0x118] sm:$0xff] }
 0x50a   : > { %4024 = vmatpush.msrb.mxu0 %v3904_v31  ;;  %4044 = vmatpush.msrb.mxu1 %v3912_v22  ;;  %v4433_v14 = vld [vmem:[%s9501_s7 + $0x1e8] sm:$0xff]  ;;  %v4432_v63 = vld [vmem:[%s9501_s7 + $0x1e0] sm:$0xff]  ;;  %v4341_v24 = vld [vmem:[%s9501_s7 + $0x158] sm:$0xff] }
 0x50b   : > { %4069 = vmatpush.msrb.mxu2 %v3915_v54  ;;  %4089 = vmatpush.msrb.mxu3 %v3923_v11  ;;  %v4386_v31 = vld [vmem:[%s9501_s7 + $0x198] sm:$0xff]  ;;  %v4295_v54 = vld [vmem:[%s9501_s7 + $0x110] sm:$0xff] }
 0x50c   : > { %4025 = vmatpush.msrb.mxu0 %v3903_v59  ;;  %4045 = vmatpush.msrb.mxu1 %v3911_v32  ;;  %v4431_v22 = vld [vmem:[%s9501_s7 + $0x1d8] sm:$0xff]  ;;  %v4340_v11 = vld [vmem:[%s9501_s7 + $0x150] sm:$0xff] }
 0x50d   : > { %5076 = vmatmul.msk.f32.vlgmr.msrb.gmra.mxu2 %vm690_vm0, %v9080_v44  ;;  %5077 = vmatmul.msk.f32.vlgmr.msrb.gmra.mxu3 %vm690_vm0, %v9080_v44  ;;  %v4385_v59 = vld [vmem:[%s9501_s7 + $0x190] sm:$0xff] }
 0x50e   : > { %4026 = vmatpush.msrb.mxu0 %v3902_v10  ;;  %4046 = vmatpush.msrb.mxu1 %v3910_v21  ;;  %v4430_v32 = vld [vmem:[%s9501_s7 + $0x1d0] sm:$0xff]  ;;  %v4294_v21 = vld [vmem:[%s9501_s7 + $0x108] sm:$0xff] }
 0x50f   : > { %4235 = vmatpush.msra.mxu2 %v4210_v3  ;;  %4280 = vmatpush.msra.mxu3 %v4255_v28  ;;  %v4339_v10 = vld [vmem:[%s9501_s7 + $0x148] sm:$0xff] }
 0x510   : > { %4027 = vmatpush.msrb.mxu0 %v3901_v2  ;;  %4047 = vmatpush.msrb.mxu1 %v3909_v5  ;;  %v4384_v3 = vld [vmem:[%s9501_s7 + $0x188] sm:$0xff]  ;;  %v4293_v5 = vld [vmem:[%s9501_s7 + $0x100] sm:$0xff] }
 0x511   : > { %4236 = vmatpush.msra.mxu2 %v4209_v51  ;;  %4281 = vmatpush.msra.mxu3 %v4254_v12  ;;  %v4429_v28 = vld [vmem:[%s9501_s7 + $0x1c8] sm:$0xff]  ;;  %v4338_v2 = vld [vmem:[%s9501_s7 + $0x140] sm:$0xff] }
 0x512   : > { %4028 = vmatpush.msrb.mxu0 %v3900_v50  ;;  %4048 = vmatpush.msrb.mxu1 %v3908_v47  ;;  %v4383_v12 = vld [vmem:[%s9501_s7 + $0x180] sm:$0xff] }
 0x513   : > { %4237 = vmatpush.msra.mxu2 %v4208_v16  ;;  %4282 = vmatpush.msra.mxu3 %v4253_v56  ;;  %v4428_v50 = vld [vmem:[%s9501_s7 + $0x1c0] sm:$0xff] }
 0x514   : > { %4029 = vmatpush.msrb.mxu0 %v3899_v55  ;;  %4049 = vmatpush.msrb.mxu1 %v3907_v52 }
 0x515   : > { %5074 = vmatmul.msk.f32.vlgmr.msrb.gmra.mxu0 %vm690_vm0, %v9080_v44  ;;  %5075 = vmatmul.msk.f32.vlgmr.msrb.gmra.mxu1 %vm690_vm0, %v9080_v44  ;;  %v4161_v44 = vld [vmem:[%s9501_s7 + $0x58] sm:$0xff] }
 0x516   : > { %4145 = vmatpush.msra.mxu0 %v4105_v62  ;;  %4190 = vmatpush.msra.mxu1 %v4165_v41 }
 0x517   : > { %4238 = vmatpush.msra.mxu2 %v4207_v33  ;;  %4283 = vmatpush.msra.mxu3 %v4252_v30 }
 0x518   : > { %4146 = vmatpush.msra.mxu0 %v4104_v39  ;;  %4191 = vmatpush.msra.mxu1 %v4164_v36 }
 0x519   : > { %4239 = vmatpush.msra.mxu2 %v4206_v26  ;;  %4284 = vmatpush.msra.mxu3 %v4251_v48 }
 0x51a   : > { %4147 = vmatpush.msra.mxu0 %v4103_v13  ;;  %4192 = vmatpush.msra.mxu1 %v4163_v9 }
 0x51b   : > { %4240 = vmatpush.msra.mxu2 %v4205_v57  ;;  %4285 = vmatpush.msra.mxu3 %v4250_v15 }
 0x51c   : > { %4148 = vmatpush.msra.mxu0 %v4102_v46  ;;  %4193 = vmatpush.msra.mxu1 %v4162_v53 }
 0x51d   : > { %4241 = vmatpush.msra.mxu2 %v4204_v19  ;;  %4286 = vmatpush.msra.mxu3 %v4249_v58 }
 0x51e   : > { %4149 = vmatpush.msra.mxu0 %v4101_v8  ;;  %4194 = vmatpush.msra.mxu1 %v4161_v44 }
 0x51f   : > { %4242 = vmatpush.msra.mxu2 %v4203_v18  ;;  %4287 = vmatpush.msra.mxu3 %v4248_v35 }
 0x520   : > { %4150 = vmatpush.msra.mxu0 %v4100_v42  ;;  %4195 = vmatpush.msra.mxu1 %v4160_v60 }
 0x521   : > { %4415 = vmatpush.msrb.mxu2 %v4390_v4  ;;  %4460 = vmatpush.msrb.mxu3 %v4435_v34 }
 0x522   : > { %4151 = vmatpush.msra.mxu0 %v4099_v6  ;;  %4196 = vmatpush.msra.mxu1 %v4159_v7 }
 0x523   : > { %4416 = vmatpush.msrb.mxu2 %v4389_v25  ;;  %4461 = vmatpush.msrb.mxu3 %v4434_v45 }
 0x524   : > { %4152 = vmatpush.msra.mxu0 %v4098_v38  ;;  %4197 = vmatpush.msra.mxu1 %v4158_v27 }
 0x525   : > { %4417 = vmatpush.msrb.mxu2 %v4388_v49  ;;  %4462 = vmatpush.msrb.mxu3 %v4433_v14 }
 0x526   : > { %4325 = vmatpush.msrb.mxu0 %v4300_v0  ;;  %4370 = vmatpush.msrb.mxu1 %v4345_v1 }
 0x527   : > { %4418 = vmatpush.msrb.mxu2 %v4387_v23  ;;  %4463 = vmatpush.msrb.mxu3 %v4432_v63 }
 0x528   : > { %4326 = vmatpush.msrb.mxu0 %v4299_v17  ;;  %4371 = vmatpush.msrb.mxu1 %v4344_v61 }
 0x529   : > { %4419 = vmatpush.msrb.mxu2 %v4386_v31  ;;  %4464 = vmatpush.msrb.mxu3 %v4431_v22 }
 0x52a   : > { %4327 = vmatpush.msrb.mxu0 %v4298_v43  ;;  %4372 = vmatpush.msrb.mxu1 %v4343_v20 }
 0x52b   : > { %4420 = vmatpush.msrb.mxu2 %v4385_v59  ;;  %4465 = vmatpush.msrb.mxu3 %v4430_v32 }
 0x52c   : > { %4328 = vmatpush.msrb.mxu0 %v4297_v29  ;;  %4373 = vmatpush.msrb.mxu1 %v4342_v37 }
 0x52d   : > { %4421 = vmatpush.msrb.mxu2 %v4384_v3  ;;  %4466 = vmatpush.msrb.mxu3 %v4429_v28 }
 0x52e   : > { %4329 = vmatpush.msrb.mxu0 %v4296_v40  ;;  %4374 = vmatpush.msrb.mxu1 %v4341_v24 }
 0x52f   : > { %4422 = vmatpush.msrb.mxu2 %v4383_v12  ;;  %4467 = vmatpush.msrb.mxu3 %v4428_v50 }
 0x530   : > { %4330 = vmatpush.msrb.mxu0 %v4295_v54  ;;  %4375 = vmatpush.msrb.mxu1 %v4340_v11 }
 0x532   : > { %4331 = vmatpush.msrb.mxu0 %v4294_v21  ;;  %4376 = vmatpush.msrb.mxu1 %v4339_v10 }
 0x533   : > { %v3951_v47 = vpop.f32.mrf.mxu0 }
 0x534   : > { %4332 = vmatpush.msrb.mxu0 %v4293_v5  ;;  %4377 = vmatpush.msrb.mxu1 %v4338_v2  ;;  %v4166_v36 = vrot.slane %v3951_v47, 1  ;;  %v4211_v13 = vrot.slane %v3951_v47, 2  ;;  %v4256_v46 = vrot.slane %v3951_v47, 3  ;;  %v4301_v53 = vrot.slane %v3951_v47, 4 }
 0x535   : > { %v4346_v33 = vrot.slane %v3951_v47, 5  ;;  %v4391_v8 = vrot.slane %v3951_v47, 6  ;;  %v4436_v44 = vrot.slane %v3951_v47, 7 }
 0x53a   : > { %v3971_v51 = vpop.f32.mrf.mxu1 }
 0x53b   : > { %v4114_v16 = vrot.slane %v3971_v51, 7  ;;  %v4212_v56 = vrot.slane %v3971_v51, 1  ;;  %v4257_v55 = vrot.slane %v3971_v51, 2  ;;  %v4302_v52 = vrot.slane %v3971_v51, 3 }
 0x53c   : > { %v4347_v41 = vrot.slane %v3971_v51, 4  ;;  %v4392_v39 = vrot.slane %v3971_v51, 5  ;;  %v4437_v9 = vrot.slane %v3971_v51, 6  ;;  %v4167_v7 = vsel %vm4115_vm2, %v3971_v51, %v4166_v36 }
 0x53d   : > { %v4116_v30 = vsel %vm4115_vm2, %v4114_v16, %v3951_v47  ;;  %v4213_v19 = vsel %vm4115_vm2, %v4212_v56, %v4211_v13  ;;  %v4258_v38 = vsel %vm4115_vm2, %v4257_v55, %v4256_v46  ;;  %v4303_v27 = vsel %vm4115_vm2, %v4302_v52, %v4301_v53 }
 0x53e   : > { %v4348_v18 = vsel %vm4115_vm2, %v4347_v41, %v4346_v33  ;;  %v4393_v29 = vsel %vm4115_vm2, %v4392_v39, %v4391_v8  ;;  %v4438_v37 = vsel %vm4115_vm2, %v4437_v9, %v4436_v44 }
 0x53f   : > { %v3991_v62 = vpop.f32.mrf.mxu2 }
 0x540   : > { %v4117_v26 = vrot.slane %v3991_v62, 6  ;;  %v4168_v42 = vrot.slane %v3991_v62, 7  ;;  %v4259_v60 = vrot.slane %v3991_v62, 1  ;;  %v4304_v57 = vrot.slane %v3991_v62, 2 }
 0x541   : > { %v4349_v15 = vrot.slane %v3991_v62, 3  ;;  %v4394_v6 = vrot.slane %v3991_v62, 4  ;;  %v4214_v61 = vsel %vm4118_vm3, %v3991_v62, %v4213_v19  ;;  %v4439_v25 = vrot.slane %v3991_v62, 5 }
 0x542   : > { %v4119_v34 = vsel %vm4118_vm3, %v4117_v26, %v4116_v30  ;;  %v4169_v17 = vsel %vm4118_vm3, %v4168_v42, %v4167_v7  ;;  %v4260_v45 = vsel %vm4118_vm3, %v4259_v60, %v4258_v38  ;;  %v4305_v43 = vsel %vm4118_vm3, %v4304_v57, %v4303_v27 }
 0x543   : > { %v4350_v20 = vsel %vm4118_vm3, %v4349_v15, %v4348_v18  ;;  %v4395_v59 = vsel %vm4118_vm3, %v4394_v6, %v4393_v29  ;;  %v4440_v32 = vsel %vm4118_vm3, %v4439_v25, %v4438_v37 }
 0x547   : > { %v9333_v48 = vpop.f32.mrf.mxu3 }
 0x548   : > { %v4120_v58 = vrot.slane %v9333_v48, 5  ;;  %v4170_v35 = vrot.slane %v9333_v48, 6  ;;  %v4215_v0 = vrot.slane %v9333_v48, 7  ;;  %v4306_v1 = vrot.slane %v9333_v48, 1 }
 0x549   : > { %v4351_v4 = vrot.slane %v9333_v48, 2  ;;  %v4396_v49 = vrot.slane %v9333_v48, 3  ;;  %v4441_v14 = vrot.slane %v9333_v48, 4  ;;  %v4261_v24 = vsel %vm4121_vm4, %v9333_v48, %v4260_v45 }
 0x54a   : > { %v4122_v23 = vsel %vm4121_vm4, %v4120_v58, %v4119_v34  ;;  %v4171_v63 = vsel %vm4121_vm4, %v4170_v35, %v4169_v17  ;;  %v4216_v40 = vsel %vm4121_vm4, %v4215_v0, %v4214_v61  ;;  %v4307_v31 = vsel %vm4121_vm4, %v4306_v1, %v4305_v43 }
 0x54b   : > { %v4352_v22 = vsel %vm4121_vm4, %v4351_v4, %v4350_v20  ;;  %v4397_v1 = vsel %vm4121_vm4, %v4396_v49, %v4395_v59  ;;  %v4442_v4 = vsel %vm4121_vm4, %v4441_v14, %v4440_v32 }
 0x590   : > { %v9362_v54 = vpop.f32.mrf.mxu2  ;;  %v9364_v11 = vpop.f32.mrf.mxu3 }
 0x591   : > { %v4129_v21 = vrot.slane %v9362_v54, 2  ;;  %v4132_v10 = vrot.slane %v9364_v11, 1  ;;  %v4176_v3 = vrot.slane %v9362_v54, 3  ;;  %v4178_v28 = vrot.slane %v9364_v11, 2 }
 0x592   : > { %v4031_v5 = vpop.f32.mrf.mxu0  ;;  %v4051_v2 = vpop.f32.mrf.mxu1  ;;  %v4221_v51 = vrot.slane %v9362_v54, 4  ;;  %v4223_v12 = vrot.slane %v9364_v11, 3  ;;  %v4266_v50 = vrot.slane %v9362_v54, 5  ;;  %v4268_v47 = vrot.slane %v9364_v11, 4 }
 0x593   : > { %v4123_v16 = vrot.slane %v4031_v5, 4  ;;  %v4126_v56 = vrot.slane %v4051_v2, 3  ;;  %v4172_v55 = vrot.slane %v4031_v5, 5  ;;  %v4174_v52 = vrot.slane %v4051_v2, 4 }
 0x594   : > { %v4217_v62 = vrot.slane %v4031_v5, 6  ;;  %v4219_v41 = vrot.slane %v4051_v2, 5  ;;  %v4262_v39 = vrot.slane %v4031_v5, 7  ;;  %v4264_v36 = vrot.slane %v4051_v2, 6 }
 0x595   : > { %v4125_v13 = vsel %vm4124_vm5, %v4123_v16, %v4122_v23  ;;  %v4173_v9 = vsel %vm4124_vm5, %v4172_v55, %v4171_v63  ;;  %v4308_v46 = vsel %vm4124_vm5, %v4031_v5, %v4307_v31  ;;  %v4309_v53 = vrot.slane %v4051_v2, 7  ;;  %v4499_v55 = vld [vmem:[%s9503_s9 + $0x30] sm:$0xff] }
 0x596   : > { %v4128_v33 = vsel %vm4127_vm6, %v4126_v56, %v4125_v13  ;;  %v4175_v30 = vsel %vm4127_vm6, %v4174_v52, %v4173_v9  ;;  %v4218_v8 = vsel %vm4124_vm5, %v4217_v62, %v4216_v40  ;;  %v4263_v44 = vsel %vm4124_vm5, %v4262_v39, %v4261_v24  ;;  %v4497_v13 = vld [vmem:[%s9503_s9 + $0x20] sm:$0xff]  ;;  %v4496_v9 = vld [vmem:[%s9503_s9 + $0x18] sm:$0xff] }
 0x597   : > { %v4131_v26 = vsel %vm4130_vm7, %v4129_v21, %v4128_v33  ;;  %v4177_v42 = vsel %vm4130_vm7, %v4176_v3, %v4175_v30  ;;  %v4220_v60 = vsel %vm4127_vm6, %v4219_v41, %v4218_v8  ;;  %v4265_v57 = vsel %vm4127_vm6, %v4264_v36, %v4263_v44  ;;  %v4498_v41 = vld [vmem:[%s9503_s9 + $0x28] sm:$0xff]  ;;  %v4495_v33 = vld [vmem:[%s9503_s9 + $0x10] sm:$0xff]  ;;  %v4493_v44 = vld [vmem:[%s9503_s9] sm:$0xff] }
 0x598   : > { %v4134_v15 = vsel %vm4133_vm8, %v4132_v10, %v4131_v26  ;;  %v4179_v6 = vsel %vm4133_vm8, %v4178_v28, %v4177_v42  ;;  %v4222_v7 = vsel %vm4130_vm7, %v4221_v51, %v4220_v60  ;;  %v4267_v19 = vsel %vm4130_vm7, %v4266_v50, %v4265_v57  ;;  %v4494_v8 = vld [vmem:[%s9503_s9 + $0x8] sm:$0xff] }
 0x599   : > { %5078 = vmatmul.msk.f32.vlgmr.msra.gmra.mxu0 %vm690_vm0, %v4134_v15  ;;  %5079 = vmatmul.msk.f32.vlgmr.msra.gmra.mxu1 %vm690_vm0, %v4179_v6  ;;  %v4224_v58 = vsel %vm4133_vm8, %v4223_v12, %v4222_v7  ;;  %v4269_v38 = vsel %vm4133_vm8, %v4268_v47, %v4267_v19  ;;  %v4310_v27 = vsel %vm4127_vm6, %v4309_v53, %v4308_v46  ;;  %v4311_v18 = vrot.slane %v9362_v54, 6 }
 0x59a   : > { %5080 = vmatmul.msk.f32.vlgmr.msra.gmra.mxu2 %vm690_vm0, %v4224_v58  ;;  %5081 = vmatmul.msk.f32.vlgmr.msra.gmra.mxu3 %vm690_vm0, %v4269_v38  ;;  %v4353_v35 = vrot.slane %v4031_v5, 1  ;;  %v4356_v0 = vrot.slane %v9362_v54, 7  ;;  %v4313_v34 = vrot.slane %v9364_v11, 5  ;;  %v4358_v17 = vrot.slane %v9364_v11, 6 }
 0x59b   : > { %v4398_v61 = vrot.slane %v4031_v5, 2  ;;  %v4400_v25 = vrot.slane %v4051_v2, 1  ;;  %v4312_v45 = vsel %vm4130_vm7, %v4311_v18, %v4310_v27  ;;  %v4443_v20 = vrot.slane %v4031_v5, 3 }
 0x59c   : > { %v4354_v43 = vsel %vm4124_vm5, %v4353_v35, %v4352_v22  ;;  %v4445_v29 = vrot.slane %v4051_v2, 2  ;;  %v4403_v48 = vrot.slane %v9364_v11, 7  ;;  %v4447_v14 = vrot.slane %v9362_v54, 1 }
 0x59d   : > { %v4355_v37 = vsel %vm4127_vm6, %v4051_v2, %v4354_v43  ;;  %v4399_v49 = vsel %vm4124_vm5, %v4398_v61, %v4397_v1  ;;  %v4444_v40 = vsel %vm4124_vm5, %v4443_v20, %v4442_v4  ;;  %v4314_v22 = vsel %vm4133_vm8, %v4313_v34, %v4312_v45 }
 0x59e   : > { %v4357_v23 = vsel %vm4130_vm7, %v4356_v0, %v4355_v37  ;;  %v4401_v63 = vsel %vm4127_vm6, %v4400_v25, %v4399_v49  ;;  %v4446_v31 = vsel %vm4127_vm6, %v4445_v29, %v4444_v40  ;;  %v5453_v0 = vld [vmem:[%s9504_s10] ss:$0 sm:$0xff] }
 0x59f   : > { %v4402_v24 = vsel %vm4130_vm7, %v9362_v54, %v4401_v63  ;;  %v4359_v59 = vsel %vm4133_vm8, %v4358_v17, %v4357_v23  ;;  %v4448_v32 = vsel %vm4130_vm7, %v4447_v14, %v4446_v31  ;;  %v5452_v54 = vld [vmem:[%s9502_s8] ss:$0 sm:$0xff] }
 0x5a0   : > { %v4404_v21 = vsel %vm4133_vm8, %v4403_v48, %v4402_v24  ;;  %v4449_v10 = vsel %vm4133_vm8, %v9364_v11, %v4448_v32  ;;  %v4500_v11 = vld [vmem:[%s9503_s9 + $0x38] sm:$0xff] }
 0x5a1   : > { %5082 = vmatmul.msk.f32.vlgmr.msrb.gmra.mxu0 %vm690_vm0, %v4314_v22  ;;  %5083 = vmatmul.msk.f32.vlgmr.msrb.gmra.mxu1 %vm690_vm0, %v4359_v59 }
 0x5a2   : > { %5084 = vmatmul.msk.f32.vlgmr.msrb.gmra.mxu2 %vm690_vm0, %v4404_v21  ;;  %5085 = vmatmul.msk.f32.vlgmr.msrb.gmra.mxu3 %vm690_vm0, %v4449_v10 }
 0x5a3   : > { %4516 = vmatpush.msra.mxu0 %v4500_v11 }
 0x5a5   : > { %4517 = vmatpush.msra.mxu0 %v4499_v55 }
 0x5a7   : > { %4518 = vmatpush.msra.mxu0 %v4498_v41 }
 0x5a9   : > { %4519 = vmatpush.msra.mxu0 %v4497_v13 }
 0x5ab   : > { %4520 = vmatpush.msra.mxu0 %v4496_v9 }
 0x5ad   : > { %4521 = vmatpush.msra.mxu0 %v4495_v33 }
 0x5af   : > { %4522 = vmatpush.msra.mxu0 %v4494_v8 }
 0x5b1   : > { %4523 = vmatpush.msra.mxu0 %v4493_v44 }
 0x616   : > { %v4154_v3 = vpop.f32.mrf.mxu0  ;;  %v4199_v5 = vpop.f32.mrf.mxu1 }
 0x617   : > { %v4157_v28 = vadd.f32 %v5452_v54, %v4154_v3 }
 0x619   : > { %v4202_v2 = vadd.f32 %v4199_v5, %v4157_v28 }
 0x61d   : > { %v4244_v51 = vpop.f32.mrf.mxu2  ;;  %v4289_v12 = vpop.f32.mrf.mxu3 }
 0x61e   : > { %v4247_v50 = vadd.f32 %v4244_v51, %v4202_v2  ;;  %v4334_v16 = vpop.f32.mrf.mxu0  ;;  %v4379_v52 = vpop.f32.mrf.mxu1 }
 0x620   : > { %v4292_v47 = vadd.f32 %v4289_v12, %v4247_v50 }
 0x622   : > { %v4337_v56 = vadd.f32 %v4334_v16, %v4292_v47 }
 0x624   : > { %v4382_v62 = vadd.f32 %v4379_v52, %v4337_v56 }
 0x625   : > { %v4424_v39 = vpop.f32.mrf.mxu2  ;;  %v4469_v46 = vpop.f32.mrf.mxu3 }
 0x626   : > { %v4427_v36 = vadd.f32 %v4424_v39, %v4382_v62 }
 0x628   : > { %v4472_v53 = vadd.f32 %v4469_v46, %v4427_v36 }
 0x62a   : > { %v5086_v30 = vmul.f32 -1.442695, %v4472_v53 }
 0x62c   : > { %5710 = vpow2.f32 %v5086_v30 }
 0x632   : > { %v5711_v26 = vpop.eup %5710 }
 0x633   : > { %v4476_v42 = vadd.f32 1.0, %v5711_v26 }
 0x635   : > { %5712 = vrcp.f32 %v4476_v42  ;;  %v4488_v6 = vand.u32 2147483648, %v4476_v42  ;;  %v4486_v19 = vand.u32 2147483647, %v4476_v42  ;;  %vm4482_vm10 = vweird.f32 %v4476_v42 }
 0x637   : > { %v4489_v38 = vor.u32 1.1754944e-38, %v4488_v6  ;;  %vm4487_vm12 = vcmp.eq.f32.partialorder %v4486_v19, 8.507059e+37 }
 0x63b   : > { %v5713_v60 = vpop.eup %5712 }
 0x63c   : > { %v4478_v57 = vmul.f32 %v5713_v60, %v4476_v42  ;;  %vm4483_vm9 = vweird.f32 %v5713_v60 }
 0x63d   : > { %vm4484_vm11 = vmor %vm4482_vm10, %vm4483_vm9 }
 0x63e   : > { %v4479_v15 = vsub.f32 1.0, %v4478_v57 }
 0x640   : > { %v4480_v7 = vmul.f32 %v5713_v60, %v4479_v15 }
 0x642   : > { %v4481_v58 = vadd.f32 %v5713_v60, %v4480_v7 }
 0x644   : > { %v4485_v27 = vsel %vm4484_vm11, %v5713_v60, %v4481_v58 }
 0x645   : > { %v4490_v18 = vsel %vm4487_vm12, %v4489_v38, %v4485_v27 }
 0x646   : > { %v4492_v35 = vmul.f32 %v4490_v18, %v4472_v53 }
 0x648   : > { %5087 = vmatmul.msk.f32.vlgmr.msra.gmra.mxu0 %vm690_vm0, %v4492_v35 }
 0x6c5   : > { %v4525_v1 = vpop.f32.mrf.mxu0 }
 0x6c6   : > { %v4526_v4 = vadd.f32 %v5453_v0, %v4525_v1 }
 0x6c8   : > { %4528 = vst.msk [vmem:[%s396_s12] sm:$0xff] %vm690_vm0, %v4526_v4 }
 0x6c9   : > { %5741 = shalt.err (!%p5738_p3)
}
 0x6ca   : > { %5412 = dma.vmem_to_hbm [thread:$0]  (%p5874_p5), %s4543_s13, 128, %s4545_s16, %s4530_s0  }
 0x6cb PF: > { %p5418_p4 = scmp.ge.s32.totalorder %s5776_s20, 2  ;;  %s4556_s21 = sand.u32 1, %s5764_s17  }
 0x6cc   : > { %s4557_s15 = scalar_lea.sflag [#allocation3], %s4556_s21 }
 0x6cd   : > { %p5415_p7 = pnand %p5418_p4, %p5878_p6 }
 0x6cf   : > { %p5416_p8 = pneg %p5415_p7 }
 0x6d1   : > { %5759 = dma.done.wait (%p5416_p8), %s4557_s15, 128  }
 0x6d2   : > { %5761 = vsyncadd (%p5416_p8), %s4557_s15, 4294967168  ;;  %p21_p9 = scmp.ge.s32.totalorder %s5862_s23, 4   ;;  %s10207_s17 = smov %s5768_s18 }
 0x6d3   : > { %s10208_s18 = smov %s5772_s19  ;;  %s10209_s19 = smov %s5872_s26 }
 0x6d4   : > { %s10210_s20 = smov %s5862_s23  ;;  %23 = sbr.rel (!%p21_p9) target bundleno = 7 (0x7), region = 102 }
 0x6d9   :  { %4563 = vsyncpa [#allocation3], 1 }
 0x6da   :  { %4565 = vsyncpa [#allocation3 + $0x1], 1 }

</bundles_post_ra>
